<compile_context>
chip_gen: v7x
topology: tpu7x:2x2x1
jax: 0.10.0
libtpu: 0.0.40
codegen_flags: <defaults>
</compile_context>

<pallas_src>
import functools

import numpy as np
import jax
import jax.numpy as jnp
from jax.experimental import pallas as pl
from jax.experimental.pallas import tpu as pltpu


def _round_up(n, m):
    return ((n + m - 1) // m) * m


# ----------------------------------------------------------------------------
# Fused kernel: one grid step == one tile of Bt batch elements, stacked on the
# sublane axis with a common per-batch segment length S (RB = Bt*S rows).
# ----------------------------------------------------------------------------
def _disc_kernel(x_ref, w1_ref, b1_ref, w2a_ref, w2b_ref, b2_ref,
                 w3a_ref, w3b_ref, b3_ref, w4_ref, b4_ref,
                 asel_ref, dsel_ref, out_ref, ha_ref, hb_ref, *, RB, RQ):
    f32 = jnp.float32
    bf16 = jnp.bfloat16

    # Zero the scratch tail rows: they are only read by the +1-row shifts /
    # maxpool windows of padding rows, but zeroing keeps everything finite.
    ha_ref[RB:RB + 8, :] = jnp.zeros((8, 512), bf16)
    hb_ref[RB:RB + 8, :] = jnp.zeros((8, 512), bf16)

    # ---- conv1 (C_in->128, K=16, stride 2) + ReLU.
    # Wrapper-built quad-folded im2col => a single matmul, K = 4*16*C_in,
    # lane-dense 512-wide result (4 output positions folded into channels).
    h1 = jnp.dot(x_ref[0], w1_ref[...], preferred_element_type=f32)
    ha_ref[0:RB, :] = jnp.maximum(h1 + b1_ref[...], 0.0).astype(bf16)

    # ---- conv2 (128->256, K=4, stride 2) + ReLU, pair-folded 512-wide output.
    # Both taps are contiguous reads at row offsets 0 / 1 (no strided loads).
    h2 = (jnp.dot(ha_ref[0:RB, :], w2a_ref[...], preferred_element_type=f32)
          + jnp.dot(ha_ref[1:RB + 1, :], w2b_ref[...],
                    preferred_element_type=f32))
    hb_ref[0:RB, :] = jnp.maximum(h2 + b2_ref[...], 0.0).astype(bf16)

    # ---- conv3 (256->512, K=4, stride 2): same shift-by-1 structure, K=512.
    # No ReLU before the pool (PyTorch order).  Reuse ha scratch for h3.
    h3 = (jnp.dot(hb_ref[0:RB, :], w3a_ref[...], preferred_element_type=f32)
          + jnp.dot(hb_ref[1:RB + 1, :], w3b_ref[...],
                    preferred_element_type=f32))
    ha_ref[0:RB, :] = (h3 + b3_ref[...]).astype(bf16)

    # ---- MaxPool1d(4, stride 1) then ReLU (PyTorch order).
    hp = ha_ref[0:RB, :]
    for j in range(1, 4):
        hp = jnp.maximum(hp, ha_ref[j:j + RB, :])
    hp = jnp.maximum(hp, 0.0)                                    # (RB, 512) bf16

    # ---- conv4 (512->1, K=8): one (RB,512)x(512,8) matmul, taps as columns,
    # then a band-diagonal sum  q[r] = sum_j P[r+j, j].
    p = jnp.dot(hp, w4_ref[...], preferred_element_type=f32)     # (RB, 8)
    lane = jax.lax.broadcasted_iota(jnp.int32, (RQ, 8), 1)
    acc = jnp.zeros((RQ, 8), f32)
    for j in range(8):
        acc = acc + jnp.where(lane == j, p[j:j + RQ, :], 0.0)
    q = jnp.sum(acc, axis=-1, keepdims=True)                     # (RQ, 1)

    # De-stack batches + sublane->lane transpose with a tiny selection matmul
    # so the output block is a lane-dense (Bt, S) slab (no trailing-1 store).
    sel = jnp.dot(asel_ref[...], q * dsel_ref[...], preferred_element_type=f32)
    out_ref[0] = sel + b4_ref[...]


# ----------------------------------------------------------------------------
# Wrapper: layout prep in plain JAX, then the single fused pallas_call.
# ----------------------------------------------------------------------------
def discriminator_alpha_forward(x, params, *, batch_tile=None):
    """x: (B, C_in, L) float32; params in PyTorch Conv1d layout."""
    B, Cin, L = x.shape
    L1 = (L - 16) // 2 + 1          # conv1 out length
    L2 = (L1 - 4) // 2 + 1          # conv2 out length
    L3 = (L2 - 4) // 2 + 1          # conv3 out length
    LP = L3 - 3                     # maxpool(4, stride 1) out length
    L5 = LP - 7                     # conv4 out length
    assert L5 >= 1, "input length too short for this architecture"

    L1q = -(-L1 // 4)               # quad-folded conv1 rows (valid)
    L2h = -(-L2 // 2)               # pair-folded conv2 rows (valid)
    # Common per-batch segment length so a whole batch tile stacks on rows and
    # every tap / pool window of a VALID row stays inside its own segment.
    S = _round_up(max(L1q, L2h + 1, L3 + 1, L5 + 7, 8), 8)

    if batch_tile is not None:
        Bt = batch_tile
    elif B >= 16:
        Bt = 8
    else:
        Bt = max(1, B // 2)         # keep >= 2 grid steps (v7x has 2 cores)
    nB = -(-B // Bt)
    B_pad = nB * Bt
    RB = Bt * S
    RQ = RB - 7
    K1 = 16 * Cin

    # ---- input prep: channel-last, zero-pad, quad-folded im2col, batch tiles
    xt = jnp.transpose(x, (0, 2, 1)).astype(jnp.float32)        # (B, L, Cin)
    Lpad = max(L, 8 * (S - 1) + 2 * 3 + 16)
    x_big = jnp.zeros((B_pad, Lpad, Cin), jnp.float32)
    x_big = x_big.at[:B, :L, :].set(xt)
    p_i, g_i, k_i = np.arange(S), np.arange(4), np.arange(16)
    samp = (8 * p_i[:, None, None] + 2 * g_i[None, :, None]
            + k_i[None, None, :]).reshape(-1)                   # sample gather
    x1q = x_big[:, samp, :].reshape(B_pad, S, 4 * K1)
    x1q = x1q.reshape(nB, RB, 4 * K1).astype(jnp.bfloat16)

    # ---- weight re-layouts (once, outside the kernel); bf16 matmul operands
    w1, b1 = params["w1"], params["b1"]                         # (128,Cin,16)
    w2, b2 = params["w2"], params["b2"]                         # (256,128,4)
    w3, b3 = params["w3"], params["b3"]                         # (512,256,4)
    w4, b4 = params["w4"], params["b4"]                         # (1,512,8)

    w1f = jnp.transpose(w1, (2, 1, 0)).reshape(K1, 128)         # [k*Cin+c, o]
    w1q = jnp.zeros((4 * K1, 512), jnp.float32)
    for g in range(4):
        w1q = w1q.at[g * K1:(g + 1) * K1, g * 128:(g + 1) * 128].set(w1f)
    b1q = jnp.tile(b1, 4).reshape(1, 512)

    w2t = jnp.transpose(w2, (2, 1, 0))                          # (4, 128, 256)
    w2a = jnp.zeros((512, 512), jnp.float32)
    w2b = jnp.zeros((512, 512), jnp.float32)
    for k in range(4):
        w2a = w2a.at[k * 128:(k + 1) * 128, 0:256].set(w2t[k])
    w2a = w2a.at[256:384, 256:512].set(w2t[0])
    w2a = w2a.at[384:512, 256:512].set(w2t[1])
    w2b = w2b.at[0:128, 256:512].set(w2t[2])
    w2b = w2b.at[128:256, 256:512].set(w2t[3])
    b2f = jnp.concatenate([b2, b2]).reshape(1, 512)

    w3t = jnp.transpose(w3, (2, 1, 0))                          # (4, 256, 512)
    w3a = jnp.concatenate([w3t[0], w3t[1]], axis=0)             # (512, 512)
    w3b = jnp.concatenate([w3t[2], w3t[3]], axis=0)             # (512, 512)
    b3r = b3.reshape(1, 512)

    w4s = w4[0]                                                 # (512, 8)
    b4r = b4.reshape(1, 1)

    bf = jnp.bfloat16
    w1q, w2a, w2b, w3a, w3b, w4s = (a.astype(bf) for a in
                                    (w1q, w2a, w2b, w3a, w3b, w4s))

    # Selection matrices for the band-diagonal gather / batch de-stacking.
    r_i = np.arange(RQ)
    a_sel = jnp.asarray((r_i[None, :] // S ==
                         np.arange(Bt)[:, None]).astype(np.float32))
    d_sel = jnp.asarray(((r_i[:, None] % S) ==
                         np.arange(S)[None, :]).astype(np.float32))

    kernel = functools.partial(_disc_kernel, RB=RB, RQ=RQ)
    c3 = lambda g: (g, 0, 0)
    c2 = lambda g: (0, 0)

    out = pl.pallas_call(
        kernel,
        out_shape=jax.ShapeDtypeStruct((nB, Bt, S), jnp.float32),
        grid_spec=pltpu.PrefetchScalarGridSpec(
            num_scalar_prefetch=0,
            grid=(nB,),
            in_specs=[
                pl.BlockSpec((1, RB, 4 * K1), c3),              # quad-folded x
                pl.BlockSpec(w1q.shape, c2),
                pl.BlockSpec(b1q.shape, c2),
                pl.BlockSpec(w2a.shape, c2),
                pl.BlockSpec(w2b.shape, c2),
                pl.BlockSpec(b2f.shape, c2),
                pl.BlockSpec(w3a.shape, c2),
                pl.BlockSpec(w3b.shape, c2),
                pl.BlockSpec(b3r.shape, c2),
                pl.BlockSpec(w4s.shape, c2),
                pl.BlockSpec(b4r.shape, c2),
                pl.BlockSpec(a_sel.shape, c2),
                pl.BlockSpec(d_sel.shape, c2),
            ],
            out_specs=pl.BlockSpec((1, Bt, S), c3),
            scratch_shapes=[
                pltpu.VMEM((RB + 8, 512), jnp.bfloat16),        # h1 (quad) / h3
                pltpu.VMEM((RB + 8, 512), jnp.bfloat16),        # h2 (pair-fold)
            ],
        ),
        compiler_params=pltpu.CompilerParams(
            dimension_semantics=("parallel",),
            vmem_limit_bytes=32 * 1024 * 1024,
        ),
    )(x1q, w1q, b1q, w2a, w2b, b2f, w3a, w3b, b3r, w4s, b4r, a_sel, d_sel)

    return out.reshape(B_pad, S)[:B, :L5]                       # (B, L5)


# ----------------------------------------------------------------------------
# Pure-JAX reference (XLA conv / reduce_window) for verification.
# ----------------------------------------------------------------------------
def reference_forward(x, params):
    def conv1d(h, w, b, stride):
        y = jax.lax.conv_general_dilated(
            h, w, window_strides=(stride,), padding="VALID",
            dimension_numbers=("NCH", "OIH", "NCH"))
        return y + b[None, :, None]

    h = jax.nn.relu(conv1d(x, params["w1"], params["b1"], 2))
    h = jax.nn.relu(conv1d(h, params["w2"], params["b2"], 2))
    h = conv1d(h, params["w3"], params["b3"], 2)
    h = jax.lax.reduce_window(h, -jnp.inf, jax.lax.max,
                              (1, 1, 4), (1, 1, 1), "VALID")
    h = jax.nn.relu(h)
    h = conv1d(h, params["w4"], params["b4"], 1)
    return h[:, 0, :]


# ----------------------------------------------------------------------------
# Deterministic PyTorch-style parameter construction.
# ----------------------------------------------------------------------------
def make_params(key, channels_in):
    ks = jax.random.split(key, 8)

    def conv_init(kw, kb, cout, cin, ksz):
        lim = 1.0 / (cin * ksz) ** 0.5
        w = jax.random.uniform(kw, (cout, cin, ksz), jnp.float32, -lim, lim)
        b = jax.random.uniform(kb, (cout,), jnp.float32, -lim, lim)
        return w, b

    w1, b1 = conv_init(ks[0], ks[1], 128, channels_in, 16)
    w2, b2 = conv_init(ks[2], ks[3], 256, 128, 4)
    w3, b3 = conv_init(ks[4], ks[5], 512, 256, 4)
    w4, b4 = conv_init(ks[6], ks[7], 1, 512, 8)
    return dict(w1=w1, b1=b1, w2=w2, b2=b2, w3=w3, b3=b3, w4=w4, b4=b4)


if __name__ == "__main__":
    B, C_IN, L = 4, 4, 160    # conv lengths 73 / 35 / 16, pool 13, out 6
    key = jax.random.PRNGKey(0)
    kx, kp = jax.random.split(key)
    x = jax.random.normal(kx, (B, C_IN, L), jnp.float32)
    params = make_params(kp, C_IN)

    out = discriminator_alpha_forward(x, params)
    out = jax.block_until_ready(out)
    assert out.shape == (B, 6), out.shape

    ref = reference_forward(x, params)
    max_err = float(jnp.max(jnp.abs(out - ref)))
    # bf16 matmul operands (f32 accumulate) => small rounding noise vs f32 ref
    assert jnp.allclose(out, ref, rtol=2e-2, atol=2e-2), max_err

    print("KERNEL_OK")
</pallas_src>

<mosaic_0001>
module attributes {stable_mosaic.version = 11 : i64} {
  func.func @_disc_kernel(%arg0: i32, %arg1: memref<1x48x256xbf16, #tpu.memory_space<vmem>>, %arg2: memref<256x512xbf16, #tpu.memory_space<vmem>>, %arg3: memref<1x512xf32, #tpu.memory_space<vmem>>, %arg4: memref<512x512xbf16, #tpu.memory_space<vmem>>, %arg5: memref<512x512xbf16, #tpu.memory_space<vmem>>, %arg6: memref<1x512xf32, #tpu.memory_space<vmem>>, %arg7: memref<512x512xbf16, #tpu.memory_space<vmem>>, %arg8: memref<512x512xbf16, #tpu.memory_space<vmem>>, %arg9: memref<1x512xf32, #tpu.memory_space<vmem>>, %arg10: memref<512x8xbf16, #tpu.memory_space<vmem>>, %arg11: memref<1x1xf32, #tpu.memory_space<vmem>>, %arg12: memref<2x41xf32, #tpu.memory_space<vmem>>, %arg13: memref<41x24xf32, #tpu.memory_space<vmem>>, %arg14: memref<1x2x24xf32, #tpu.memory_space<vmem>>, %arg15: memref<56x512xbf16, #tpu.memory_space<vmem>>, %arg16: memref<56x512xbf16, #tpu.memory_space<vmem>>) attributes {dimension_semantics = [#tpu.dimension_semantics<parallel>], iteration_bounds = array<i64: 2>, scalar_prefetch = 0 : i64, scratch_operands = 2 : i64, tpu.core_type = #tpu.core_type<tc>, window_params = [{transform_indices = @transform_0, window_bounds = array<i64: 1, 48, 256>}, {pipeline_mode = #tpu.pipeline_mode<synchronous>, transform_indices = @transform_1, window_bounds = array<i64: 256, 512>}, {pipeline_mode = #tpu.pipeline_mode<synchronous>, transform_indices = @transform_2, window_bounds = array<i64: 1, 512>}, {pipeline_mode = #tpu.pipeline_mode<synchronous>, transform_indices = @transform_3, window_bounds = array<i64: 512, 512>}, {pipeline_mode = #tpu.pipeline_mode<synchronous>, transform_indices = @transform_4, window_bounds = array<i64: 512, 512>}, {pipeline_mode = #tpu.pipeline_mode<synchronous>, transform_indices = @transform_5, window_bounds = array<i64: 1, 512>}, {pipeline_mode = #tpu.pipeline_mode<synchronous>, transform_indices = @transform_6, window_bounds = array<i64: 512, 512>}, {pipeline_mode = #tpu.pipeline_mode<synchronous>, transform_indices = @transform_7, window_bounds = array<i64: 512, 512>}, {pipeline_mode = #tpu.pipeline_mode<synchronous>, transform_indices = @transform_8, window_bounds = array<i64: 1, 512>}, {pipeline_mode = #tpu.pipeline_mode<synchronous>, transform_indices = @transform_9, window_bounds = array<i64: 512, 8>}, {pipeline_mode = #tpu.pipeline_mode<synchronous>, transform_indices = @transform_10, window_bounds = array<i64: 1, 1>}, {pipeline_mode = #tpu.pipeline_mode<synchronous>, transform_indices = @transform_11, window_bounds = array<i64: 2, 41>}, {pipeline_mode = #tpu.pipeline_mode<synchronous>, transform_indices = @transform_12, window_bounds = array<i64: 41, 24>}, {transform_indices = @transform_13, window_bounds = array<i64: 1, 2, 24>}]} {
    %cst = arith.constant 0.000000e+00 : bf16
    %0 = vector.broadcast %cst : bf16 to vector<8x512xbf16>
    %c48 = arith.constant 48 : index
    %c0 = arith.constant 0 : index
    %1 = vector.load %arg15[%c48, %c0] : memref<56x512xbf16, #tpu.memory_space<vmem>>, vector<8x512xbf16>
    tpu.vector_store %arg15[%c48, %c0], %0 {strides = array<i32>} : memref<56x512xbf16, #tpu.memory_space<vmem>>, vector<8x512xbf16>,
    %cst_0 = arith.constant 0.000000e+00 : bf16
    %2 = vector.broadcast %cst_0 : bf16 to vector<8x512xbf16>
    %c48_1 = arith.constant 48 : index
    %c0_2 = arith.constant 0 : index
    %3 = vector.load %arg16[%c48_1, %c0_2] : memref<56x512xbf16, #tpu.memory_space<vmem>>, vector<8x512xbf16>
    tpu.vector_store %arg16[%c48_1, %c0_2], %2 {strides = array<i32>} : memref<56x512xbf16, #tpu.memory_space<vmem>>, vector<8x512xbf16>,
    %c0_3 = arith.constant 0 : index
    %c0_4 = arith.constant 0 : index
    %c0_5 = arith.constant 0 : index
    %4 = vector.load %arg1[%c0_3, %c0_4, %c0_5] : memref<1x48x256xbf16, #tpu.memory_space<vmem>>, vector<1x48x256xbf16>
    %5 = vector.shape_cast %4 : vector<1x48x256xbf16> to vector<48x256xbf16>
    %c0_6 = arith.constant 0 : index
    %c0_7 = arith.constant 0 : index
    %6 = vector.load %arg2[%c0_6, %c0_7] : memref<256x512xbf16, #tpu.memory_space<vmem>>, vector<256x512xbf16>
    %cst_8 = arith.constant dense<0.000000e+00> : vector<48x512xf32>
    %7 = tpu.matmul %5, %6, %cst_8 {dimension_numbers = #tpu.dot_dimension_numbers<[1], [0], [0], [1], [0, 0, 1, 1], [], []>} : vector<48x256xbf16>, vector<256x512xbf16>, vector<48x512xf32> -> vector<48x512xf32>
    %c0_9 = arith.constant 0 : index
    %c0_10 = arith.constant 0 : index
    %8 = vector.load %arg3[%c0_9, %c0_10] : memref<1x512xf32, #tpu.memory_space<vmem>>, vector<1x512xf32>
    %9 = vector.broadcast %8 : vector<1x512xf32> to vector<48x512xf32>
    %10 = arith.addf %7, %9 : vector<48x512xf32>
    %cst_11 = arith.constant 0.000000e+00 : f32
    %11 = vector.broadcast %cst_11 : f32 to vector<48x512xf32>
    %12 = arith.maximumf %10, %11 : vector<48x512xf32>
    %13 = arith.truncf %12 : vector<48x512xf32> to vector<48x512xbf16>
    %c0_12 = arith.constant 0 : index
    %c0_13 = arith.constant 0 : index
    %14 = vector.load %arg15[%c0_12, %c0_13] : memref<56x512xbf16, #tpu.memory_space<vmem>>, vector<48x512xbf16>
    tpu.vector_store %arg15[%c0_12, %c0_13], %13 {strides = array<i32>} : memref<56x512xbf16, #tpu.memory_space<vmem>>, vector<48x512xbf16>,
    %c0_14 = arith.constant 0 : index
    %c0_15 = arith.constant 0 : index
    %15 = vector.load %arg15[%c0_14, %c0_15] : memref<56x512xbf16, #tpu.memory_space<vmem>>, vector<48x512xbf16>
    %c0_16 = arith.constant 0 : index
    %c0_17 = arith.constant 0 : index
    %16 = vector.load %arg4[%c0_16, %c0_17] : memref<512x512xbf16, #tpu.memory_space<vmem>>, vector<512x512xbf16>
    %cst_18 = arith.constant dense<0.000000e+00> : vector<48x512xf32>
    %17 = tpu.matmul %15, %16, %cst_18 {dimension_numbers = #tpu.dot_dimension_numbers<[1], [0], [0], [1], [0, 0, 1, 1], [], []>} : vector<48x512xbf16>, vector<512x512xbf16>, vector<48x512xf32> -> vector<48x512xf32>
    %c1 = arith.constant 1 : index
    %c0_19 = arith.constant 0 : index
    %18 = vector.load %arg15[%c1, %c0_19] : memref<56x512xbf16, #tpu.memory_space<vmem>>, vector<48x512xbf16>
    %c0_20 = arith.constant 0 : index
    %c0_21 = arith.constant 0 : index
    %19 = vector.load %arg5[%c0_20, %c0_21] : memref<512x512xbf16, #tpu.memory_space<vmem>>, vector<512x512xbf16>
    %cst_22 = arith.constant dense<0.000000e+00> : vector<48x512xf32>
    %20 = tpu.matmul %18, %19, %cst_22 {dimension_numbers = #tpu.dot_dimension_numbers<[1], [0], [0], [1], [0, 0, 1, 1], [], []>} : vector<48x512xbf16>, vector<512x512xbf16>, vector<48x512xf32> -> vector<48x512xf32>
    %21 = arith.addf %17, %20 : vector<48x512xf32>
    %c0_23 = arith.constant 0 : index
    %c0_24 = arith.constant 0 : index
    %22 = vector.load %arg6[%c0_23, %c0_24] : memref<1x512xf32, #tpu.memory_space<vmem>>, vector<1x512xf32>
    %23 = vector.broadcast %22 : vector<1x512xf32> to vector<48x512xf32>
    %24 = arith.addf %21, %23 : vector<48x512xf32>
    %cst_25 = arith.constant 0.000000e+00 : f32
    %25 = vector.broadcast %cst_25 : f32 to vector<48x512xf32>
    %26 = arith.maximumf %24, %25 : vector<48x512xf32>
    %27 = arith.truncf %26 : vector<48x512xf32> to vector<48x512xbf16>
    %c0_26 = arith.constant 0 : index
    %c0_27 = arith.constant 0 : index
    %28 = vector.load %arg16[%c0_26, %c0_27] : memref<56x512xbf16, #tpu.memory_space<vmem>>, vector<48x512xbf16>
    tpu.vector_store %arg16[%c0_26, %c0_27], %27 {strides = array<i32>} : memref<56x512xbf16, #tpu.memory_space<vmem>>, vector<48x512xbf16>,
    %c0_28 = arith.constant 0 : index
    %c0_29 = arith.constant 0 : index
    %29 = vector.load %arg16[%c0_28, %c0_29] : memref<56x512xbf16, #tpu.memory_space<vmem>>, vector<48x512xbf16>
    %c0_30 = arith.constant 0 : index
    %c0_31 = arith.constant 0 : index
    %30 = vector.load %arg7[%c0_30, %c0_31] : memref<512x512xbf16, #tpu.memory_space<vmem>>, vector<512x512xbf16>
    %cst_32 = arith.constant dense<0.000000e+00> : vector<48x512xf32>
    %31 = tpu.matmul %29, %30, %cst_32 {dimension_numbers = #tpu.dot_dimension_numbers<[1], [0], [0], [1], [0, 0, 1, 1], [], []>} : vector<48x512xbf16>, vector<512x512xbf16>, vector<48x512xf32> -> vector<48x512xf32>
    %c1_33 = arith.constant 1 : index
    %c0_34 = arith.constant 0 : index
    %32 = vector.load %arg16[%c1_33, %c0_34] : memref<56x512xbf16, #tpu.memory_space<vmem>>, vector<48x512xbf16>
    %c0_35 = arith.constant 0 : index
    %c0_36 = arith.constant 0 : index
    %33 = vector.load %arg8[%c0_35, %c0_36] : memref<512x512xbf16, #tpu.memory_space<vmem>>, vector<512x512xbf16>
    %cst_37 = arith.constant dense<0.000000e+00> : vector<48x512xf32>
    %34 = tpu.matmul %32, %33, %cst_37 {dimension_numbers = #tpu.dot_dimension_numbers<[1], [0], [0], [1], [0, 0, 1, 1], [], []>} : vector<48x512xbf16>, vector<512x512xbf16>, vector<48x512xf32> -> vector<48x512xf32>
    %35 = arith.addf %31, %34 : vector<48x512xf32>
    %c0_38 = arith.constant 0 : index
    %c0_39 = arith.constant 0 : index
    %36 = vector.load %arg9[%c0_38, %c0_39] : memref<1x512xf32, #tpu.memory_space<vmem>>, vector<1x512xf32>
    %37 = vector.broadcast %36 : vector<1x512xf32> to vector<48x512xf32>
    %38 = arith.addf %35, %37 : vector<48x512xf32>
    %39 = arith.truncf %38 : vector<48x512xf32> to vector<48x512xbf16>
    %c0_40 = arith.constant 0 : index
    %c0_41 = arith.constant 0 : index
    %40 = vector.load %arg15[%c0_40, %c0_41] : memref<56x512xbf16, #tpu.memory_space<vmem>>, vector<48x512xbf16>
    tpu.vector_store %arg15[%c0_40, %c0_41], %39 {strides = array<i32>} : memref<56x512xbf16, #tpu.memory_space<vmem>>, vector<48x512xbf16>,
    %c0_42 = arith.constant 0 : index
    %c0_43 = arith.constant 0 : index
    %41 = vector.load %arg15[%c0_42, %c0_43] : memref<56x512xbf16, #tpu.memory_space<vmem>>, vector<48x512xbf16>
    %c1_44 = arith.constant 1 : index
    %c0_45 = arith.constant 0 : index
    %42 = vector.load %arg15[%c1_44, %c0_45] : memref<56x512xbf16, #tpu.memory_space<vmem>>, vector<48x512xbf16>
    %43 = arith.maximumf %41, %42 : vector<48x512xbf16>
    %c2 = arith.constant 2 : index
    %c0_46 = arith.constant 0 : index
    %44 = vector.load %arg15[%c2, %c0_46] : memref<56x512xbf16, #tpu.memory_space<vmem>>, vector<48x512xbf16>
    %45 = arith.maximumf %43, %44 : vector<48x512xbf16>
    %c3 = arith.constant 3 : index
    %c0_47 = arith.constant 0 : index
    %46 = vector.load %arg15[%c3, %c0_47] : memref<56x512xbf16, #tpu.memory_space<vmem>>, vector<48x512xbf16>
    %47 = arith.maximumf %45, %46 : vector<48x512xbf16>
    %cst_48 = arith.constant 0.000000e+00 : bf16
    %48 = vector.broadcast %cst_48 : bf16 to vector<48x512xbf16>
    %49 = arith.maximumf %47, %48 : vector<48x512xbf16>
    %c0_49 = arith.constant 0 : index
    %c0_50 = arith.constant 0 : index
    %50 = vector.load %arg10[%c0_49, %c0_50] : memref<512x8xbf16, #tpu.memory_space<vmem>>, vector<512x8xbf16>
    %cst_51 = arith.constant dense<0.000000e+00> : vector<48x8xf32>
    %51 = tpu.matmul %49, %50, %cst_51 {dimension_numbers = #tpu.dot_dimension_numbers<[1], [0], [0], [1], [0, 0, 1, 1], [], []>} : vector<48x512xbf16>, vector<512x8xbf16>, vector<48x8xf32> -> vector<48x8xf32>
    %52 = tpu.iota {dimensions = array<i32: 1>} : vector<41x8xi32>
    %cst_52 = arith.constant 0.000000e+00 : f32
    %53 = vector.broadcast %cst_52 : f32 to vector<41x8xf32>
    %c0_i32 = arith.constant 0 : i32
    %54 = vector.broadcast %c0_i32 : i32 to vector<41x8xi32>
    %55 = arith.cmpi eq, %52, %54 : vector<41x8xi32>
    %56 = vector.extract_strided_slice %51 {offsets = [0, 0], sizes = [41, 8], strides = [1, 1]} : vector<48x8xf32> to vector<41x8xf32>
    %cst_53 = arith.constant 0.000000e+00 : f32
    %57 = vector.broadcast %cst_53 : f32 to vector<41x8xf32>
    %58 = arith.select %55, %56, %57 : vector<41x8xi1>, vector<41x8xf32>
    %59 = arith.addf %53, %58 : vector<41x8xf32>
    %c1_i32 = arith.constant 1 : i32
    %60 = vector.broadcast %c1_i32 : i32 to vector<41x8xi32>
    %61 = arith.cmpi eq, %52, %60 : vector<41x8xi32>
    %62 = vector.extract_strided_slice %51 {offsets = [1, 0], sizes = [41, 8], strides = [1, 1]} : vector<48x8xf32> to vector<41x8xf32>
    %cst_54 = arith.constant 0.000000e+00 : f32
    %63 = vector.broadcast %cst_54 : f32 to vector<41x8xf32>
    %64 = arith.select %61, %62, %63 : vector<41x8xi1>, vector<41x8xf32>
    %65 = arith.addf %59, %64 : vector<41x8xf32>
    %c2_i32 = arith.constant 2 : i32
    %66 = vector.broadcast %c2_i32 : i32 to vector<41x8xi32>
    %67 = arith.cmpi eq, %52, %66 : vector<41x8xi32>
    %68 = vector.extract_strided_slice %51 {offsets = [2, 0], sizes = [41, 8], strides = [1, 1]} : vector<48x8xf32> to vector<41x8xf32>
    %cst_55 = arith.constant 0.000000e+00 : f32
    %69 = vector.broadcast %cst_55 : f32 to vector<41x8xf32>
    %70 = arith.select %67, %68, %69 : vector<41x8xi1>, vector<41x8xf32>
    %71 = arith.addf %65, %70 : vector<41x8xf32>
    %c3_i32 = arith.constant 3 : i32
    %72 = vector.broadcast %c3_i32 : i32 to vector<41x8xi32>
    %73 = arith.cmpi eq, %52, %72 : vector<41x8xi32>
    %74 = vector.extract_strided_slice %51 {offsets = [3, 0], sizes = [41, 8], strides = [1, 1]} : vector<48x8xf32> to vector<41x8xf32>
    %cst_56 = arith.constant 0.000000e+00 : f32
    %75 = vector.broadcast %cst_56 : f32 to vector<41x8xf32>
    %76 = arith.select %73, %74, %75 : vector<41x8xi1>, vector<41x8xf32>
    %77 = arith.addf %71, %76 : vector<41x8xf32>
    %c4_i32 = arith.constant 4 : i32
    %78 = vector.broadcast %c4_i32 : i32 to vector<41x8xi32>
    %79 = arith.cmpi eq, %52, %78 : vector<41x8xi32>
    %80 = vector.extract_strided_slice %51 {offsets = [4, 0], sizes = [41, 8], strides = [1, 1]} : vector<48x8xf32> to vector<41x8xf32>
    %cst_57 = arith.constant 0.000000e+00 : f32
    %81 = vector.broadcast %cst_57 : f32 to vector<41x8xf32>
    %82 = arith.select %79, %80, %81 : vector<41x8xi1>, vector<41x8xf32>
    %83 = arith.addf %77, %82 : vector<41x8xf32>
    %c5_i32 = arith.constant 5 : i32
    %84 = vector.broadcast %c5_i32 : i32 to vector<41x8xi32>
    %85 = arith.cmpi eq, %52, %84 : vector<41x8xi32>
    %86 = vector.extract_strided_slice %51 {offsets = [5, 0], sizes = [41, 8], strides = [1, 1]} : vector<48x8xf32> to vector<41x8xf32>
    %cst_58 = arith.constant 0.000000e+00 : f32
    %87 = vector.broadcast %cst_58 : f32 to vector<41x8xf32>
    %88 = arith.select %85, %86, %87 : vector<41x8xi1>, vector<41x8xf32>
    %89 = arith.addf %83, %88 : vector<41x8xf32>
    %c6_i32 = arith.constant 6 : i32
    %90 = vector.broadcast %c6_i32 : i32 to vector<41x8xi32>
    %91 = arith.cmpi eq, %52, %90 : vector<41x8xi32>
    %92 = vector.extract_strided_slice %51 {offsets = [6, 0], sizes = [41, 8], strides = [1, 1]} : vector<48x8xf32> to vector<41x8xf32>
    %cst_59 = arith.constant 0.000000e+00 : f32
    %93 = vector.broadcast %cst_59 : f32 to vector<41x8xf32>
    %94 = arith.select %91, %92, %93 : vector<41x8xi1>, vector<41x8xf32>
    %95 = arith.addf %89, %94 : vector<41x8xf32>
    %c7_i32 = arith.constant 7 : i32
    %96 = vector.broadcast %c7_i32 : i32 to vector<41x8xi32>
    %97 = arith.cmpi eq, %52, %96 : vector<41x8xi32>
    %98 = vector.extract_strided_slice %51 {offsets = [7, 0], sizes = [41, 8], strides = [1, 1]} : vector<48x8xf32> to vector<41x8xf32>
    %cst_60 = arith.constant 0.000000e+00 : f32
    %99 = vector.broadcast %cst_60 : f32 to vector<41x8xf32>
    %100 = arith.select %97, %98, %99 : vector<41x8xi1>, vector<41x8xf32>
    %101 = arith.addf %95, %100 : vector<41x8xf32>
    %cst_61 = arith.constant dense<0.000000e+00> : vector<41xf32>
    %102 = vector.multi_reduction <add>, %101, %cst_61 [1] : vector<41x8xf32> to vector<41xf32>
    %103 = vector.shape_cast %102 : vector<41xf32> to vector<41x1xf32>
    %c0_62 = arith.constant 0 : index
    %c0_63 = arith.constant 0 : index
    %104 = vector.load %arg12[%c0_62, %c0_63] : memref<2x41xf32, #tpu.memory_space<vmem>>, vector<2x41xf32>
    %c0_64 = arith.constant 0 : index
    %c0_65 = arith.constant 0 : index
    %105 = vector.load %arg13[%c0_64, %c0_65] : memref<41x24xf32, #tpu.memory_space<vmem>>, vector<41x24xf32>
    %106 = vector.broadcast %103 : vector<41x1xf32> to vector<41x24xf32>
    %107 = arith.mulf %106, %105 : vector<41x24xf32>
    %cst_66 = arith.constant dense<0.000000e+00> : vector<2x24xf32>
    %108 = tpu.matmul %104, %107, %cst_66 {dimension_numbers = #tpu.dot_dimension_numbers<[1], [0], [0], [1], [0, 0, 1, 1], [], []>} : vector<2x41xf32>, vector<41x24xf32>, vector<2x24xf32> -> vector<2x24xf32>
    %c0_67 = arith.constant 0 : index
    %c0_68 = arith.constant 0 : index
    %109 = vector.load %arg11[%c0_67, %c0_68] : memref<1x1xf32, #tpu.memory_space<vmem>>, vector<1x1xf32>
    %110 = vector.broadcast %109 : vector<1x1xf32> to vector<2x24xf32>
    %111 = arith.addf %108, %110 : vector<2x24xf32>
    %c0_69 = arith.constant 0 : index
    %c0_70 = arith.constant 0 : index
    %c0_71 = arith.constant 0 : index
    %112 = vector.load %arg14[%c0_69, %c0_70, %c0_71] : memref<1x2x24xf32, #tpu.memory_space<vmem>>, vector<1x2x24xf32>
    %113 = vector.shape_cast %112 : vector<1x2x24xf32> to vector<2x24xf32>
    %114 = vector.shape_cast %111 : vector<2x24xf32> to vector<1x2x24xf32>
    tpu.vector_store %arg14[%c0_69, %c0_70, %c0_71], %114 {strides = array<i32>} : memref<1x2x24xf32, #tpu.memory_space<vmem>>, vector<1x2x24xf32>,
    return
  }
  func.func @transform_0(%arg0: i32) -> (i32, i32, i32) {
    %c0_i32 = arith.constant 0 : i32
    %c0_i32_0 = arith.constant 0 : i32
    %c0_i32_1 = arith.constant 0 : i32
    return %arg0, %c0_i32, %c0_i32_0 : i32, i32, i32
  }
  func.func @transform_1(%arg0: i32) -> (i32, i32) {
    %c0_i32 = arith.constant 0 : i32
    %c0_i32_0 = arith.constant 0 : i32
    %c0_i32_1 = arith.constant 0 : i32
    return %c0_i32, %c0_i32_0 : i32, i32
  }
  func.func @transform_2(%arg0: i32) -> (i32, i32) {
    %c0_i32 = arith.constant 0 : i32
    %c0_i32_0 = arith.constant 0 : i32
    %c0_i32_1 = arith.constant 0 : i32
    return %c0_i32, %c0_i32_0 : i32, i32
  }
  func.func @transform_3(%arg0: i32) -> (i32, i32) {
    %c0_i32 = arith.constant 0 : i32
    %c0_i32_0 = arith.constant 0 : i32
    %c0_i32_1 = arith.constant 0 : i32
    return %c0_i32, %c0_i32_0 : i32, i32
  }
  func.func @transform_4(%arg0: i32) -> (i32, i32) {
    %c0_i32 = arith.constant 0 : i32
    %c0_i32_0 = arith.constant 0 : i32
    %c0_i32_1 = arith.constant 0 : i32
    return %c0_i32, %c0_i32_0 : i32, i32
  }
  func.func @transform_5(%arg0: i32) -> (i32, i32) {
    %c0_i32 = arith.constant 0 : i32
    %c0_i32_0 = arith.constant 0 : i32
    %c0_i32_1 = arith.constant 0 : i32
    return %c0_i32, %c0_i32_0 : i32, i32
  }
  func.func @transform_6(%arg0: i32) -> (i32, i32) {
    %c0_i32 = arith.constant 0 : i32
    %c0_i32_0 = arith.constant 0 : i32
    %c0_i32_1 = arith.constant 0 : i32
    return %c0_i32, %c0_i32_0 : i32, i32
  }
  func.func @transform_7(%arg0: i32) -> (i32, i32) {
    %c0_i32 = arith.constant 0 : i32
    %c0_i32_0 = arith.constant 0 : i32
    %c0_i32_1 = arith.constant 0 : i32
    return %c0_i32, %c0_i32_0 : i32, i32
  }
  func.func @transform_8(%arg0: i32) -> (i32, i32) {
    %c0_i32 = arith.constant 0 : i32
    %c0_i32_0 = arith.constant 0 : i32
    %c0_i32_1 = arith.constant 0 : i32
    return %c0_i32, %c0_i32_0 : i32, i32
  }
  func.func @transform_9(%arg0: i32) -> (i32, i32) {
    %c0_i32 = arith.constant 0 : i32
    %c0_i32_0 = arith.constant 0 : i32
    %c0_i32_1 = arith.constant 0 : i32
    return %c0_i32, %c0_i32_0 : i32, i32
  }
  func.func @transform_10(%arg0: i32) -> (i32, i32) {
    %c0_i32 = arith.constant 0 : i32
    %c0_i32_0 = arith.constant 0 : i32
    %c0_i32_1 = arith.constant 0 : i32
    return %c0_i32, %c0_i32_0 : i32, i32
  }
  func.func @transform_11(%arg0: i32) -> (i32, i32) {
    %c0_i32 = arith.constant 0 : i32
    %c0_i32_0 = arith.constant 0 : i32
    %c0_i32_1 = arith.constant 0 : i32
    return %c0_i32, %c0_i32_0 : i32, i32
  }
  func.func @transform_12(%arg0: i32) -> (i32, i32) {
    %c0_i32 = arith.constant 0 : i32
    %c0_i32_0 = arith.constant 0 : i32
    %c0_i32_1 = arith.constant 0 : i32
    return %c0_i32, %c0_i32_0 : i32, i32
  }
  func.func @transform_13(%arg0: i32) -> (i32, i32, i32) {
    %c0_i32 = arith.constant 0 : i32
    %c0_i32_0 = arith.constant 0 : i32
    %c0_i32_1 = arith.constant 0 : i32
    return %arg0, %c0_i32, %c0_i32_0 : i32, i32, i32
  }
}

</mosaic_0001>

<bundles_post_ra>
// kernel: tpu_custom_call.1
= control target key start
LH: loop header
LB: loop body
LE: loop exit
PB: predicated region body
PF: predicated region fallthrough
CT: control target
= control target key end

     0   :  { %s10949_s0 = inlined_call_operand.vmem [shape: bf16[2,48,256], index: 0, kind: input, shape index: {}]   ;;  %s10950_s1 = inlined_call_operand.hbm [shape: bf16[256,512], index: 1, kind: input, shape index: {}]   ;;  %s10951_s2 = inlined_call_operand.vmem [shape: f32[1,512], index: 2, kind: input, shape index: {}]   ;;  %s10952_s3 = inlined_call_operand.hbm [shape: bf16[512,512], index: 3, kind: input, shape index: {}]   ;;  %s10953_s4 = inlined_call_operand.hbm [shape: bf16[512,512], index: 4, kind: input, shape index: {}]   ;;  %s10954_s5 = inlined_call_operand.vmem [shape: f32[1,512], index: 5, kind: input, shape index: {}]   ;;  %s10955_s6 = inlined_call_operand.hbm [shape: bf16[512,512], index: 6, kind: input, shape index: {}]   ;;  %s10956_s7 = inlined_call_operand.hbm [shape: bf16[512,512], index: 7, kind: input, shape index: {}]   ;;  %s10957_s8 = inlined_call_operand.vmem [shape: f32[1,512], index: 8, kind: input, shape index: {}]   ;;  %s10958_s9 = inlined_call_operand.vmem [shape: bf16[512,8], index: 9, kind: input, shape index: {}]   ;;  %s10959_s10 = inlined_call_operand.<no memory space> [shape: f32[1,1], index: 10, kind: input, shape index: {}]   ;;  %s10960_s11 = inlined_call_operand.vmem [shape: f32[2,41], index: 11, kind: input, shape index: {}]   ;;  %s10961_s12 = inlined_call_operand.vmem [shape: f32[41,24], index: 12, kind: input, shape index: {}]   ;;  %s10962_s13 = inlined_call_operand.hbm [shape: f32[2,2,24], index: 13, kind: output, shape index: {}]  }
   0x1   :  { %10975 = sst [smem:[#allocation26_spill]] %s10952_s3  ;;  %v18_v0 = vstv %s10959_s10 }
   0x2   :  { %10976 = sst [smem:[#allocation27_spill]] %s10962_s13  ;;  %19 = vst [vmem:[#allocation4] sm:$0x1] %v18_v0 }
   0x3   :  { %20 = vsyncpa [#allocation6], 0 }
   0x4   :  { %21 = vsyncpa [#allocation9], 0 }
   0x5   :  { %22 = vsyncpa [#allocation12], 0 }
   0x6   :  { %23 = vsyncpa [#allocation7], 0 }
   0x7   :  { %25 = vsyncpa [#allocation7 + $0x1], 0  ;;  %s9829_s27 = smov 0   ;;  %s9831_s28 = smov 0  }
   0x8   :  { %s9833_s29 = smov 0   ;;  %s9835_s30 = smov 0  }
   0x9 LB: > { %10977 = sst [smem:[#allocation19_spill]] %s9729_s27  ;;  %s9850_s10 = sadd.s32 4294967295, %s9741_s30   ;;  %s9741_s30 = sphi %s9835_s30, %s11010_s30   ;;  %s9737_s29 = sphi %s9833_s29, %s11012_s29   ;;  %s9733_s28 = sphi %s9831_s28, %s11014_s28   ;;  %s9729_s27 = sphi %s9829_s27, %s11013_s27  }
   0xa   : > { %10978 = sst [smem:[#allocation20_spill]] %s9737_s29  ;;  %s7434_s14 = sadd.s32 4294967294, %s9741_s30  }
   0xb   : > { %10979 = sst [smem:[#allocation21_spill]] %s9741_s30  ;;  %s9854_s15 = sadd.s32 1, %s9741_s30  }
   0xc   : > { %10980 = sst [smem:[#allocation22_spill]] %s9854_s15  ;;  %s316_s16 = sadd.s32 1, %s9737_s29 }
   0xd   : > { %s313_s17 = ssub.s32 %s9741_s30, %s9854_s15  ;;  %p326_p0 = scmp.ne.s32.totalorder %s9737_s29, %s9733_s28 }
   0xe   : > { %p314_p1 = scmp.eq.s32.totalorder %s313_s17, 0  ;;  %p327_p2 = scmp.eq.s32.totalorder %s9850_s10, 1 }
   0xf   : > { %p332_p3 = scmp.ne.s32.totalorder %s9733_s28, %s9729_s27  ;;  %p333_p4 = scmp.eq.s32.totalorder %s7434_s14, 1 }
  0x10   : > { %s9865_s18 = scalar_select %p314_p1, %s9737_s29, %s316_s16  }
  0x11   : > { %p9867_p5 = por %p327_p2, %p326_p0  ;;  %p9871_p6 = por %p333_p4, %p332_p3 }
  0x12   : > { %10981 = sst [smem:[#allocation23_spill]] %s9865_s18  ;;  %p7435_p7 = scmp.ge.s32.totalorder %s9741_s30, 1 }
  0x13   : > { %s10982_s19 = scalar_select %p9867_p5, 1, 0 }
  0x14   : > { %s10984_s20 = scalar_select %p9871_p6, 1, 0 }
  0x15   : > { %10983 = sst [smem:[#allocation24_spill]] %s10982_s19  ;;  %p340_p8 = scmp.lt.s32.totalorder %s9741_s30, 3 }
  0x16   : > { %10985 = sst [smem:[#allocation25_spill]] %s10984_s20  ;;  %p10967_p9 = scmp.eq.s32.totalorder %s9850_s10, 0 }
  0x17   : > { %p9878_p10 = pnand %p7435_p7, %p340_p8  ;;  %s9743_s22 = smov [#allocation8]  }
  0x18   : > { %s368_s23 = sshll.u32 %s9743_s22, 4  ;;  %s9744_s25 = smov [#allocation11]   ;;  %s9884_s23 = int_to_ptr.vmem [resolvable:$true] %s368_s23 }
  0x19   : > { %s10986_s21 = scalar_select %p9878_p10, 1, 0 }
  0x1a   : > { %p8480_p11 = pneg %p9878_p10  ;;  %s397_s26 = sshll.u32 %s9744_s25, 4  ;;  %s9892_s26 = int_to_ptr.vmem [resolvable:$true] %s397_s26 }
  0x1b   : > { %s9745_s14 = smov [#allocation5]   ;;  %s10988_s3 = sld [smem:[#allocation26_spill]] }
  0x1c   : > { %p9888_p12 = pnand %p10967_p9, %p8480_p11  ;;  %s9894_s16 = sshll.u32 %s9745_s14, 4  ;;  %s353_s16 = int_to_ptr.vmem [resolvable:$true] %s9894_s16 }
  0x1e   : > { %p9904_p0 = pneg %p9888_p12 }
  0x21   : > { %s9527_s29 = scalar_lea.hbm %s10988_s3, 16384 }
  0x22   : > { %p9528_p13 = scmp.ne.s32.totalorder %s10988_s3, %s9527_s29  ;;  %p9534_p3 = scmp.lt.u32.totalorder %s9527_s29, %s10988_s3 }
  0x24   : > { %p9530_p1 = pnand %p9904_p0, %p9528_p13 }
  0x26   : > { %p9531_p2 = pneg %p9530_p1 }
  0x28   : > { %p9536_p4 = pnand %p9534_p3, %p9531_p2 }
  0x2a   : > { %9539 = shalt.err (!%p9536_p4)
}
  0x2b   : > { %s9540_s15 = scalar_lea.vmem %s9884_s23, 16384  ;;  %p9548_p9 = scmp.lt.s32.totalorder %s9884_s23, %s9884_s23 }
  0x2c   : > { %p9541_p7 = scmp.ne.s32.totalorder %s9884_s23, %s9540_s15  ;;  %p9549_p6 = scmp.lt.s32.totalorder %s9540_s15, %s9540_s15 }
  0x2e   : > { %p9543_p8 = pnand %p9541_p7, %p9904_p0  ;;  %p9550_p13 = por %p9549_p6, %p9548_p9 }
  0x30   : > { %p9544_p11 = pneg %p9543_p8 }
  0x32   : > { %p9551_p1 = pnand %p9550_p13, %p9544_p11 }
  0x34   : > { %9554 = shalt.err (!%p9551_p1)
}
  0x35   : > { %s9746_s18 = smov 256   ;;  %s9747_s29 = smov 16  }
  0x36   : > { %8486 = dma.hbm_to_vmem [thread:$0]  (!%p9888_p12), %s10988_s3, 16384, %s9884_s23, [#allocation9], %s9746_s18, %s9746_s18, %s9747_s29  }
  0x37   : > { %s9555_s15 = scalar_lea.hbm %s10955_s6, 16384 }
  0x38   : > { %p9556_p6 = scmp.ne.s32.totalorder %s10955_s6, %s9555_s15  ;;  %p9562_p3 = scmp.lt.u32.totalorder %s9555_s15, %s10955_s6 }
  0x3a   : > { %p9558_p9 = pnand %p9556_p6, %p9904_p0 }
  0x3c   : > { %p9559_p2 = pneg %p9558_p9 }
  0x3e   : > { %p9564_p4 = pnand %p9562_p3, %p9559_p2 }
  0x40   : > { %9567 = shalt.err (!%p9564_p4)
}
  0x41   : > { %s9568_s23 = scalar_lea.vmem %s9892_s26, 16384  ;;  %p9576_p13 = scmp.lt.s32.totalorder %s9892_s26, %s9892_s26 }
  0x42   : > { %p9569_p7 = scmp.ne.s32.totalorder %s9892_s26, %s9568_s23  ;;  %p9577_p1 = scmp.lt.s32.totalorder %s9568_s23, %s9568_s23 }
  0x44   : > { %p9571_p8 = pnand %p9569_p7, %p9904_p0  ;;  %p9578_p6 = por %p9577_p1, %p9576_p13 }
  0x46   : > { %p9572_p11 = pneg %p9571_p8 }
  0x48   : > { %p9579_p9 = pnand %p9578_p6, %p9572_p11 }
  0x4a   : > { %9582 = shalt.err (!%p9579_p9)
}
  0x4b   : > { %8492 = dma.hbm_to_vmem [thread:$0]  (!%p9888_p12), %s10955_s6, 16384, %s9892_s26, [#allocation12], %s9746_s18, %s9746_s18, %s9747_s29  }
  0x4c   : > { %s9583_s17 = scalar_lea.hbm %s10950_s1, 8192 }
  0x4d   : > { %p9584_p2 = scmp.ne.s32.totalorder %s10950_s1, %s9583_s17  ;;  %p9590_p7 = scmp.lt.u32.totalorder %s9583_s17, %s10950_s1 }
  0x4f   : > { %p9586_p3 = pnand %p9584_p2, %p9904_p0 }
  0x51   : > { %p9587_p4 = pneg %p9586_p3 }
  0x53   : > { %p9592_p8 = pnand %p9590_p7, %p9587_p4 }
  0x55   : > { %9595 = shalt.err (!%p9592_p8)
}
  0x56   : > { %s9596_s23 = scalar_lea.vmem %s353_s16, 8192  ;;  %p9604_p6 = scmp.lt.s32.totalorder %s353_s16, %s353_s16 }
  0x57   : > { %p9597_p11 = scmp.ne.s32.totalorder %s353_s16, %s9596_s23  ;;  %p9605_p9 = scmp.lt.s32.totalorder %s9596_s23, %s9596_s23 }
  0x59   : > { %p9599_p13 = pnand %p9597_p11, %p9904_p0  ;;  %p9606_p5 = por %p9605_p9, %p9604_p6 }
  0x5b   : > { %p9600_p1 = pneg %p9599_p13 }
  0x5d   : > { %p9607_p10 = pnand %p9606_p5, %p9600_p1 }
  0x5f   : > { %9610 = shalt.err (!%p9607_p10)
}
  0x60   : > { %8483 = dma.hbm_to_vmem [thread:$0]  (!%p9888_p12), %s10950_s1, 8192, %s353_s16, [#allocation6], %s9746_s18, %s9746_s18, %s9747_s29  }
  0x61   : > { %s9748_s27 = smov [#allocation10]   ;;  %s9749_s19 = smov [#allocation13]  }
  0x62   : > { %s381_s30 = sshll.u32 %s9748_s27, 4  ;;  %s410_s17 = sshll.u32 %s9749_s19, 4  ;;  %s382_s30 = int_to_ptr.vmem [resolvable:$true] %s381_s30  ;;  %s411_s17 = int_to_ptr.vmem [resolvable:$true] %s410_s17 }
  0x63   : > { %s9611_s14 = scalar_lea.hbm %s10953_s4, 16384 }
  0x64   : > { %p9612_p5 = scmp.ne.s32.totalorder %s10953_s4, %s9611_s14  ;;  %p9618_p3 = scmp.lt.u32.totalorder %s9611_s14, %s10953_s4 }
  0x66   : > { %p9614_p10 = pnand %p9612_p5, %p9904_p0 }
  0x68   : > { %p9615_p2 = pneg %p9614_p10 }
  0x6a   : > { %p9620_p4 = pnand %p9618_p3, %p9615_p2 }
  0x6c   : > { %9623 = shalt.err (!%p9620_p4)
}
  0x6d   : > { %s9624_s16 = scalar_lea.vmem %s382_s30, 16384  ;;  %p9632_p13 = scmp.lt.s32.totalorder %s382_s30, %s382_s30 }
  0x6e   : > { %p9625_p7 = scmp.ne.s32.totalorder %s382_s30, %s9624_s16  ;;  %p9633_p1 = scmp.lt.s32.totalorder %s9624_s16, %s9624_s16 }
  0x70   : > { %p9627_p8 = pnand %p9625_p7, %p9904_p0  ;;  %p9634_p6 = por %p9633_p1, %p9632_p13 }
  0x72   : > { %p9628_p11 = pneg %p9627_p8 }
  0x74   : > { %p9635_p9 = pnand %p9634_p6, %p9628_p11 }
  0x76   : > { %9638 = shalt.err (!%p9635_p9)
}
  0x77   : > { %8489 = dma.hbm_to_vmem [thread:$0]  (!%p9888_p12), %s10953_s4, 16384, %s382_s30, [#allocation9], %s9746_s18, %s9746_s18, %s9747_s29  }
  0x78   : > { %s9639_s22 = scalar_lea.hbm %s10956_s7, 16384 }
  0x79   : > { %p9640_p5 = scmp.ne.s32.totalorder %s10956_s7, %s9639_s22  ;;  %p9646_p3 = scmp.lt.u32.totalorder %s9639_s22, %s10956_s7 }
  0x7b   : > { %p9642_p10 = pnand %p9640_p5, %p9904_p0 }
  0x7d   : > { %p9643_p2 = pneg %p9642_p10 }
  0x7f   : > { %p9648_p4 = pnand %p9646_p3, %p9643_p2 }
  0x81   : > { %9651 = shalt.err (!%p9648_p4)
}
  0x82   : > { %s9652_s26 = scalar_lea.vmem %s411_s17, 16384  ;;  %p9660_p13 = scmp.lt.s32.totalorder %s411_s17, %s411_s17 }
  0x83   : > { %p9653_p7 = scmp.ne.s32.totalorder %s411_s17, %s9652_s26  ;;  %p9661_p1 = scmp.lt.s32.totalorder %s9652_s26, %s9652_s26 }
  0x85   : > { %p9655_p8 = pnand %p9653_p7, %p9904_p0  ;;  %p9662_p6 = por %p9661_p1, %p9660_p13 }
  0x87   : > { %p9656_p11 = pneg %p9655_p8 }
  0x89   : > { %p9663_p9 = pnand %p9662_p6, %p9656_p11 }
  0x8b   : > { %9666 = shalt.err (!%p9663_p9)
}
  0x8c   : > { %8495 = dma.hbm_to_vmem [thread:$0]  (!%p9888_p12), %s10956_s7, 16384, %s411_s17, [#allocation12], %s9746_s18, %s9746_s18, %s9747_s29  }
  0x8d   : > { %p10990_p5 = scmp.ne.s32.totalorder %s10986_s21, 0 }
  0x8e   : > { %p10991_p0 = scmp.eq.s32.totalorder (!%p10990_p5), %s9850_s10, 0 }
  0x8f   : > { %449 = sbr.rel (%p10990_p5) target bundleno = 1998 (0x7ce), region = 72 }
  0x96   : > { %9712 = dma.done.wait (%p10991_p0), [#allocation6], 8192   ;;  %p10992_p10 = pmov %p10991_p0 }
  0x97   : > { %p10993_p2 = pmov %p10991_p0 }
  0x98   : > { %9714 = vsyncadd (%p10992_p10), [#allocation6], 4294959104 }
  0x99   : > { %9716 = dma.done.wait (%p10993_p2), [#allocation9], 32768   ;;  %p10994_p3 = pmov %p10991_p0 }
  0x9a   : > { %p10995_p4 = pmov %p10991_p0 }
  0x9b   : > { %9718 = vsyncadd (%p10994_p3), [#allocation9], 4294934528 }
  0x9c   : > { %9720 = dma.done.wait (%p10995_p4), [#allocation12], 32768   ;;  %p10996_p12 = pmov %p10991_p0 }
  0x9d   : > { %v8556_v1 = vld [vmem:[#allocation5 + $0x4] ss:$16 sps:$4 sm:$0xff]   ;;  %v8558_v2 = vld [vmem:[#allocation5] ss:$16 sps:$4 sm:$0xff]   ;;  %p509_p7 = scmp.lt.s32.totalorder %s9850_s10, 1  ;;  %vm6293_vm3 = vcmask 1042432  }
  0x9e   : > { %9722 = vsyncadd (%p10996_p12), [#allocation12], 4294934528  ;;  %961 = vmatprep.subr.bf16.mxu0 %v8556_v1  ;;  %v8559_v3 = vld [vmem:[#allocation5 + $0x24] ss:$16 sps:$4 sm:$0xff]   ;;  %v8561_v4 = vld [vmem:[#allocation5 + $0x20] ss:$16 sps:$4 sm:$0xff]  }
  0x9f   : > { %962 = vmatpush1.bf16.msra.mxu0 %v8558_v2  ;;  %v8562_v5 = vld [vmem:[#allocation5 + $0x44] ss:$16 sps:$4 sm:$0xff]   ;;  %v8564_v6 = vld [vmem:[#allocation5 + $0x40] ss:$16 sps:$4 sm:$0xff]   ;;  %s510_s20 = scalar_select %p509_p7, %s9850_s10, 1  ;;  %vm6294_vm4 = vcmask 1046532  }
  0xa0   : > { %963 = vmatprep.subr.bf16.mxu0 %v8559_v3  ;;  %v8565_v7 = vld [vmem:[#allocation5 + $0x64] ss:$16 sps:$4 sm:$0xff]   ;;  %v8567_v8 = vld [vmem:[#allocation5 + $0x60] ss:$16 sps:$4 sm:$0xff]   ;;  %v8598_v13 = vld [vmem:[#allocation5 + $0xc] ss:$16 sps:$4 sm:$0xff]  }
  0xa1   : > { %v8568_v9 = vld [vmem:[#allocation5 + $0x84] ss:$16 sps:$4 sm:$0xff]   ;;  %v8570_v10 = vld [vmem:[#allocation5 + $0x80] ss:$16 sps:$4 sm:$0xff]   ;;  %v8600_v14 = vld [vmem:[#allocation5 + $0x8] ss:$16 sps:$4 sm:$0xff]   ;;  %1024 = vmatprep.subr.bf16.mxu1 %v8598_v13 }
  0xa2   : > { %v8571_v11 = vld [vmem:[#allocation5 + $0xa4] ss:$16 sps:$4 sm:$0xff]   ;;  %v8573_v12 = vld [vmem:[#allocation5 + $0xa0] ss:$16 sps:$4 sm:$0xff]   ;;  %s8457_s21 = smul.u32 48, %s510_s20  ;;  %1025 = vmatpush1.bf16.msra.mxu1 %v8600_v14  ;;  %vm10485_vm8 = vmor %vm6293_vm3, %vm6294_vm4  ;;  %vm6980_vm4 = vcmask 1045504  }
  0xa3   : > { %964 = vmatpush1.bf16.msra.mxu0 %v8561_v4  ;;  %v8574_v15 = vld [vmem:[#allocation5 + $0xc4] ss:$16 sps:$4 sm:$0xff]   ;;  %v8604_v16 = vld [vmem:[#allocation5 + $0x2c] ss:$16 sps:$4 sm:$0xff]   ;;  %v8606_v17 = vld [vmem:[#allocation5 + $0x28] ss:$16 sps:$4 sm:$0xff]  }
  0xa4   : > { %965 = vmatprep.subr.bf16.mxu0 %v8562_v5  ;;  %v8576_v18 = vld [vmem:[#allocation5 + $0xc0] ss:$16 sps:$4 sm:$0xff]   ;;  %v8577_v19 = vld [vmem:[#allocation5 + $0xe4] ss:$16 sps:$4 sm:$0xff]   ;;  %s10037_s29 = scalar_lea.vmem %s10949_s0, %s8457_s21  ;;  %1026 = vmatprep.subr.bf16.mxu1 %v8604_v16  ;;  %v8610_v20 = vld [vmem:[#allocation5 + $0x4c] ss:$16 sps:$4 sm:$0xff]  }
  0xa5   : > { %v8612_v21 = vld [vmem:[#allocation5 + $0x48] ss:$16 sps:$4 sm:$0xff]   ;;  %v8579_v23 = vld [vmem:[#allocation5 + $0xe0] ss:$16 sps:$4 sm:$0xff]   ;;  %v8616_v24 = vld [vmem:[#allocation5 + $0x6c] ss:$16 sps:$4 sm:$0xff]  }
  0xa6   : > { %1027 = vmatpush1.bf16.msra.mxu1 %v8606_v17  ;;  %v8615_v22 = vld [vmem:[%s10037_s29 + $0x4] ss:$8 sps:$4 sm:$0xff]   ;;  %v8613_v58 = vld [vmem:[%s10037_s29] ss:$8 sps:$4 sm:$0xff]   ;;  %v8622_v60 = vld [vmem:[%s10037_s29 + $0x14] ss:$8 sps:$4 sm:$0xff]  }
  0xa7   : > { %966 = vmatpush1.bf16.msra.mxu0 %v8564_v6  ;;  %1028 = vmatprep.subr.bf16.mxu1 %v8610_v20  ;;  %v8580_v25 = vld [vmem:[#allocation5 + $0x104] ss:$16 sps:$4 sm:$0xff]   ;;  %v8618_v26 = vld [vmem:[#allocation5 + $0x68] ss:$16 sps:$4 sm:$0xff]   ;;  %v8582_v27 = vld [vmem:[#allocation5 + $0x100] ss:$16 sps:$4 sm:$0xff]  }
  0xa8   : > { %967 = vmatprep.subr.bf16.mxu0 %v8565_v7  ;;  %993 = vmatprep.mubr.bf16.mxu0 %v8615_v22  ;;  %v8619_v28 = vld [vmem:[#allocation5 + $0x8c] ss:$16 sps:$4 sm:$0xff]   ;;  %v8583_v29 = vld [vmem:[#allocation5 + $0x124] ss:$16 sps:$4 sm:$0xff]   ;;  %v8621_v30 = vld [vmem:[#allocation5 + $0x88] ss:$16 sps:$4 sm:$0xff]  }
  0xa9   : > { %1056 = vmatprep.mubr.bf16.mxu1 %v8615_v22  ;;  %v8585_v31 = vld [vmem:[#allocation5 + $0x120] ss:$16 sps:$4 sm:$0xff]   ;;  %v8625_v32 = vld [vmem:[#allocation5 + $0xac] ss:$16 sps:$4 sm:$0xff]   ;;  %v8586_v33 = vld [vmem:[#allocation5 + $0x144] ss:$16 sps:$4 sm:$0xff]  }
  0xaa   : > { %1029 = vmatpush1.bf16.msra.mxu1 %v8612_v21  ;;  %v8627_v34 = vld [vmem:[#allocation5 + $0xa8] ss:$16 sps:$4 sm:$0xff]   ;;  %v8588_v35 = vld [vmem:[#allocation5 + $0x140] ss:$16 sps:$4 sm:$0xff]   ;;  %v8628_v36 = vld [vmem:[#allocation5 + $0xcc] ss:$16 sps:$4 sm:$0xff]  }
  0xab   : > { %968 = vmatpush1.bf16.msra.mxu0 %v8567_v8  ;;  %1030 = vmatprep.subr.bf16.mxu1 %v8616_v24  ;;  %v8589_v37 = vld [vmem:[#allocation5 + $0x164] ss:$16 sps:$4 sm:$0xff]   ;;  %v8630_v38 = vld [vmem:[#allocation5 + $0xc8] ss:$16 sps:$4 sm:$0xff]   ;;  %v8591_v39 = vld [vmem:[#allocation5 + $0x160] ss:$16 sps:$4 sm:$0xff]  }
  0xac   : > { %969 = vmatprep.subr.bf16.mxu0 %v8568_v9  ;;  %v8634_v40 = vld [vmem:[#allocation5 + $0xec] ss:$16 sps:$4 sm:$0xff]   ;;  %v8592_v41 = vld [vmem:[#allocation5 + $0x184] ss:$16 sps:$4 sm:$0xff]   ;;  %v8636_v42 = vld [vmem:[#allocation5 + $0xe8] ss:$16 sps:$4 sm:$0xff]  }
  0xad   : > { %v8594_v43 = vld [vmem:[#allocation5 + $0x180] ss:$16 sps:$4 sm:$0xff]   ;;  %v8637_v44 = vld [vmem:[#allocation5 + $0x10c] ss:$16 sps:$4 sm:$0xff]   ;;  %v8595_v45 = vld [vmem:[#allocation5 + $0x1a4] ss:$16 sps:$4 sm:$0xff]  }
  0xae   : > { %1031 = vmatpush1.bf16.msra.mxu1 %v8618_v26  ;;  %v8639_v46 = vld [vmem:[#allocation5 + $0x108] ss:$16 sps:$4 sm:$0xff]   ;;  %v8597_v47 = vld [vmem:[#allocation5 + $0x1a0] ss:$16 sps:$4 sm:$0xff]   ;;  %v8640_v48 = vld [vmem:[#allocation5 + $0x12c] ss:$16 sps:$4 sm:$0xff]  }
  0xaf   : > { %970 = vmatpush1.bf16.msra.mxu0 %v8570_v10  ;;  %1032 = vmatprep.subr.bf16.mxu1 %v8619_v28  ;;  %v8601_v49 = vld [vmem:[#allocation5 + $0x1c4] ss:$16 sps:$4 sm:$0xff]   ;;  %v8642_v50 = vld [vmem:[#allocation5 + $0x128] ss:$16 sps:$4 sm:$0xff]   ;;  %v8603_v51 = vld [vmem:[#allocation5 + $0x1c0] ss:$16 sps:$4 sm:$0xff]  }
  0xb0   : > { %971 = vmatprep.subr.bf16.mxu0 %v8571_v11  ;;  %v8643_v52 = vld [vmem:[#allocation5 + $0x14c] ss:$16 sps:$4 sm:$0xff]   ;;  %v8607_v53 = vld [vmem:[#allocation5 + $0x1e4] ss:$16 sps:$4 sm:$0xff]   ;;  %v8645_v54 = vld [vmem:[#allocation5 + $0x148] ss:$16 sps:$4 sm:$0xff]  }
  0xb1   : > { %v8609_v55 = vld [vmem:[#allocation5 + $0x1e0] ss:$16 sps:$4 sm:$0xff]   ;;  %v8646_v56 = vld [vmem:[#allocation5 + $0x16c] ss:$16 sps:$4 sm:$0xff]   ;;  %v8663_v57 = vld [vmem:[#allocation10 + $0x4] ss:$16 sps:$4 sm:$0xff]  }
  0xb2   : > { %1033 = vmatpush1.bf16.msra.mxu1 %v8621_v30  ;;  %v8648_v59 = vld [vmem:[#allocation5 + $0x168] ss:$16 sps:$4 sm:$0xff]   ;;  %v8649_v61 = vld [vmem:[#allocation5 + $0x18c] ss:$16 sps:$4 sm:$0xff]   ;;  %v8661_v62 = vld [vmem:[#allocation10] ss:$16 sps:$4 sm:$0xff]  }
  0xb3   : > { %972 = vmatpush1.bf16.msra.mxu0 %v8573_v12  ;;  %1034 = vmatprep.subr.bf16.mxu1 %v8625_v32  ;;  %v8669_v63 = vld [vmem:[#allocation10 + $0x24] ss:$16 sps:$4 sm:$0xff]   ;;  %v8651_v0 = vld [vmem:[#allocation5 + $0x188] ss:$16 sps:$4 sm:$0xff]   ;;  %v8652_v1 = vld [vmem:[#allocation5 + $0x1ac] ss:$16 sps:$4 sm:$0xff]  }
  0xb4   : > { %973 = vmatprep.subr.bf16.mxu0 %v8574_v15  ;;  %v8667_v2 = vld [vmem:[#allocation10 + $0x20] ss:$16 sps:$4 sm:$0xff]   ;;  %v8654_v4 = vld [vmem:[#allocation5 + $0x1a8] ss:$16 sps:$4 sm:$0xff]   ;;  %v8675_v5 = vld [vmem:[#allocation10 + $0x44] ss:$16 sps:$4 sm:$0xff]  }
  0xb5   : > { %v8624_v3 = vld [vmem:[%s10037_s29 + $0x10] ss:$8 sps:$4 sm:$0xff]   ;;  %v8631_v6 = vld [vmem:[%s10037_s29 + $0x24] ss:$8 sps:$4 sm:$0xff]   ;;  %v8633_v14 = vld [vmem:[%s10037_s29 + $0x20] ss:$8 sps:$4 sm:$0xff]  }
  0xb6   : > { %1035 = vmatpush1.bf16.msra.mxu1 %v8627_v34  ;;  %v8655_v7 = vld [vmem:[#allocation5 + $0x1cc] ss:$16 sps:$4 sm:$0xff]   ;;  %v8673_v8 = vld [vmem:[#allocation10 + $0x40] ss:$16 sps:$4 sm:$0xff]   ;;  %v8681_v9 = vld [vmem:[#allocation10 + $0x64] ss:$16 sps:$4 sm:$0xff]  }
  0xb7   : > { %974 = vmatpush1.bf16.msra.mxu0 %v8576_v18  ;;  %1036 = vmatprep.subr.bf16.mxu1 %v8628_v36  ;;  %v8657_v10 = vld [vmem:[#allocation5 + $0x1c8] ss:$16 sps:$4 sm:$0xff]   ;;  %v8658_v11 = vld [vmem:[#allocation5 + $0x1ec] ss:$16 sps:$4 sm:$0xff]   ;;  %v8679_v12 = vld [vmem:[#allocation10 + $0x60] ss:$16 sps:$4 sm:$0xff]  }
  0xb8   : > { %975 = vmatprep.subr.bf16.mxu0 %v8577_v19  ;;  %v8687_v13 = vld [vmem:[#allocation10 + $0x84] ss:$16 sps:$4 sm:$0xff]   ;;  %v8660_v15 = vld [vmem:[#allocation5 + $0x1e8] ss:$16 sps:$4 sm:$0xff]   ;;  %v8666_v16 = vld [vmem:[#allocation10 + $0xc] ss:$16 sps:$4 sm:$0xff]  }
  0xb9   : > { %v8685_v17 = vld [vmem:[#allocation10 + $0x80] ss:$16 sps:$4 sm:$0xff]   ;;  %v8693_v18 = vld [vmem:[#allocation10 + $0xa4] ss:$16 sps:$4 sm:$0xff]   ;;  %v8664_v19 = vld [vmem:[#allocation10 + $0x8] ss:$16 sps:$4 sm:$0xff]  }
  0xba   : > { %1037 = vmatpush1.bf16.msra.mxu1 %v8630_v38  ;;  %v8672_v20 = vld [vmem:[#allocation10 + $0x2c] ss:$16 sps:$4 sm:$0xff]   ;;  %v8691_v21 = vld [vmem:[#allocation10 + $0xa0] ss:$16 sps:$4 sm:$0xff]   ;;  %v8699_v22 = vld [vmem:[#allocation10 + $0xc4] ss:$16 sps:$4 sm:$0xff]  }
  0xbb   : > { %976 = vmatpush1.bf16.msra.mxu0 %v8579_v23  ;;  %1038 = vmatprep.subr.bf16.mxu1 %v8634_v40  ;;  %v8670_v23 = vld [vmem:[#allocation10 + $0x28] ss:$16 sps:$4 sm:$0xff]   ;;  %v8678_v24 = vld [vmem:[#allocation10 + $0x4c] ss:$16 sps:$4 sm:$0xff]   ;;  %v8705_v26 = vld [vmem:[#allocation10 + $0xe4] ss:$16 sps:$4 sm:$0xff]  }
  0xbc   : > { %977 = vmatprep.subr.bf16.mxu0 %v8580_v25  ;;  %v8697_v25 = vld [vmem:[#allocation10 + $0xc0] ss:$16 sps:$4 sm:$0xff]   ;;  %v8684_v28 = vld [vmem:[#allocation10 + $0x6c] ss:$16 sps:$4 sm:$0xff]   ;;  %v8682_v30 = vld [vmem:[#allocation10 + $0x68] ss:$16 sps:$4 sm:$0xff]  }
  0xbd   : > { %v8688_v32 = vld [vmem:[#allocation10 + $0x88] ss:$16 sps:$4 sm:$0xff]   ;;  %v8714_v40 = vld [vmem:[#allocation10 + $0x10c] ss:$16 sps:$4 sm:$0xff]   ;;  %vm1535_vm0 = vsmask.f32 7424 }
  0xbe   : > { %1039 = vmatpush1.bf16.msra.mxu1 %v8636_v42  ;;  %v8694_v34 = vld [vmem:[#allocation10 + $0xa8] ss:$16 sps:$4 sm:$0xff]   ;;  %vm6122_vm1 = vsmask.f32 3328  ;;  %vm6123_vm2 = vsmask.f32 7440 }
  0xbf   : > { %978 = vmatpush1.bf16.msra.mxu0 %v8582_v27  ;;  %1040 = vmatprep.subr.bf16.mxu1 %v8637_v44  ;;  %v8676_v27 = vld [vmem:[#allocation10 + $0x48] ss:$16 sps:$4 sm:$0xff]   ;;  %v8720_v44 = vld [vmem:[#allocation10 + $0x12c] ss:$16 sps:$4 sm:$0xff]   ;;  %vm10465_vm5 = vmor %vm6122_vm1, %vm6123_vm2  ;;  %vm6360_vm6 = vsmask.f32 2304 }
  0xc0   : > { %979 = vmatprep.subr.bf16.mxu0 %v8583_v29  ;;  %v8703_v29 = vld [vmem:[#allocation10 + $0xe0] ss:$16 sps:$4 sm:$0xff]   ;;  %v8700_v36 = vld [vmem:[#allocation10 + $0xc8] ss:$16 sps:$4 sm:$0xff]   ;;  %vm6361_vm7 = vsmask.f32 6416 }
  0xc1   : > { %v8706_v38 = vld [vmem:[#allocation10 + $0xe8] ss:$16 sps:$4 sm:$0xff]   ;;  %vm10533_vm9 = vmor %vm6360_vm6, %vm6361_vm7  ;;  %vm6943_vm1 = vcmask 1046528   ;;  %vm7054_vm6 = vcmask 1043456   ;;  %vm7128_vm7 = vcmask 1041408   ;;  %s506_s16 = sand.u32 1, %s9733_s28  }
  0xc2   : > { %1041 = vmatpush1.bf16.msra.mxu1 %v8639_v46  ;;  %v8712_v42 = vld [vmem:[#allocation10 + $0x108] ss:$16 sps:$4 sm:$0xff]   ;;  %s11003_s20 = sld [smem:[#allocation24_spill]]  ;;  %s7448_s21 = sshll.u32 %s506_s16, 1 }
  0xc3   : > { %980 = vmatpush1.bf16.msra.mxu0 %v8585_v31  ;;  %1042 = vmatprep.subr.bf16.mxu1 %v8640_v48  ;;  %v8690_v31 = vld [vmem:[#allocation10 + $0x8c] ss:$16 sps:$4 sm:$0xff]   ;;  %v8718_v46 = vld [vmem:[#allocation10 + $0x128] ss:$16 sps:$4 sm:$0xff]   ;;  %s8174_s24 = sshll.u32 %s9850_s10, 5  ;;  %s508_s18 = scalar_lea.vmem [#allocation14], %s7448_s21 }
  0xc4   : > { %981 = vmatprep.subr.bf16.mxu0 %v8586_v33  ;;  %v8696_v33 = vld [vmem:[#allocation10 + $0xac] ss:$16 sps:$4 sm:$0xff]   ;;  %s7325_s29 = sshll.u32 %s508_s18, 4  ;;  %s11004_s13 = sld [smem:[#allocation27_spill]]  ;;  %s10909_s29 = int_to_ptr.vmem [resolvable:$true] %s7325_s29 }
  0xc5   : > { %v8726_v48 = vld [vmem:[#allocation10 + $0x14c] ss:$16 sps:$4 sm:$0xff]   ;;  %s7312_s19 = scalar_lea.sflag [#allocation7], %s506_s16  ;;  %s9667_s22 = scalar_lea.vmem %s10909_s29, 32 }
  0xc6   : > { %1043 = vmatpush1.bf16.msra.mxu1 %v8642_v50  ;;  %v8724_v50 = vld [vmem:[#allocation10 + $0x148] ss:$16 sps:$4 sm:$0xff]   ;;  %p9668_p8 = scmp.ne.s32.totalorder %s10909_s29, %s9667_s22  ;;  %s9755_s10 = smov [#allocation14]  }
  0xc7   : > { %982 = vmatpush1.bf16.msra.mxu0 %v8588_v35  ;;  %1044 = vmatprep.subr.bf16.mxu1 %v8643_v52  ;;  %v8702_v35 = vld [vmem:[#allocation10 + $0xcc] ss:$16 sps:$4 sm:$0xff]   ;;  %s9671_s25 = sshll.u32 %s9755_s10, 4  ;;  %s9672_s25 = int_to_ptr.vmem [resolvable:$false] %s9671_s25 }
  0xc8   : > { %983 = vmatprep.subr.bf16.mxu0 %v8589_v37  ;;  %v8708_v37 = vld [vmem:[#allocation10 + $0xec] ss:$16 sps:$4 sm:$0xff]   ;;  %p11005_p11 = scmp.ne.s32.totalorder %s11003_s20, 0  ;;  %s9673_s14 = scalar_lea.vmem %s9672_s25, 64 }
  0xc9   : > { %v8732_v52 = vld [vmem:[#allocation10 + $0x16c] ss:$16 sps:$4 sm:$0xff]   ;;  %p9674_p6 = scmp.lt.s32.totalorder %s10909_s29, %s9672_s25  ;;  %p9675_p9 = scmp.lt.s32.totalorder %s9673_s14, %s9667_s22 }
  0xca   : > { %1045 = vmatpush1.bf16.msra.mxu1 %v8645_v54  ;;  %v8730_v54 = vld [vmem:[#allocation10 + $0x168] ss:$16 sps:$4 sm:$0xff]   ;;  %s10907_s27 = scalar_lea.hbm %s11004_s13, %s8174_s24  ;;  %p9669_p13 = pnand %p9668_p8, %p11005_p11 }
  0xcb   : > { %984 = vmatpush1.bf16.msra.mxu0 %v8591_v39  ;;  %1046 = vmatprep.subr.bf16.mxu1 %v8646_v56  ;;  %v8711_v39 = vld [vmem:[#allocation10 + $0x104] ss:$16 sps:$4 sm:$0xff]   ;;  %v8738_v56 = vld [vmem:[#allocation10 + $0x18c] ss:$16 sps:$4 sm:$0xff]   ;;  %p9676_p5 = por %p9675_p9, %p9674_p6 }
  0xcc   : > { %985 = vmatprep.subr.bf16.mxu0 %v8592_v41  ;;  %v8709_v41 = vld [vmem:[#allocation10 + $0x100] ss:$16 sps:$4 sm:$0xff]   ;;  %p9670_p1 = pneg %p9669_p13 }
  0xce   : > { %1047 = vmatpush1.bf16.msra.mxu1 %v8648_v59  ;;  %v8741_v59 = vld [vmem:[#allocation10 + $0x1a4] ss:$16 sps:$4 sm:$0xff]   ;;  %p9677_p0 = pnand %p9676_p5, %p9670_p1 }
  0xcf   : > { %986 = vmatpush1.bf16.msra.mxu0 %v8594_v43  ;;  %1048 = vmatprep.subr.bf16.mxu1 %v8649_v61  ;;  %v8717_v43 = vld [vmem:[#allocation10 + $0x124] ss:$16 sps:$4 sm:$0xff]   ;;  %v8739_v61 = vld [vmem:[#allocation10 + $0x1a0] ss:$16 sps:$4 sm:$0xff]  }
  0xd0   : > { %987 = vmatprep.subr.bf16.mxu0 %v8595_v45  ;;  %v8715_v45 = vld [vmem:[#allocation10 + $0x120] ss:$16 sps:$4 sm:$0xff]  }
  0xd2   : > { %1049 = vmatpush1.bf16.msra.mxu1 %v8651_v0  ;;  %v8750_v0 = vld [vmem:[#allocation10 + $0x1cc] ss:$16 sps:$4 sm:$0xff]  }
  0xd3   : > { %988 = vmatpush1.bf16.msra.mxu0 %v8597_v47  ;;  %1050 = vmatprep.subr.bf16.mxu1 %v8652_v1  ;;  %v8723_v47 = vld [vmem:[#allocation10 + $0x144] ss:$16 sps:$4 sm:$0xff]   ;;  %v8745_v1 = vld [vmem:[#allocation10 + $0x1c0] ss:$16 sps:$4 sm:$0xff]  }
  0xd4   : > { %989 = vmatprep.subr.bf16.mxu0 %v8601_v49  ;;  %v8721_v49 = vld [vmem:[#allocation10 + $0x140] ss:$16 sps:$4 sm:$0xff]  }
  0xd6   : > { %1051 = vmatpush1.bf16.msra.mxu1 %v8654_v4  ;;  %v8756_v4 = vld [vmem:[#allocation10 + $0x1ec] ss:$16 sps:$4 sm:$0xff]  }
  0xd7   : > { %990 = vmatpush1.bf16.msra.mxu0 %v8603_v51  ;;  %1052 = vmatprep.subr.bf16.mxu1 %v8655_v7  ;;  %v8729_v51 = vld [vmem:[#allocation10 + $0x164] ss:$16 sps:$4 sm:$0xff]  }
  0xd8   : > { %991 = vmatprep.subr.bf16.mxu0 %v8607_v53  ;;  %v8727_v53 = vld [vmem:[#allocation10 + $0x160] ss:$16 sps:$4 sm:$0xff]   ;;  %v8759_v7 = vld [vmem:[#allocation10 + $0x204] ss:$16 sps:$4 sm:$0xff]  }
  0xda   : > { %1053 = vmatpush1.bf16.msra.mxu1 %v8657_v10  ;;  %v591_v10 = vlaneseq }
  0xdb   : > { %992 = vmatpush1.bf16.msra.mxu0 %v8609_v55  ;;  %1054 = vmatprep.subr.bf16.mxu1 %v8658_v11  ;;  %v8735_v55 = vld [vmem:[#allocation10 + $0x184] ss:$16 sps:$4 sm:$0xff]  }
  0xdc   : > { %2300 = vmatprep.subr.bf16.mxu0 %v8663_v57  ;;  %v8733_v57 = vld [vmem:[#allocation10 + $0x180] ss:$16 sps:$4 sm:$0xff]   ;;  %v592_v11 = vshrl.u32 %v591_v10, 7 }
  0xde   : > { %994 = vmatmul.mubr.bf16.vlgmr.msra.gmra.mrb[0].mxu0 %v8613_v58  ;;  %1055 = vmatpush1.bf16.msra.mxu1 %v8660_v15 }
  0xdf   : > { %1003 = vmatprep.mubr.bf16.mxu0 %v8622_v60  ;;  %2301 = vmatpush1.bf16.msra.mxu0 %v8661_v62  ;;  %v8742_v62 = vld [vmem:[#allocation10 + $0x1a8] ss:$16 sps:$4 sm:$0xff]  }
  0xe0   : > { %2302 = vmatprep.subr.bf16.mxu0 %v8669_v63  ;;  %2426 = vmatprep.subr.bf16.mxu1 %v8666_v16  ;;  %v8747_v63 = vld [vmem:[#allocation10 + $0x1c4] ss:$16 sps:$4 sm:$0xff]  }
  0xe1   : > { %1057 = vmatmul.mubr.bf16.vlgmr.msra.gmra.mrb[0].mxu1 %v8613_v58  ;;  %v8736_v58 = vld [vmem:[#allocation10 + $0x188] ss:$16 sps:$4 sm:$0xff]  }
  0xe2   : > { %1066 = vmatprep.mubr.bf16.mxu1 %v8622_v60  ;;  %2427 = vmatpush1.bf16.msra.mxu1 %v8664_v19  ;;  %v8744_v60 = vld [vmem:[#allocation10 + $0x1ac] ss:$16 sps:$4 sm:$0xff]  }
  0xe3   : > { %2303 = vmatpush1.bf16.msra.mxu0 %v8667_v2  ;;  %2428 = vmatprep.subr.bf16.mxu1 %v8672_v20  ;;  %v8748_v2 = vld [vmem:[#allocation10 + $0x1c8] ss:$16 sps:$4 sm:$0xff]  }
  0xe4   : > { %2304 = vmatprep.subr.bf16.mxu0 %v8675_v5  ;;  %v8751_v5 = vld [vmem:[#allocation10 + $0x1e0] ss:$16 sps:$4 sm:$0xff]  }
  0xe6   : > { %1004 = vmatmul.mubr.bf16.gmra.mrb[4].mxu0 %v8624_v3  ;;  %2429 = vmatpush1.bf16.msra.mxu1 %v8670_v23 }
  0xe7   : > { %1013 = vmatprep.mubr.bf16.mxu0 %v8631_v6  ;;  %2305 = vmatpush1.bf16.msra.mxu0 %v8673_v8  ;;  %v8762_v8 = vld [vmem:[#allocation10 + $0x20c] ss:$16 sps:$4 sm:$0xff]  }
  0xe8   : > { %2306 = vmatprep.subr.bf16.mxu0 %v8681_v9  ;;  %2430 = vmatprep.subr.bf16.mxu1 %v8678_v24  ;;  %v9750_v9 = vmov 0  }
  0xe9   : > { %1067 = vmatmul.mubr.bf16.gmra.mrb[4].mxu1 %v8624_v3  ;;  %v8753_v3 = vld [vmem:[#allocation10 + $0x1e4] ss:$16 sps:$4 sm:$0xff]   ;;  %515 = vst [vmem:[#allocation2 + $0x60] sm:$0xff] %v9750_v9  ;;  %516 = vst [vmem:[#allocation2 + $0x68] sm:$0xff] %v9750_v9  ;;  %8555 = vset.pattern.permute.xlu0 %v9750_v9 }
  0xea   : > { %1076 = vmatprep.mubr.bf16.mxu1 %v8631_v6  ;;  %2431 = vmatpush1.bf16.msra.mxu1 %v8676_v27  ;;  %v8754_v6 = vld [vmem:[#allocation10 + $0x1e8] ss:$16 sps:$4 sm:$0xff]   ;;  %517 = vst [vmem:[#allocation3 + $0x60] sm:$0xff] %v9750_v9  ;;  %518 = vst [vmem:[#allocation3 + $0x68] sm:$0xff] %v9750_v9 }
  0xeb   : > { %2307 = vmatpush1.bf16.msra.mxu0 %v8679_v12  ;;  %2432 = vmatprep.subr.bf16.mxu1 %v8684_v28  ;;  %v589_v12 = vld [vmem:[%s10951_s2] sm:$0xf] }
  0xec   : > { %2308 = vmatprep.subr.bf16.mxu0 %v8687_v13  ;;  %v10049_v13 = vsub.s32 0, %v592_v11 }
  0xee   : > { %1014 = vmatmul.mubr.bf16.gmra.mrb[8].mxu0 %v8633_v14  ;;  %2433 = vmatpush1.bf16.msra.mxu1 %v8682_v30  ;;  %v594_v15 = vrot.slane %v589_v12, %v10049_v13 }
  0xef   : > { %2309 = vmatpush1.bf16.msra.mxu0 %v8685_v17  ;;  %2434 = vmatprep.subr.bf16.mxu1 %v8690_v31 }
  0xf0   : > { %2310 = vmatprep.subr.bf16.mxu0 %v8693_v18 }
  0xf1   : > { %1077 = vmatmul.mubr.bf16.gmra.mrb[8].mxu1 %v8633_v14  ;;  %v10051_v14 = vsub.s32 1, %v592_v11 }
  0xf2   : > { %2435 = vmatpush1.bf16.msra.mxu1 %v8688_v32 }
  0xf3   : > { %2311 = vmatpush1.bf16.msra.mxu0 %v8691_v21  ;;  %2436 = vmatprep.subr.bf16.mxu1 %v8696_v33  ;;  %v10055_v16 = vrot.slane %v589_v12, %v10051_v14 }
  0xf4   : > { %2312 = vmatprep.subr.bf16.mxu0 %v8699_v22 }
  0xf6   : > { %2437 = vmatpush1.bf16.msra.mxu1 %v8694_v34  ;;  %v10059_v34 = vld [vmem:[#allocation2 + $0x60] sm:$0x11] }
  0xf7   : > { %2313 = vmatpush1.bf16.msra.mxu0 %v8697_v25  ;;  %2438 = vmatprep.subr.bf16.mxu1 %v8702_v35 }
  0xf8   : > { %2314 = vmatprep.subr.bf16.mxu0 %v8705_v26 }
  0xfa   : > { %2439 = vmatpush1.bf16.msra.mxu1 %v8700_v36 }
  0xfb   : > { %2315 = vmatpush1.bf16.msra.mxu0 %v8703_v29  ;;  %2440 = vmatprep.subr.bf16.mxu1 %v8708_v37 }
  0xfc   : > { %2316 = vmatprep.subr.bf16.mxu0 %v8711_v39  ;;  %v10062_v39 = vsub.s32 2, %v592_v11 }
  0xfe   : > { %2441 = vmatpush1.bf16.msra.mxu1 %v8706_v38 }
  0xff   : > { %2442 = vmatprep.subr.bf16.mxu1 %v8714_v40  ;;  %2317 = vmatpush1.bf16.msra.mxu0 %v8709_v41 }
 0x100   : > { %2318 = vmatprep.subr.bf16.mxu0 %v8717_v43 }
 0x102   : > { %2443 = vmatpush1.bf16.msra.mxu1 %v8712_v42 }
 0x103   : > { %2444 = vmatprep.subr.bf16.mxu1 %v8720_v44  ;;  %2319 = vmatpush1.bf16.msra.mxu0 %v8715_v45 }
 0x104   : > { %2320 = vmatprep.subr.bf16.mxu0 %v8723_v47 }
 0x106   : > { %2445 = vmatpush1.bf16.msra.mxu1 %v8718_v46  ;;  %v10065_v46 = vsub.s32 3, %v592_v11 }
 0x107   : > { %2446 = vmatprep.subr.bf16.mxu1 %v8726_v48  ;;  %2321 = vmatpush1.bf16.msra.mxu0 %v8721_v49 }
 0x108   : > { %2322 = vmatprep.subr.bf16.mxu0 %v8729_v51  ;;  %v7545_v51 = vcombine.high %v10059_v34, %v10059_v34 }
 0x10a   : > { %2447 = vmatpush1.bf16.msra.mxu1 %v8724_v50 }
 0x10b   : > { %2448 = vmatprep.subr.bf16.mxu1 %v8732_v52  ;;  %2323 = vmatpush1.bf16.msra.mxu0 %v8727_v53 }
 0x10c   : > { %2324 = vmatprep.subr.bf16.mxu0 %v8735_v55  ;;  %v10070_v55 = vrot.slane %v589_v12, %v10062_v39 }
 0x10e   : > { %2449 = vmatpush1.bf16.msra.mxu1 %v8730_v54 }
 0x10f   : > { %2450 = vmatprep.subr.bf16.mxu1 %v8738_v56  ;;  %2325 = vmatpush1.bf16.msra.mxu0 %v8733_v57  ;;  %v10073_v56 = vrot.slane %v589_v12, %v10065_v46 }
 0x110   : > { %2326 = vmatprep.subr.bf16.mxu0 %v8741_v59 }
 0x112   : > { %2451 = vmatpush1.bf16.msra.mxu1 %v8736_v58 }
 0x113   : > { %2452 = vmatprep.subr.bf16.mxu1 %v8744_v60  ;;  %2327 = vmatpush1.bf16.msra.mxu0 %v8739_v61  ;;  %v7544_v61 = vcombine.low %v10059_v34, %v10059_v34 }
 0x114   : > { %2328 = vmatprep.subr.bf16.mxu0 %v8747_v63 }
 0x116   : > { %2453 = vmatpush1.bf16.msra.mxu1 %v8742_v62 }
 0x117   : > { %2454 = vmatprep.subr.bf16.mxu1 %v8750_v0  ;;  %2329 = vmatpush1.bf16.msra.mxu0 %v8745_v1 }
 0x118   : > { %2330 = vmatprep.subr.bf16.mxu0 %v8753_v3 }
 0x11a   : > { %2455 = vmatpush1.bf16.msra.mxu1 %v8748_v2  ;;  %v10078_v2 = vshll.u32 %v7545_v51, 16  ;;  %v8774_v51 = vld [vmem:[#allocation10 + $0x24c] ss:$16 sps:$4 sm:$0xff]  }
 0x11b   : > { %2456 = vmatprep.subr.bf16.mxu1 %v8756_v4  ;;  %2331 = vmatpush1.bf16.msra.mxu0 %v8751_v5 }
 0x11c   : > { %2363 = vmatprep.subr.bf16.mxu0 %v8759_v7 }
 0x11e   : > { %2457 = vmatpush1.bf16.msra.mxu1 %v8754_v6 }
 0x11f   : > { %2489 = vmatprep.subr.bf16.mxu1 %v8762_v8 }
 0x1b1   : > { %v995_v17 = vpop.f32.mrb[0].mxu0 }
 0x1b2   : > { %v996_v18 = vadd.f32 %v995_v17, %v594_v15  ;;  %v997_v19 = vpop.f32.mrb[1].mxu0 }
 0x1b3   : > { %v998_v20 = vadd.f32 %v997_v19, %v10055_v16  ;;  %v999_v21 = vpop.f32.mrb[2].mxu0 }
 0x1b4   : > { %v1087_v22 = vmax.f32 %v996_v18, 0.0  ;;  %v1000_v23 = vadd.f32 %v999_v21, %v594_v15  ;;  %v1001_v24 = vpop.f32.mrb[3].mxu0  ;;  %v1058_v8 = vpop.f32.mrb[0].mxu1  ;;  %v8760_v21 = vld [vmem:[#allocation10 + $0x208] ss:$16 sps:$4 sm:$0xff]  }
 0x1b5   : > { %v1088_v25 = vmax.f32 %v998_v20, 0.0  ;;  %v1002_v26 = vadd.f32 %v1001_v24, %v10055_v16  ;;  %v1060_v18 = vpop.f32.mrb[1].mxu1  ;;  %v8757_v20 = vld [vmem:[#allocation10 + $0x200] ss:$16 sps:$4 sm:$0xff]   ;;  %v1059_v24 = vadd.f32 %v1058_v8, %v10070_v55 }
 0x1b6   : > { %v1091_v27 = vmax.f32 %v1000_v23, 0.0 }
 0x1b7   : > { %v8177_v28 = vpack.c.bf16 %v1088_v25, %v1087_v22  ;;  %v1092_v29 = vmax.f32 %v1002_v26, 0.0 }
 0x1b8   : > { %v9504_v38 = vpack.c.bf16 %v1091_v27, %v1087_v22 }
 0x1b9   : > { %1183 = vst [vmem:[#allocation2] sm:$0xff] %v8177_v28  ;;  %v8179_v30 = vpack.c.bf16 %v1092_v29, %v1091_v27  ;;  %v1005_v31 = vpop.f32.mrb[4].mxu0  ;;  %v9503_v37 = vpack.c.bf16 %v1092_v29, %v1088_v25  ;;  %v1062_v25 = vpop.f32.mrb[2].mxu1  ;;  %v8765_v29 = vld [vmem:[#allocation10 + $0x224] ss:$16 sps:$4 sm:$0xff]  }
 0x1ba   : > { %v1006_v32 = vadd.f32 %v1005_v31, %v594_v15  ;;  %v1007_v33 = vpop.f32.mrb[5].mxu0  ;;  %v1539_v48 = vshll.u32 %v9504_v38, 16  ;;  %v1537_v7 = vshrl.u32 %v9504_v38, 16  ;;  %v8768_v31 = vld [vmem:[#allocation10 + $0x22c] ss:$16 sps:$4 sm:$0xff]  }
 0x1bb   : > { %1185 = vst [vmem:[#allocation2 + $0x10] sm:$0xff] %v8179_v30  ;;  %v1008_v35 = vadd.f32 %v1007_v33, %v10055_v16  ;;  %v1009_v36 = vpop.f32.mrb[6].mxu0  ;;  %v1551_v45 = vshll.u32 %v9503_v37, 16  ;;  %v1549_v59 = vshrl.u32 %v9503_v37, 16  ;;  %v1064_v30 = vpop.f32.mrb[3].mxu1  ;;  %v1063_v33 = vadd.f32 %v1062_v25, %v10070_v55 }
 0x1bc   : > { %v1095_v40 = vmax.f32 %v1006_v32, 0.0  ;;  %v1010_v41 = vadd.f32 %v1009_v36, %v594_v15  ;;  %v1011_v42 = vpop.f32.mrb[7].mxu0  ;;  %v1541_v60 = vrot.slane %v1539_v48, 1  ;;  %v1089_v32 = vmax.f32 %v1059_v24, 0.0 }
 0x1bd   : > { %v1096_v43 = vmax.f32 %v1008_v35, 0.0  ;;  %v1012_v44 = vadd.f32 %v1011_v42, %v10055_v16  ;;  %v1553_v52 = vrot.slane %v1551_v45, 1  ;;  %v1065_v34 = vadd.f32 %v1064_v30, %v10073_v56  ;;  %v8783_v30 = vld [vmem:[#allocation10 + $0x284] ss:$16 sps:$4 sm:$0xff]  }
 0x1be   : > { %v1099_v47 = vmax.f32 %v1010_v41, 0.0  ;;  %v1542_v22 = vor.u32 %v1541_v60, %v1537_v7  ;;  %v1093_v41 = vmax.f32 %v1063_v33, 0.0  ;;  %v8777_v7 = vld [vmem:[#allocation10 + $0x264] ss:$16 sps:$4 sm:$0xff]  }
 0x1bf   : > { %v8181_v49 = vpack.c.bf16 %v1096_v43, %v1095_v40  ;;  %v1100_v50 = vmax.f32 %v1012_v44, 0.0  ;;  %v1554_v6 = vor.u32 %v1553_v52, %v1549_v59  ;;  %v1094_v42 = vmax.f32 %v1065_v34, 0.0  ;;  %v8766_v44 = vld [vmem:[#allocation10 + $0x228] ss:$16 sps:$4 sm:$0xff]   ;;  %v8786_v34 = vld [vmem:[#allocation10 + $0x28c] ss:$16 sps:$4 sm:$0xff]  }
 0x1c0   : > { %v9506_v1 = vpack.c.bf16 %v1099_v47, %v1095_v40 }
 0x1c1   : > { %1187 = vst [vmem:[#allocation2 + $0x20] sm:$0xff] %v8181_v49  ;;  %v8183_v53 = vpack.c.bf16 %v1100_v50, %v1099_v47  ;;  %v1015_v54 = vpop.f32.mrb[8].mxu0  ;;  %v9505_v0 = vpack.c.bf16 %v1100_v50, %v1096_v43  ;;  %v8763_v43 = vld [vmem:[#allocation10 + $0x220] ss:$16 sps:$4 sm:$0xff]   ;;  %v10087_v49 = vshll.u32 %v7544_v61, 16 }
 0x1c2   : > { %v1016_v57 = vadd.f32 %v1015_v54, %v594_v15  ;;  %v1017_v58 = vpop.f32.mrb[9].mxu0  ;;  %v1544_v17 = vshll.u32 %v9506_v1, 16  ;;  %v1584_v38 = vshrl.u32 %v9506_v1, 16  ;;  %v8771_v50 = vld [vmem:[#allocation10 + $0x244] ss:$16 sps:$4 sm:$0xff]   ;;  %v1630_v54 = vrot.slane %v10078_v2, 1 }
 0x1c3   : > { %1189 = vst [vmem:[#allocation2 + $0x30] sm:$0xff] %v8183_v53  ;;  %v1018_v62 = vadd.f32 %v1017_v58, %v10055_v16  ;;  %v1019_v63 = vpop.f32.mrb[10].mxu0  ;;  %v1556_v12 = vshll.u32 %v9505_v0, 16  ;;  %v1592_v23 = vshrl.u32 %v9505_v0, 16  ;;  %v1068_v53 = vpop.f32.mrb[4].mxu1 }
 0x1c4   : > { %v1103_v3 = vmax.f32 %v1016_v57, 0.0  ;;  %v1020_v4 = vadd.f32 %v1019_v63, %v594_v15  ;;  %v1021_v5 = vpop.f32.mrb[11].mxu0  ;;  %v1546_v28 = vrot.slane %v1544_v17, 1  ;;  %v1069_v59 = vadd.f32 %v1068_v53, %v10070_v55  ;;  %v1070_v60 = vpop.f32.mrb[5].mxu1  ;;  %v8769_v63 = vld [vmem:[#allocation10 + $0x240] ss:$16 sps:$4 sm:$0xff]  }
 0x1c5   : > { %v1104_v9 = vmax.f32 %v1018_v62, 0.0  ;;  %v1022_v11 = vadd.f32 %v1021_v5, %v10055_v16  ;;  %v1558_v27 = vrot.slane %v1556_v12, 1  ;;  %v1061_v16 = vadd.f32 %v1060_v18, %v10073_v56  ;;  %v8772_v0 = vld [vmem:[#allocation10 + $0x248] ss:$16 sps:$4 sm:$0xff]   ;;  %v1072_v1 = vpop.f32.mrb[6].mxu1 }
 0x1c6   : > { %v1107_v19 = vmax.f32 %v1020_v4, 0.0  ;;  %v1547_v37 = vsel %vm1535_vm0, %v1542_v22, %v1546_v28  ;;  %v1586_v52 = vor.u32 %v1584_v38, %v1546_v28  ;;  %v1071_v61 = vadd.f32 %v1070_v60, %v10073_v56  ;;  %v8780_v12 = vld [vmem:[#allocation10 + $0x26c] ss:$16 sps:$4 sm:$0xff]  }
 0x1c7   : > { %v8185_v26 = vpack.c.bf16 %v1104_v9, %v1103_v3  ;;  %v1108_v15 = vmax.f32 %v1022_v11, 0.0  ;;  %v1559_v36 = vsel %vm1535_vm0, %v1554_v6, %v1558_v27  ;;  %v1090_v40 = vmax.f32 %v1061_v16, 0.0  ;;  %v1074_v11 = vpop.f32.mrb[7].mxu1 }
 0x1c8   : > { %2332 = vmatprep.mubr.bf16.mxu0 %v1559_v36  ;;  %2458 = vmatprep.mubr.bf16.mxu1 %v1559_v36  ;;  %v1594_v47 = vor.u32 %v1592_v23, %v1558_v27  ;;  %v9508_v48 = vpack.c.bf16 %v1107_v19, %v1103_v3  ;;  %v10094_v5 = vpack.c.bf16 %v1093_v41, %v1089_v32  ;;  %v1097_v8 = vmax.f32 %v1069_v59, 0.0  ;;  %v1078_v32 = vpop.f32.mrb[8].mxu1 }
 0x1c9   : > { %1191 = vst [vmem:[#allocation2 + $0x40] sm:$0xff] %v8185_v26  ;;  %v8187_v35 = vpack.c.bf16 %v1108_v15, %v1107_v19  ;;  %2333 = vmatmul.mubr.bf16.vlgmr.msra.gmra.mrb[12].mxu0 %v1547_v37  ;;  %2459 = vmatmul.mubr.bf16.vlgmr.msra.gmra.mrb[12].mxu1 %v1547_v37  ;;  %v9507_v45 = vpack.c.bf16 %v1108_v15, %v1104_v9  ;;  %v1098_v17 = vmax.f32 %v1071_v61, 0.0  ;;  %v8775_v26 = vld [vmem:[#allocation10 + $0x260] ss:$16 sps:$4 sm:$0xff]   ;;  %v8778_v15 = vld [vmem:[#allocation10 + $0x268] ss:$16 sps:$4 sm:$0xff]  }
 0x1ca   : > { %2364 = vmatpush1.bf16.msra.mxu0 %v8757_v20  ;;  %2490 = vmatpush1.bf16.msra.mxu1 %v8760_v21  ;;  %v1588_v58 = vshll.u32 %v9508_v48, 16  ;;  %v1616_v3 = vshrl.u32 %v9508_v48, 16  ;;  %v10092_v4 = vpack.c.bf16 %v1094_v42, %v1090_v40  ;;  %v1073_v9 = vadd.f32 %v1072_v1, %v10070_v55  ;;  %v1080_v36 = vpop.f32.mrb[9].mxu1  ;;  %v8781_v42 = vld [vmem:[#allocation10 + $0x280] ss:$16 sps:$4 sm:$0xff]  }
 0x1cb   : > { %1193 = vst [vmem:[#allocation2 + $0x50] sm:$0xff] %v8187_v35  ;;  %2365 = vmatprep.subr.bf16.mxu0 %v8765_v29  ;;  %2491 = vmatprep.subr.bf16.mxu1 %v8768_v31  ;;  %v1596_v57 = vshll.u32 %v9507_v45, 16  ;;  %v1624_v62 = vshrl.u32 %v9507_v45, 16  ;;  %v1075_v18 = vadd.f32 %v1074_v11, %v10073_v56  ;;  %v8182_v24 = vpack.c.bf16 %v1098_v17, %v1097_v8  ;;  %v1082_v38 = vpop.f32.mrb[10].mxu1  ;;  %v8796_v11 = vld [vmem:[#allocation10 + $0x2c8] ss:$16 sps:$4 sm:$0xff]  }
 0x1cc   : > { %v1590_v2 = vrot.slane %v1588_v58, 1  ;;  %v1575_v19 = vshll.u32 %v10092_v4, 16  ;;  %v1101_v22 = vmax.f32 %v1073_v9, 0.0  ;;  %v1622_v29 = vrot.slane %v10087_v49, 1  ;;  %v8789_v49 = vld [vmem:[#allocation10 + $0x2a4] ss:$16 sps:$4 sm:$0xff]  }
 0x1cd   : > { %v1598_v6 = vrot.slane %v1596_v57, 1  ;;  %v1102_v25 = vmax.f32 %v1075_v18, 0.0  ;;  %1188 = vst [vmem:[#allocation2 + $0x28] sm:$0xff] %v8182_v24  ;;  %v1573_v16 = vshrl.u32 %v10092_v4, 16  ;;  %v1079_v35 = vadd.f32 %v1078_v32, %v10070_v55  ;;  %v8799_v24 = vld [vmem:[#allocation10 + $0x2e0] ss:$16 sps:$4 sm:$0xff]  }
 0x1ce   : > { %2366 = vmatpush1.bf16.msra.mxu0 %v8763_v43  ;;  %2492 = vmatpush1.bf16.msra.mxu1 %v8766_v44  ;;  %v1591_v21 = vsel %vm1535_vm0, %v1586_v52, %v1590_v2  ;;  %v1618_v28 = vor.u32 %v1616_v3, %v1590_v2  ;;  %v1577_v33 = vrot.slane %v1575_v19, 1  ;;  %v1081_v37 = vadd.f32 %v1080_v36, %v10073_v56  ;;  %v8784_v43 = vld [vmem:[#allocation10 + $0x288] ss:$16 sps:$4 sm:$0xff]   ;;  %v8795_v3 = vld [vmem:[#allocation10 + $0x2c4] ss:$16 sps:$4 sm:$0xff]  }
 0x1cf   : > { %v1599_v20 = vsel %vm1535_vm0, %v1594_v47, %v1598_v6  ;;  %2367 = vmatprep.subr.bf16.mxu0 %v8771_v50  ;;  %2493 = vmatprep.subr.bf16.mxu1 %v8774_v51  ;;  %v1626_v23 = vor.u32 %v1624_v62, %v1598_v6  ;;  %v8184_v31 = vpack.c.bf16 %v1102_v25, %v1101_v22  ;;  %v1105_v44 = vmax.f32 %v1079_v35, 0.0  ;;  %v1084_v47 = vpop.f32.mrb[11].mxu1  ;;  %v8798_v6 = vld [vmem:[#allocation10 + $0x2cc] ss:$16 sps:$4 sm:$0xff]   ;;  %v8793_v2 = vld [vmem:[#allocation10 + $0x2c0] ss:$16 sps:$4 sm:$0xff]  }
 0x1d0   : > { %2342 = vmatprep.mubr.bf16.mxu0 %v1599_v20  ;;  %2468 = vmatprep.mubr.bf16.mxu1 %v1599_v20  ;;  %v9511_v40 = vpack.c.bf16 %v1102_v25, %v1098_v17  ;;  %v9512_v41 = vpack.c.bf16 %v1101_v22, %v1097_v8  ;;  %v1083_v45 = vadd.f32 %v1082_v38, %v10070_v55  ;;  %v1106_v50 = vmax.f32 %v1081_v37, 0.0  ;;  %v8787_v55 = vld [vmem:[#allocation10 + $0x2a0] ss:$16 sps:$4 sm:$0xff]   ;;  %v8804_v17 = vld [vmem:[#allocation10 + $0x2ec] ss:$16 sps:$4 sm:$0xff]  }
 0x1d1   : > { %2343 = vmatmul.mubr.bf16.gmra.mrb[16].mxu0 %v1591_v21  ;;  %2469 = vmatmul.mubr.bf16.gmra.mrb[16].mxu1 %v1591_v21  ;;  %v1631_v27 = vsel %vm1535_vm0, %v1626_v23, %v1630_v54  ;;  %1190 = vst [vmem:[#allocation2 + $0x38] sm:$0xff] %v8184_v31  ;;  %v1623_v48 = vsel %vm1535_vm0, %v1618_v28, %v1622_v29  ;;  %v8792_v54 = vld [vmem:[#allocation10 + $0x2ac] ss:$16 sps:$4 sm:$0xff]   ;;  %v8802_v25 = vld [vmem:[#allocation10 + $0x2e8] ss:$16 sps:$4 sm:$0xff]  }
 0x1d2   : > { %2368 = vmatpush1.bf16.msra.mxu0 %v8769_v63  ;;  %2494 = vmatpush1.bf16.msra.mxu1 %v8772_v0  ;;  %v1085_v51 = vadd.f32 %v1084_v47, %v10073_v56  ;;  %v1578_v52 = vor.u32 %v1577_v33, %v1573_v16  ;;  %v1580_v53 = vshll.u32 %v9511_v40, 16  ;;  %v1109_v57 = vmax.f32 %v1083_v45, 0.0  ;;  %v8790_v63 = vld [vmem:[#allocation10 + $0x2a8] ss:$16 sps:$4 sm:$0xff]   ;;  %v8810_v28 = vld [vmem:[#allocation10 + $0x30c] ss:$16 sps:$4 sm:$0xff]  }
 0x1d3   : > { %2369 = vmatprep.subr.bf16.mxu0 %v8777_v7  ;;  %2495 = vmatprep.subr.bf16.mxu1 %v8780_v12  ;;  %v8186_v58 = vpack.c.bf16 %v1106_v50, %v1105_v44  ;;  %v1568_v62 = vshll.u32 %v9512_v41, 16  ;;  %v1608_v61 = vshrl.u32 %v9511_v40, 16  ;;  %v1600_v1 = vshrl.u32 %v9512_v41, 16  ;;  %v8801_v12 = vld [vmem:[#allocation10 + $0x2e4] ss:$16 sps:$4 sm:$0xff]  }
 0x1d4   : > { %2352 = vmatprep.mubr.bf16.mxu0 %v1631_v27  ;;  %2478 = vmatprep.mubr.bf16.mxu1 %v1631_v27  ;;  %v1110_v59 = vmax.f32 %v1085_v51, 0.0  ;;  %v1582_v60 = vrot.slane %v1580_v53, 1  ;;  %v10114_v9 = vpack.c.bf16 %v1109_v57, %v1105_v44  ;;  %v8807_v27 = vld [vmem:[#allocation10 + $0x304] ss:$16 sps:$4 sm:$0xff]   ;;  %v8805_v29 = vld [vmem:[#allocation10 + $0x300] ss:$16 sps:$4 sm:$0xff]  }
 0x1d5   : > { %1192 = vst [vmem:[#allocation2 + $0x48] sm:$0xff] %v8186_v58  ;;  %v10110_v7 = vrot.slane %v1568_v62, 1  ;;  %v8813_v31 = vld [vmem:[#allocation10 + $0x324] ss:$16 sps:$4 sm:$0xff]   ;;  %v8816_v32 = vld [vmem:[#allocation10 + $0x32c] ss:$16 sps:$4 sm:$0xff]  }
 0x1d6   : > { %2370 = vmatpush1.bf16.msra.mxu0 %v8775_v26  ;;  %2496 = vmatpush1.bf16.msra.mxu1 %v8778_v15  ;;  %v8188_v0 = vpack.c.bf16 %v1110_v59, %v1109_v57  ;;  %v1583_v56 = vsel %vm1535_vm0, %v1578_v52, %v1582_v60  ;;  %v10112_v8 = vpack.c.bf16 %v1110_v59, %v1106_v50  ;;  %v1604_v21 = vshll.u32 %v10114_v9, 16  ;;  %v8811_v16 = vld [vmem:[#allocation10 + $0x320] ss:$16 sps:$4 sm:$0xff]   ;;  %v8814_v33 = vld [vmem:[#allocation10 + $0x328] ss:$16 sps:$4 sm:$0xff]  }
 0x1d7   : > { %2371 = vmatprep.subr.bf16.mxu0 %v8783_v30  ;;  %2497 = vmatprep.subr.bf16.mxu1 %v8786_v34  ;;  %v1610_v18 = vor.u32 %v1608_v61, %v1582_v60  ;;  %v1602_v20 = vor.u32 %v1600_v1, %v10110_v7  ;;  %v8808_v30 = vld [vmem:[#allocation10 + $0x308] ss:$16 sps:$4 sm:$0xff]   ;;  %v8819_v34 = vld [vmem:[#allocation10 + $0x344] ss:$16 sps:$4 sm:$0xff]   ;;  %v8822_v35 = vld [vmem:[#allocation10 + $0x34c] ss:$16 sps:$4 sm:$0xff]  }
 0x1d8   : > { %1194 = vst [vmem:[#allocation2 + $0x58] sm:$0xff] %v8188_v0  ;;  %v1612_v19 = vshll.u32 %v10112_v8, 16  ;;  %v10121_v23 = vrot.slane %v1604_v21, 1  ;;  %v8817_v36 = vld [vmem:[#allocation10 + $0x340] ss:$16 sps:$4 sm:$0xff]   ;;  %v1561_v62 = vshrl.u32 %v10094_v5, 16 }
 0x1d9   : > { %2353 = vmatmul.mubr.bf16.gmra.mrb[20].mxu0 %v1623_v48  ;;  %2479 = vmatmul.mubr.bf16.gmra.mrb[20].mxu1 %v1623_v48  ;;  %v8820_v37 = vld [vmem:[#allocation10 + $0x348] ss:$16 sps:$4 sm:$0xff]   ;;  %v8826_v38 = vld [vmem:[#allocation10 + $0x364] ss:$16 sps:$4 sm:$0xff]   ;;  %v8829_v40 = vld [vmem:[#allocation10 + $0x36c] ss:$16 sps:$4 sm:$0xff]  }
 0x1da   : > { %2372 = vmatpush1.bf16.msra.mxu0 %v8781_v42  ;;  %2498 = vmatpush1.bf16.msra.mxu1 %v8784_v43  ;;  %v10119_v22 = vrot.slane %v1612_v19, 1  ;;  %v10129_v15 = vsel %vm1535_vm0, %v1602_v20, %v10121_v23  ;;  %v8824_v41 = vld [vmem:[#allocation10 + $0x360] ss:$16 sps:$4 sm:$0xff]   ;;  %v8827_v42 = vld [vmem:[#allocation10 + $0x368] ss:$16 sps:$4 sm:$0xff]  }
 0x1db   : > { %2373 = vmatprep.subr.bf16.mxu0 %v8789_v49  ;;  %2499 = vmatprep.subr.bf16.mxu1 %v8792_v54  ;;  %v8833_v43 = vld [vmem:[#allocation10 + $0x384] ss:$16 sps:$4 sm:$0xff]   ;;  %v8836_v44 = vld [vmem:[#allocation10 + $0x38c] ss:$16 sps:$4 sm:$0xff]   ;;  %v8831_v45 = vld [vmem:[#allocation10 + $0x380] ss:$16 sps:$4 sm:$0xff]  }
 0x1dc   : > { %2395 = vmatprep.mubr.bf16.mxu0 %v1583_v56  ;;  %2521 = vmatprep.mubr.bf16.mxu1 %v1583_v56  ;;  %v10125_v26 = vsel %vm1535_vm0, %v1610_v18, %v10119_v22  ;;  %v8834_v47 = vld [vmem:[#allocation10 + $0x388] ss:$16 sps:$4 sm:$0xff]   ;;  %v8839_v48 = vld [vmem:[#allocation10 + $0x3a4] ss:$16 sps:$4 sm:$0xff]   ;;  %v8842_v49 = vld [vmem:[#allocation10 + $0x3ac] ss:$16 sps:$4 sm:$0xff]  }
 0x1dd   : > { %v8837_v50 = vld [vmem:[#allocation10 + $0x3a0] ss:$16 sps:$4 sm:$0xff]   ;;  %v8840_v51 = vld [vmem:[#allocation10 + $0x3a8] ss:$16 sps:$4 sm:$0xff]   ;;  %v8845_v52 = vld [vmem:[#allocation10 + $0x3c4] ss:$16 sps:$4 sm:$0xff]  }
 0x1de   : > { %2374 = vmatpush1.bf16.msra.mxu0 %v8787_v55  ;;  %2500 = vmatpush1.bf16.msra.mxu1 %v8790_v63  ;;  %v8848_v53 = vld [vmem:[#allocation10 + $0x3cc] ss:$16 sps:$4 sm:$0xff]   ;;  %v1563_v54 = vshll.u32 %v10094_v5, 16  ;;  %v8843_v57 = vld [vmem:[#allocation10 + $0x3c0] ss:$16 sps:$4 sm:$0xff]  }
 0x1df   : > { %2375 = vmatprep.subr.bf16.mxu0 %v8795_v3  ;;  %2501 = vmatprep.subr.bf16.mxu1 %v8798_v6  ;;  %v8846_v58 = vld [vmem:[#allocation10 + $0x3c8] ss:$16 sps:$4 sm:$0xff]   ;;  %v8851_v59 = vld [vmem:[#allocation10 + $0x3e4] ss:$16 sps:$4 sm:$0xff]   ;;  %v8854_v60 = vld [vmem:[#allocation10 + $0x3ec] ss:$16 sps:$4 sm:$0xff]  }
 0x1e0   : > { %v1565_v55 = vrot.slane %v1563_v54, 1  ;;  %v1348_v63 = vld [vmem:[#allocation2 + $0x68] sm:$0x11]  ;;  %v8849_v0 = vld [vmem:[#allocation10 + $0x3e0] ss:$16 sps:$4 sm:$0xff]  }
 0x1e1   : > { %v8852_v56 = vld [vmem:[#allocation10 + $0x3e8] ss:$16 sps:$4 sm:$0xff]   ;;  %v8857_v61 = vld [vmem:[#allocation8 + $0x4] ss:$16 sps:$4 sm:$0xff]   ;;  %v8860_v1 = vld [vmem:[#allocation8 + $0xc] ss:$16 sps:$4 sm:$0xff]   ;;  %v7547_v3 = vcombine.high %v1348_v63, %v1348_v63  ;;  %v7546_v21 = vcombine.low %v1348_v63, %v1348_v63 }
 0x1e2   : > { %2376 = vmatpush1.bf16.msra.mxu0 %v8793_v2  ;;  %2502 = vmatpush1.bf16.msra.mxu1 %v8796_v11  ;;  %v1566_v6 = vor.u32 %v1565_v55, %v1561_v62  ;;  %v8855_v2 = vld [vmem:[#allocation8] ss:$16 sps:$4 sm:$0xff]   ;;  %v8858_v11 = vld [vmem:[#allocation8 + $0x8] ss:$16 sps:$4 sm:$0xff]   ;;  %v8863_v19 = vld [vmem:[#allocation8 + $0x24] ss:$16 sps:$4 sm:$0xff]  }
 0x1e3   : > { %2377 = vmatprep.subr.bf16.mxu0 %v8801_v12  ;;  %2503 = vmatprep.subr.bf16.mxu1 %v8804_v17  ;;  %v1640_v12 = vshrl.u32 %v10112_v8, 16  ;;  %v1644_v17 = vshll.u32 %v7547_v3, 16  ;;  %v8866_v20 = vld [vmem:[#allocation8 + $0x2c] ss:$16 sps:$4 sm:$0xff]   ;;  %v8910_v54 = vld [vmem:[#allocation8 + $0x104] ss:$16 sps:$4 sm:$0xff]  }
 0x1e4   : > { %v1571_v18 = vsel %vm1535_vm0, %v1566_v6, %v10110_v7  ;;  %v8872_v7 = vld [vmem:[#allocation8 + $0x4c] ss:$16 sps:$4 sm:$0xff]   ;;  %v8914_v55 = vld [vmem:[#allocation8 + $0x120] ss:$16 sps:$4 sm:$0xff]   ;;  %v8917_v63 = vld [vmem:[#allocation8 + $0x128] ss:$16 sps:$4 sm:$0xff]  }
 0x1e5   : > { %v1646_v8 = vrot.slane %v1644_v17, 1  ;;  %v8919_v62 = vld [vmem:[#allocation8 + $0x12c] ss:$16 sps:$4 sm:$0xff]   ;;  %v8928_v3 = vld [vmem:[#allocation8 + $0x164] ss:$16 sps:$4 sm:$0xff]  }
 0x1e6   : > { %2378 = vmatpush1.bf16.msra.mxu0 %v8799_v24  ;;  %2504 = vmatpush1.bf16.msra.mxu1 %v8802_v25  ;;  %v8861_v24 = vld [vmem:[#allocation8 + $0x20] ss:$16 sps:$4 sm:$0xff]   ;;  %v8864_v25 = vld [vmem:[#allocation8 + $0x28] ss:$16 sps:$4 sm:$0xff]   ;;  %v8931_v6 = vld [vmem:[#allocation8 + $0x16c] ss:$16 sps:$4 sm:$0xff]  }
 0x1e7   : > { %2379 = vmatprep.subr.bf16.mxu0 %v8807_v27  ;;  %2505 = vmatprep.subr.bf16.mxu1 %v8810_v28  ;;  %v1642_v27 = vor.u32 %v1640_v12, %v10119_v22  ;;  %v8869_v28 = vld [vmem:[#allocation8 + $0x44] ss:$16 sps:$4 sm:$0xff]   ;;  %v8937_v17 = vld [vmem:[#allocation8 + $0x18c] ss:$16 sps:$4 sm:$0xff]  }
 0x1e8   : > { %v8934_v12 = vld [vmem:[#allocation8 + $0x184] ss:$16 sps:$4 sm:$0xff]  }
 0x1ea   : > { %2380 = vmatpush1.bf16.msra.mxu0 %v8805_v29  ;;  %2506 = vmatpush1.bf16.msra.mxu1 %v8808_v30  ;;  %v1632_v29 = vshrl.u32 %v10114_v9, 16  ;;  %v1636_v30 = vshll.u32 %v7546_v21, 16  ;;  %v8943_v21 = vld [vmem:[#allocation8 + $0x1ac] ss:$16 sps:$4 sm:$0xff]  }
 0x1eb   : > { %2381 = vmatprep.subr.bf16.mxu0 %v8813_v31  ;;  %2507 = vmatprep.subr.bf16.mxu1 %v8816_v32  ;;  %v8867_v31 = vld [vmem:[#allocation8 + $0x40] ss:$16 sps:$4 sm:$0xff]   ;;  %v8870_v32 = vld [vmem:[#allocation8 + $0x48] ss:$16 sps:$4 sm:$0xff]  }
 0x1ec   : > { %v1634_v22 = vor.u32 %v1632_v29, %v10121_v23  ;;  %v1638_v9 = vrot.slane %v1636_v30, 1  ;;  %v8895_v23 = vld [vmem:[#allocation8 + $0xac] ss:$16 sps:$4 sm:$0xff]   ;;  %v8952_v29 = vld [vmem:[#allocation8 + $0x1e4] ss:$16 sps:$4 sm:$0xff]  }
 0x1ed   : > { %v8955_v30 = vld [vmem:[#allocation8 + $0x1ec] ss:$16 sps:$4 sm:$0xff]  }
 0x1ee   : > { %2382 = vmatpush1.bf16.msra.mxu0 %v8811_v16  ;;  %2508 = vmatpush1.bf16.msra.mxu1 %v8814_v33  ;;  %v8875_v16 = vld [vmem:[#allocation8 + $0x64] ss:$16 sps:$4 sm:$0xff]   ;;  %v8878_v33 = vld [vmem:[#allocation8 + $0x6c] ss:$16 sps:$4 sm:$0xff]  }
 0x1ef   : > { %2383 = vmatprep.subr.bf16.mxu0 %v8819_v34  ;;  %2509 = vmatprep.subr.bf16.mxu1 %v8822_v35  ;;  %v8873_v34 = vld [vmem:[#allocation8 + $0x60] ss:$16 sps:$4 sm:$0xff]   ;;  %v8876_v35 = vld [vmem:[#allocation8 + $0x68] ss:$16 sps:$4 sm:$0xff]  }
 0x1f2   : > { %2384 = vmatpush1.bf16.msra.mxu0 %v8817_v36  ;;  %2510 = vmatpush1.bf16.msra.mxu1 %v8820_v37  ;;  %v8883_v36 = vld [vmem:[#allocation8 + $0x84] ss:$16 sps:$4 sm:$0xff]   ;;  %v8886_v37 = vld [vmem:[#allocation8 + $0x8c] ss:$16 sps:$4 sm:$0xff]  }
 0x1f3   : > { %2385 = vmatprep.subr.bf16.mxu0 %v8826_v38  ;;  %2511 = vmatprep.subr.bf16.mxu1 %v8829_v40  ;;  %v1639_v38 = vsel %vm1535_vm0, %v1634_v22, %v1638_v9  ;;  %v8881_v40 = vld [vmem:[#allocation8 + $0x80] ss:$16 sps:$4 sm:$0xff]   ;;  %v8959_v9 = vld [vmem:[#allocation8 + $0x208] ss:$16 sps:$4 sm:$0xff]  }
 0x1f4   : > { %v8887_v22 = vld [vmem:[#allocation2] ss:$16 sps:$4 sm:$0xff]  }
 0x1f6   : > { %2386 = vmatpush1.bf16.msra.mxu0 %v8824_v41  ;;  %2512 = vmatpush1.bf16.msra.mxu1 %v8827_v42  ;;  %v8884_v41 = vld [vmem:[#allocation8 + $0x88] ss:$16 sps:$4 sm:$0xff]   ;;  %v8892_v42 = vld [vmem:[#allocation8 + $0xa4] ss:$16 sps:$4 sm:$0xff]  }
 0x1f7   : > { %2387 = vmatprep.subr.bf16.mxu0 %v8833_v43  ;;  %2513 = vmatprep.subr.bf16.mxu1 %v8836_v44  ;;  %v8890_v43 = vld [vmem:[#allocation8 + $0xa0] ss:$16 sps:$4 sm:$0xff]   ;;  %v8893_v44 = vld [vmem:[#allocation8 + $0xa8] ss:$16 sps:$4 sm:$0xff]  }
 0x1fa   : > { %2388 = vmatpush1.bf16.msra.mxu0 %v8831_v45  ;;  %2514 = vmatpush1.bf16.msra.mxu1 %v8834_v47  ;;  %v8898_v45 = vld [vmem:[#allocation8 + $0xc4] ss:$16 sps:$4 sm:$0xff]   ;;  %v8901_v47 = vld [vmem:[#allocation8 + $0xcc] ss:$16 sps:$4 sm:$0xff]  }
 0x1fb   : > { %2389 = vmatprep.subr.bf16.mxu0 %v8839_v48  ;;  %2515 = vmatprep.subr.bf16.mxu1 %v8842_v49  ;;  %v8896_v48 = vld [vmem:[#allocation8 + $0xc0] ss:$16 sps:$4 sm:$0xff]   ;;  %v8899_v49 = vld [vmem:[#allocation8 + $0xc8] ss:$16 sps:$4 sm:$0xff]  }
 0x1fe   : > { %2390 = vmatpush1.bf16.msra.mxu0 %v8837_v50  ;;  %2516 = vmatpush1.bf16.msra.mxu1 %v8840_v51  ;;  %v8904_v50 = vld [vmem:[#allocation8 + $0xe4] ss:$16 sps:$4 sm:$0xff]   ;;  %v8907_v51 = vld [vmem:[#allocation8 + $0xec] ss:$16 sps:$4 sm:$0xff]  }
 0x1ff   : > { %2391 = vmatprep.subr.bf16.mxu0 %v8845_v52  ;;  %2517 = vmatprep.subr.bf16.mxu1 %v8848_v53  ;;  %v8902_v52 = vld [vmem:[#allocation8 + $0xe0] ss:$16 sps:$4 sm:$0xff]   ;;  %v8905_v53 = vld [vmem:[#allocation8 + $0xe8] ss:$16 sps:$4 sm:$0xff]  }
 0x202   : > { %2392 = vmatpush1.bf16.msra.mxu0 %v8843_v57  ;;  %2518 = vmatpush1.bf16.msra.mxu1 %v8846_v58  ;;  %v8913_v57 = vld [vmem:[#allocation8 + $0x10c] ss:$16 sps:$4 sm:$0xff]   ;;  %v8908_v58 = vld [vmem:[#allocation8 + $0x100] ss:$16 sps:$4 sm:$0xff]  }
 0x203   : > { %2393 = vmatprep.subr.bf16.mxu0 %v8851_v59  ;;  %2519 = vmatprep.subr.bf16.mxu1 %v8854_v60  ;;  %v8911_v59 = vld [vmem:[#allocation8 + $0x108] ss:$16 sps:$4 sm:$0xff]   ;;  %v8916_v60 = vld [vmem:[#allocation8 + $0x124] ss:$16 sps:$4 sm:$0xff]  }
 0x206   : > { %2394 = vmatpush1.bf16.msra.mxu0 %v8849_v0  ;;  %2520 = vmatpush1.bf16.msra.mxu1 %v8852_v56  ;;  %v8922_v0 = vld [vmem:[#allocation8 + $0x144] ss:$16 sps:$4 sm:$0xff]   ;;  %v8925_v56 = vld [vmem:[#allocation8 + $0x14c] ss:$16 sps:$4 sm:$0xff]  }
 0x207   : > { %3252 = vmatprep.subr.bf16.mxu0 %v8857_v61  ;;  %3378 = vmatprep.subr.bf16.mxu1 %v8860_v1  ;;  %v8920_v61 = vld [vmem:[#allocation8 + $0x140] ss:$16 sps:$4 sm:$0xff]   ;;  %v8923_v1 = vld [vmem:[#allocation8 + $0x148] ss:$16 sps:$4 sm:$0xff]  }
 0x209   : > { %2396 = vmatmul.mubr.bf16.vlgmr.msra.gmra.mrb[12].mxu0 %v1571_v18  ;;  %2522 = vmatmul.mubr.bf16.vlgmr.msra.gmra.mrb[12].mxu1 %v1571_v18  ;;  %v8932_v18 = vld [vmem:[#allocation8 + $0x180] ss:$16 sps:$4 sm:$0xff]  }
 0x20a   : > { %2405 = vmatprep.mubr.bf16.mxu0 %v10125_v26  ;;  %2531 = vmatprep.mubr.bf16.mxu1 %v10125_v26  ;;  %v1647_v26 = vsel %vm1535_vm0, %v1642_v27, %v1646_v8  ;;  %v8946_v27 = vld [vmem:[#allocation8 + $0x1c4] ss:$16 sps:$4 sm:$0xff]   ;;  %v8949_v8 = vld [vmem:[#allocation8 + $0x1cc] ss:$16 sps:$4 sm:$0xff]  }
 0x20b   : > { %3253 = vmatpush1.bf16.msra.mxu0 %v8855_v2  ;;  %3379 = vmatpush1.bf16.msra.mxu1 %v8858_v11  ;;  %v8926_v2 = vld [vmem:[#allocation8 + $0x160] ss:$16 sps:$4 sm:$0xff]   ;;  %v8929_v11 = vld [vmem:[#allocation8 + $0x168] ss:$16 sps:$4 sm:$0xff]  }
 0x20c   : > { %3254 = vmatprep.subr.bf16.mxu0 %v8863_v19  ;;  %3380 = vmatprep.subr.bf16.mxu1 %v8866_v20  ;;  %v8935_v19 = vld [vmem:[#allocation8 + $0x188] ss:$16 sps:$4 sm:$0xff]   ;;  %v8940_v20 = vld [vmem:[#allocation8 + $0x1a4] ss:$16 sps:$4 sm:$0xff]  }
 0x20f   : > { %3255 = vmatpush1.bf16.msra.mxu0 %v8861_v24  ;;  %3381 = vmatpush1.bf16.msra.mxu1 %v8864_v25  ;;  %v8938_v24 = vld [vmem:[#allocation8 + $0x1a0] ss:$16 sps:$4 sm:$0xff]   ;;  %v8941_v25 = vld [vmem:[#allocation8 + $0x1a8] ss:$16 sps:$4 sm:$0xff]  }
 0x210   : > { %3256 = vmatprep.subr.bf16.mxu0 %v8869_v28  ;;  %3382 = vmatprep.subr.bf16.mxu1 %v8872_v7  ;;  %v8944_v28 = vld [vmem:[#allocation8 + $0x1c0] ss:$16 sps:$4 sm:$0xff]   ;;  %v8947_v7 = vld [vmem:[#allocation8 + $0x1c8] ss:$16 sps:$4 sm:$0xff]  }
 0x211   : > { %2406 = vmatmul.mubr.bf16.gmra.mrb[16].mxu0 %v10129_v15  ;;  %2532 = vmatmul.mubr.bf16.gmra.mrb[16].mxu1 %v10129_v15  ;;  %v8889_v15 = vld [vmem:[#allocation2 + $0x4] ss:$16 sps:$4 sm:$0xff]  }
 0x212   : > { %2415 = vmatprep.mubr.bf16.mxu0 %v1647_v26  ;;  %2541 = vmatprep.mubr.bf16.mxu1 %v1647_v26  ;;  %v8958_v26 = vld [vmem:[#allocation8 + $0x204] ss:$16 sps:$4 sm:$0xff]  }
 0x213   : > { %3257 = vmatpush1.bf16.msra.mxu0 %v8867_v31  ;;  %3383 = vmatpush1.bf16.msra.mxu1 %v8870_v32  ;;  %v8950_v31 = vld [vmem:[#allocation8 + $0x1e0] ss:$16 sps:$4 sm:$0xff]   ;;  %v8953_v32 = vld [vmem:[#allocation8 + $0x1e8] ss:$16 sps:$4 sm:$0xff]  }
 0x214   : > { %3258 = vmatprep.subr.bf16.mxu0 %v8875_v16  ;;  %3384 = vmatprep.subr.bf16.mxu1 %v8878_v33  ;;  %v8961_v16 = vld [vmem:[#allocation8 + $0x20c] ss:$16 sps:$4 sm:$0xff]   ;;  %v8956_v33 = vld [vmem:[#allocation8 + $0x200] ss:$16 sps:$4 sm:$0xff]  }
 0x217   : > { %3259 = vmatpush1.bf16.msra.mxu0 %v8873_v34  ;;  %3385 = vmatpush1.bf16.msra.mxu1 %v8876_v35  ;;  %v8962_v34 = vld [vmem:[#allocation2 + $0x24] ss:$16 sps:$4 sm:$0xff]  }
 0x218   : > { %3260 = vmatprep.subr.bf16.mxu0 %v8883_v36  ;;  %3386 = vmatprep.subr.bf16.mxu1 %v8886_v37  ;;  %v8966_v35 = vld [vmem:[#allocation8 + $0x224] ss:$16 sps:$4 sm:$0xff]   ;;  %v8969_v36 = vld [vmem:[#allocation8 + $0x22c] ss:$16 sps:$4 sm:$0xff]   ;;  %v8964_v37 = vld [vmem:[#allocation8 + $0x220] ss:$16 sps:$4 sm:$0xff]  }
 0x219   : > { %2416 = vmatmul.mubr.bf16.gmra.mrb[20].mxu0 %v1639_v38  ;;  %2542 = vmatmul.mubr.bf16.gmra.mrb[20].mxu1 %v1639_v38  ;;  %v8967_v38 = vld [vmem:[#allocation8 + $0x228] ss:$16 sps:$4 sm:$0xff]  }
 0x21a   : > { %3284 = vmatprep.mubr.bf16.mxu0 %v8889_v15  ;;  %3410 = vmatprep.mubr.bf16.mxu1 %v8889_v15  ;;  %v8971_v15 = vld [vmem:[#allocation8 + $0x240] ss:$16 sps:$4 sm:$0xff]  }
 0x21b   : > { %3261 = vmatpush1.bf16.msra.mxu0 %v8881_v40  ;;  %3387 = vmatpush1.bf16.msra.mxu1 %v8884_v41  ;;  %v8973_v40 = vld [vmem:[#allocation8 + $0x244] ss:$16 sps:$4 sm:$0xff]   ;;  %v8976_v41 = vld [vmem:[#allocation8 + $0x24c] ss:$16 sps:$4 sm:$0xff]  }
 0x21c   : > { %3262 = vmatprep.subr.bf16.mxu0 %v8892_v42  ;;  %3388 = vmatprep.subr.bf16.mxu1 %v8895_v23  ;;  %v8970_v42 = vld [vmem:[#allocation2 + $0x20] ss:$16 sps:$4 sm:$0xff]   ;;  %v8974_v23 = vld [vmem:[#allocation8 + $0x248] ss:$16 sps:$4 sm:$0xff]  }
 0x21f   : > { %3263 = vmatpush1.bf16.msra.mxu0 %v8890_v43  ;;  %3389 = vmatpush1.bf16.msra.mxu1 %v8893_v44  ;;  %v8977_v43 = vld [vmem:[#allocation2 + $0x44] ss:$16 sps:$4 sm:$0xff]  }
 0x220   : > { %3264 = vmatprep.subr.bf16.mxu0 %v8898_v45  ;;  %3390 = vmatprep.subr.bf16.mxu1 %v8901_v47  ;;  %v8981_v44 = vld [vmem:[#allocation8 + $0x264] ss:$16 sps:$4 sm:$0xff]   ;;  %v8984_v45 = vld [vmem:[#allocation8 + $0x26c] ss:$16 sps:$4 sm:$0xff]   ;;  %v8979_v47 = vld [vmem:[#allocation8 + $0x260] ss:$16 sps:$4 sm:$0xff]  }
 0x223   : > { %3265 = vmatpush1.bf16.msra.mxu0 %v8896_v48  ;;  %3391 = vmatpush1.bf16.msra.mxu1 %v8899_v49  ;;  %v8982_v48 = vld [vmem:[#allocation8 + $0x268] ss:$16 sps:$4 sm:$0xff]   ;;  %v8988_v49 = vld [vmem:[#allocation8 + $0x284] ss:$16 sps:$4 sm:$0xff]  }
 0x224   : > { %3266 = vmatprep.subr.bf16.mxu0 %v8904_v50  ;;  %3392 = vmatprep.subr.bf16.mxu1 %v8907_v51  ;;  %v8991_v50 = vld [vmem:[#allocation8 + $0x28c] ss:$16 sps:$4 sm:$0xff]   ;;  %v8986_v51 = vld [vmem:[#allocation8 + $0x280] ss:$16 sps:$4 sm:$0xff]  }
 0x227   : > { %3267 = vmatpush1.bf16.msra.mxu0 %v8902_v52  ;;  %3393 = vmatpush1.bf16.msra.mxu1 %v8905_v53  ;;  %v8985_v52 = vld [vmem:[#allocation2 + $0x40] ss:$16 sps:$4 sm:$0xff]   ;;  %v8989_v53 = vld [vmem:[#allocation8 + $0x288] ss:$16 sps:$4 sm:$0xff]  }
 0x228   : > { %3268 = vmatprep.subr.bf16.mxu0 %v8910_v54  ;;  %3394 = vmatprep.subr.bf16.mxu1 %v8913_v57  ;;  %v8994_v54 = vld [vmem:[#allocation8 + $0x2a4] ss:$16 sps:$4 sm:$0xff]   ;;  %v8997_v57 = vld [vmem:[#allocation8 + $0x2ac] ss:$16 sps:$4 sm:$0xff]  }
 0x22b   : > { %3269 = vmatpush1.bf16.msra.mxu0 %v8908_v58  ;;  %3395 = vmatpush1.bf16.msra.mxu1 %v8911_v59  ;;  %v8992_v58 = vld [vmem:[#allocation8 + $0x2a0] ss:$16 sps:$4 sm:$0xff]   ;;  %v8995_v59 = vld [vmem:[#allocation8 + $0x2a8] ss:$16 sps:$4 sm:$0xff]  }
 0x22c   : > { %3270 = vmatprep.subr.bf16.mxu0 %v8916_v60  ;;  %3396 = vmatprep.subr.bf16.mxu1 %v8919_v62  ;;  %v9000_v60 = vld [vmem:[#allocation8 + $0x2c4] ss:$16 sps:$4 sm:$0xff]   ;;  %v9003_v62 = vld [vmem:[#allocation8 + $0x2cc] ss:$16 sps:$4 sm:$0xff]  }
 0x22f   : > { %3271 = vmatpush1.bf16.msra.mxu0 %v8914_v55  ;;  %3397 = vmatpush1.bf16.msra.mxu1 %v8917_v63  ;;  %v8998_v55 = vld [vmem:[#allocation8 + $0x2c0] ss:$16 sps:$4 sm:$0xff]   ;;  %v9001_v63 = vld [vmem:[#allocation8 + $0x2c8] ss:$16 sps:$4 sm:$0xff]  }
 0x230   : > { %3272 = vmatprep.subr.bf16.mxu0 %v8922_v0  ;;  %3398 = vmatprep.subr.bf16.mxu1 %v8925_v56  ;;  %v9006_v0 = vld [vmem:[#allocation8 + $0x2e4] ss:$16 sps:$4 sm:$0xff]   ;;  %v9009_v56 = vld [vmem:[#allocation8 + $0x2ec] ss:$16 sps:$4 sm:$0xff]  }
 0x233   : > { %3273 = vmatpush1.bf16.msra.mxu0 %v8920_v61  ;;  %3399 = vmatpush1.bf16.msra.mxu1 %v8923_v1  ;;  %v9004_v61 = vld [vmem:[#allocation8 + $0x2e0] ss:$16 sps:$4 sm:$0xff]   ;;  %v9007_v1 = vld [vmem:[#allocation8 + $0x2e8] ss:$16 sps:$4 sm:$0xff]  }
 0x234   : > { %3274 = vmatprep.subr.bf16.mxu0 %v8928_v3  ;;  %3400 = vmatprep.subr.bf16.mxu1 %v8931_v6  ;;  %v9012_v3 = vld [vmem:[#allocation8 + $0x304] ss:$16 sps:$4 sm:$0xff]   ;;  %v9010_v6 = vld [vmem:[#allocation8 + $0x300] ss:$16 sps:$4 sm:$0xff]  }
 0x237   : > { %3275 = vmatpush1.bf16.msra.mxu0 %v8926_v2  ;;  %3401 = vmatpush1.bf16.msra.mxu1 %v8929_v11  ;;  %v9013_v2 = vld [vmem:[#allocation8 + $0x308] ss:$16 sps:$4 sm:$0xff]   ;;  %v9018_v11 = vld [vmem:[#allocation8 + $0x324] ss:$16 sps:$4 sm:$0xff]  }
 0x238   : > { %3276 = vmatprep.subr.bf16.mxu0 %v8934_v12  ;;  %3402 = vmatprep.subr.bf16.mxu1 %v8937_v17  ;;  %v9021_v12 = vld [vmem:[#allocation8 + $0x32c] ss:$16 sps:$4 sm:$0xff]   ;;  %v9016_v17 = vld [vmem:[#allocation8 + $0x320] ss:$16 sps:$4 sm:$0xff]  }
 0x23b   : > { %3277 = vmatpush1.bf16.msra.mxu0 %v8932_v18  ;;  %3403 = vmatpush1.bf16.msra.mxu1 %v8935_v19  ;;  %v9019_v18 = vld [vmem:[#allocation8 + $0x328] ss:$16 sps:$4 sm:$0xff]   ;;  %v9024_v19 = vld [vmem:[#allocation8 + $0x344] ss:$16 sps:$4 sm:$0xff]  }
 0x23c   : > { %3278 = vmatprep.subr.bf16.mxu0 %v8940_v20  ;;  %3404 = vmatprep.subr.bf16.mxu1 %v8943_v21  ;;  %v9027_v20 = vld [vmem:[#allocation8 + $0x34c] ss:$16 sps:$4 sm:$0xff]   ;;  %v9022_v21 = vld [vmem:[#allocation8 + $0x340] ss:$16 sps:$4 sm:$0xff]  }
 0x23f   : > { %3279 = vmatpush1.bf16.msra.mxu0 %v8938_v24  ;;  %3405 = vmatpush1.bf16.msra.mxu1 %v8941_v25  ;;  %v9025_v24 = vld [vmem:[#allocation8 + $0x348] ss:$16 sps:$4 sm:$0xff]   ;;  %v9030_v25 = vld [vmem:[#allocation8 + $0x364] ss:$16 sps:$4 sm:$0xff]  }
 0x240   : > { %3280 = vmatprep.subr.bf16.mxu0 %v8946_v27  ;;  %3406 = vmatprep.subr.bf16.mxu1 %v8949_v8  ;;  %v9033_v27 = vld [vmem:[#allocation8 + $0x36c] ss:$16 sps:$4 sm:$0xff]   ;;  %v9028_v8 = vld [vmem:[#allocation8 + $0x360] ss:$16 sps:$4 sm:$0xff]  }
 0x243   : > { %3281 = vmatpush1.bf16.msra.mxu0 %v8944_v28  ;;  %3407 = vmatpush1.bf16.msra.mxu1 %v8947_v7  ;;  %v9031_v28 = vld [vmem:[#allocation8 + $0x368] ss:$16 sps:$4 sm:$0xff]   ;;  %v9036_v7 = vld [vmem:[#allocation8 + $0x384] ss:$16 sps:$4 sm:$0xff]  }
 0x244   : > { %3282 = vmatprep.subr.bf16.mxu0 %v8952_v29  ;;  %3408 = vmatprep.subr.bf16.mxu1 %v8955_v30  ;;  %v9039_v29 = vld [vmem:[#allocation8 + $0x38c] ss:$16 sps:$4 sm:$0xff]   ;;  %v9034_v30 = vld [vmem:[#allocation8 + $0x380] ss:$16 sps:$4 sm:$0xff]  }
 0x247   : > { %3283 = vmatpush1.bf16.msra.mxu0 %v8950_v31  ;;  %3409 = vmatpush1.bf16.msra.mxu1 %v8953_v32  ;;  %v9037_v31 = vld [vmem:[#allocation8 + $0x388] ss:$16 sps:$4 sm:$0xff]   ;;  %v9042_v32 = vld [vmem:[#allocation8 + $0x3a4] ss:$16 sps:$4 sm:$0xff]  }
 0x248   : > { %3315 = vmatprep.subr.bf16.mxu0 %v8958_v26  ;;  %3441 = vmatprep.subr.bf16.mxu1 %v8961_v16  ;;  %v9045_v26 = vld [vmem:[#allocation8 + $0x3ac] ss:$16 sps:$4 sm:$0xff]   ;;  %v9040_v16 = vld [vmem:[#allocation8 + $0x3a0] ss:$16 sps:$4 sm:$0xff]  }
 0x24a   : > { %3285 = vmatmul.mubr.bf16.vlgmr.msra.gmra.mrb[12].mxu0 %v8887_v22  ;;  %3411 = vmatmul.mubr.bf16.vlgmr.msra.gmra.mrb[12].mxu1 %v8887_v22  ;;  %v9048_v22 = vld [vmem:[#allocation8 + $0x3c4] ss:$16 sps:$4 sm:$0xff]  }
 0x24b   : > { %3294 = vmatprep.mubr.bf16.mxu0 %v8962_v34  ;;  %3316 = vmatpush1.bf16.msra.mxu0 %v8956_v33  ;;  %v9043_v33 = vld [vmem:[#allocation8 + $0x3a8] ss:$16 sps:$4 sm:$0xff]  }
 0x24c   : > { %3420 = vmatprep.mubr.bf16.mxu1 %v8962_v34  ;;  %3442 = vmatpush1.bf16.msra.mxu1 %v8959_v9  ;;  %v9051_v9 = vld [vmem:[#allocation8 + $0x3cc] ss:$16 sps:$4 sm:$0xff]   ;;  %v9046_v34 = vld [vmem:[#allocation8 + $0x3c0] ss:$16 sps:$4 sm:$0xff]  }
 0x24d   : > { %3317 = vmatprep.subr.bf16.mxu0 %v8966_v35  ;;  %3443 = vmatprep.subr.bf16.mxu1 %v8969_v36  ;;  %v9049_v35 = vld [vmem:[#allocation8 + $0x3c8] ss:$16 sps:$4 sm:$0xff]   ;;  %v9054_v36 = vld [vmem:[#allocation8 + $0x3e4] ss:$16 sps:$4 sm:$0xff]  }
 0x24f   : > { %3318 = vmatpush1.bf16.msra.mxu0 %v8964_v37  ;;  %v9057_v37 = vld [vmem:[#allocation8 + $0x3ec] ss:$16 sps:$4 sm:$0xff]  }
 0x250   : > { %3444 = vmatpush1.bf16.msra.mxu1 %v8967_v38  ;;  %3319 = vmatprep.subr.bf16.mxu0 %v8973_v40  ;;  %v9052_v38 = vld [vmem:[#allocation8 + $0x3e0] ss:$16 sps:$4 sm:$0xff]   ;;  %v9055_v40 = vld [vmem:[#allocation8 + $0x3e8] ss:$16 sps:$4 sm:$0xff]  }
 0x251   : > { %3445 = vmatprep.subr.bf16.mxu1 %v8976_v41  ;;  %v9066_v41 = vld [vmem:[#allocation13 + $0x4] ss:$16 sps:$4 sm:$0xff]  }
 0x252   : > { %3295 = vmatmul.mubr.bf16.gmra.mrb[16].mxu0 %v8970_v42  ;;  %3421 = vmatmul.mubr.bf16.gmra.mrb[16].mxu1 %v8970_v42  ;;  %v9064_v42 = vld [vmem:[#allocation13] ss:$16 sps:$4 sm:$0xff]  }
 0x253   : > { %3304 = vmatprep.mubr.bf16.mxu0 %v8977_v43  ;;  %3320 = vmatpush1.bf16.msra.mxu0 %v8971_v15  ;;  %v9069_v15 = vld [vmem:[#allocation13 + $0xc] ss:$16 sps:$4 sm:$0xff]  }
 0x254   : > { %3430 = vmatprep.mubr.bf16.mxu1 %v8977_v43  ;;  %3446 = vmatpush1.bf16.msra.mxu1 %v8974_v23  ;;  %v9058_v23 = vld [vmem:[#allocation2 + $0x2c] ss:$16 sps:$4 sm:$0xff]  }
 0x255   : > { %3321 = vmatprep.subr.bf16.mxu0 %v8981_v44  ;;  %3447 = vmatprep.subr.bf16.mxu1 %v8984_v45  ;;  %v9067_v43 = vld [vmem:[#allocation13 + $0x8] ss:$16 sps:$4 sm:$0xff]   ;;  %v9072_v44 = vld [vmem:[#allocation13 + $0x24] ss:$16 sps:$4 sm:$0xff]   ;;  %v9075_v45 = vld [vmem:[#allocation13 + $0x2c] ss:$16 sps:$4 sm:$0xff]  }
 0x257   : > { %3322 = vmatpush1.bf16.msra.mxu0 %v8979_v47  ;;  %v9070_v47 = vld [vmem:[#allocation13 + $0x20] ss:$16 sps:$4 sm:$0xff]  }
 0x258   : > { %3448 = vmatpush1.bf16.msra.mxu1 %v8982_v48  ;;  %3323 = vmatprep.subr.bf16.mxu0 %v8988_v49  ;;  %v9073_v48 = vld [vmem:[#allocation13 + $0x28] ss:$16 sps:$4 sm:$0xff]   ;;  %v9078_v49 = vld [vmem:[#allocation13 + $0x44] ss:$16 sps:$4 sm:$0xff]  }
 0x259   : > { %3449 = vmatprep.subr.bf16.mxu1 %v8991_v50  ;;  %v9081_v50 = vld [vmem:[#allocation13 + $0x4c] ss:$16 sps:$4 sm:$0xff]  }
 0x25a   : > { %3305 = vmatmul.mubr.bf16.gmra.mrb[20].mxu0 %v8985_v52  ;;  %3431 = vmatmul.mubr.bf16.gmra.mrb[20].mxu1 %v8985_v52  ;;  %v9076_v52 = vld [vmem:[#allocation13 + $0x40] ss:$16 sps:$4 sm:$0xff]  }
 0x25b   : > { %3324 = vmatpush1.bf16.msra.mxu0 %v8986_v51  ;;  %3347 = vmatprep.mubr.bf16.mxu0 %v10092_v4  ;;  %v9060_v51 = vld [vmem:[#allocation2 + $0x28] ss:$16 sps:$4 sm:$0xff]  }
 0x25c   : > { %3450 = vmatpush1.bf16.msra.mxu1 %v8989_v53  ;;  %3473 = vmatprep.mubr.bf16.mxu1 %v10092_v4  ;;  %v9015_v4 = vld [vmem:[#allocation8 + $0x30c] ss:$16 sps:$4 sm:$0xff]  }
 0x25d   : > { %3325 = vmatprep.subr.bf16.mxu0 %v8994_v54  ;;  %3451 = vmatprep.subr.bf16.mxu1 %v8997_v57  ;;  %v9061_v53 = vld [vmem:[#allocation2 + $0x4c] ss:$16 sps:$4 sm:$0xff]   ;;  %v9084_v57 = vld [vmem:[#allocation13 + $0x64] ss:$16 sps:$4 sm:$0xff]  }
 0x25e   : > { %v9079_v54 = vld [vmem:[#allocation13 + $0x48] ss:$16 sps:$4 sm:$0xff]  }
 0x25f   : > { %3326 = vmatpush1.bf16.msra.mxu0 %v8992_v58  ;;  %v9082_v58 = vld [vmem:[#allocation13 + $0x60] ss:$16 sps:$4 sm:$0xff]  }
 0x260   : > { %3452 = vmatpush1.bf16.msra.mxu1 %v8995_v59  ;;  %3327 = vmatprep.subr.bf16.mxu0 %v9000_v60  ;;  %v9085_v59 = vld [vmem:[#allocation13 + $0x68] ss:$16 sps:$4 sm:$0xff]   ;;  %v9090_v60 = vld [vmem:[#allocation13 + $0x84] ss:$16 sps:$4 sm:$0xff]  }
 0x261   : > { %3453 = vmatprep.subr.bf16.mxu1 %v9003_v62  ;;  %v9093_v62 = vld [vmem:[#allocation13 + $0x8c] ss:$16 sps:$4 sm:$0xff]  }
 0x263   : > { %3328 = vmatpush1.bf16.msra.mxu0 %v8998_v55  ;;  %v9063_v55 = vld [vmem:[#allocation2 + $0x48] ss:$16 sps:$4 sm:$0xff]  }
 0x264   : > { %3454 = vmatpush1.bf16.msra.mxu1 %v9001_v63  ;;  %3329 = vmatprep.subr.bf16.mxu0 %v9006_v0  ;;  %v9088_v63 = vld [vmem:[#allocation13 + $0x80] ss:$16 sps:$4 sm:$0xff]   ;;  %v9091_v0 = vld [vmem:[#allocation13 + $0x88] ss:$16 sps:$4 sm:$0xff]  }
 0x265   : > { %3455 = vmatprep.subr.bf16.mxu1 %v9009_v56  ;;  %v9096_v56 = vld [vmem:[#allocation13 + $0xa4] ss:$16 sps:$4 sm:$0xff]  }
 0x267   : > { %3330 = vmatpush1.bf16.msra.mxu0 %v9004_v61  ;;  %v9099_v61 = vld [vmem:[#allocation13 + $0xac] ss:$16 sps:$4 sm:$0xff]  }
 0x268   : > { %3456 = vmatpush1.bf16.msra.mxu1 %v9007_v1  ;;  %3331 = vmatprep.subr.bf16.mxu0 %v9012_v3  ;;  %v9094_v1 = vld [vmem:[#allocation13 + $0xa0] ss:$16 sps:$4 sm:$0xff]   ;;  %v9097_v3 = vld [vmem:[#allocation13 + $0xa8] ss:$16 sps:$4 sm:$0xff]  }
 0x269   : > { %3457 = vmatprep.subr.bf16.mxu1 %v9015_v4  ;;  %v9102_v4 = vld [vmem:[#allocation13 + $0xc4] ss:$16 sps:$4 sm:$0xff]  }
 0x26b   : > { %3332 = vmatpush1.bf16.msra.mxu0 %v9010_v6  ;;  %v9105_v6 = vld [vmem:[#allocation13 + $0xcc] ss:$16 sps:$4 sm:$0xff]  }
 0x26c   : > { %3458 = vmatpush1.bf16.msra.mxu1 %v9013_v2  ;;  %3333 = vmatprep.subr.bf16.mxu0 %v9018_v11  ;;  %v9100_v2 = vld [vmem:[#allocation13 + $0xc0] ss:$16 sps:$4 sm:$0xff]   ;;  %v9103_v11 = vld [vmem:[#allocation13 + $0xc8] ss:$16 sps:$4 sm:$0xff]  }
 0x26d   : > { %3459 = vmatprep.subr.bf16.mxu1 %v9021_v12  ;;  %v9108_v12 = vld [vmem:[#allocation13 + $0xe4] ss:$16 sps:$4 sm:$0xff]  }
 0x26f   : > { %3334 = vmatpush1.bf16.msra.mxu0 %v9016_v17  ;;  %v9111_v17 = vld [vmem:[#allocation13 + $0xec] ss:$16 sps:$4 sm:$0xff]  }
 0x270   : > { %3460 = vmatpush1.bf16.msra.mxu1 %v9019_v18  ;;  %3335 = vmatprep.subr.bf16.mxu0 %v9024_v19  ;;  %v9106_v18 = vld [vmem:[#allocation13 + $0xe0] ss:$16 sps:$4 sm:$0xff]   ;;  %v9109_v19 = vld [vmem:[#allocation13 + $0xe8] ss:$16 sps:$4 sm:$0xff]  }
 0x271   : > { %3461 = vmatprep.subr.bf16.mxu1 %v9027_v20  ;;  %v9114_v20 = vld [vmem:[#allocation13 + $0x104] ss:$16 sps:$4 sm:$0xff]  }
 0x273   : > { %3336 = vmatpush1.bf16.msra.mxu0 %v9022_v21  ;;  %v9117_v21 = vld [vmem:[#allocation13 + $0x10c] ss:$16 sps:$4 sm:$0xff]  }
 0x274   : > { %3462 = vmatpush1.bf16.msra.mxu1 %v9025_v24  ;;  %3337 = vmatprep.subr.bf16.mxu0 %v9030_v25  ;;  %v9112_v24 = vld [vmem:[#allocation13 + $0x100] ss:$16 sps:$4 sm:$0xff]   ;;  %v9115_v25 = vld [vmem:[#allocation13 + $0x108] ss:$16 sps:$4 sm:$0xff]  }
 0x275   : > { %3463 = vmatprep.subr.bf16.mxu1 %v9033_v27  ;;  %v9120_v27 = vld [vmem:[#allocation13 + $0x124] ss:$16 sps:$4 sm:$0xff]  }
 0x277   : > { %3338 = vmatpush1.bf16.msra.mxu0 %v9028_v8  ;;  %v9123_v8 = vld [vmem:[#allocation13 + $0x12c] ss:$16 sps:$4 sm:$0xff]  }
 0x278   : > { %3464 = vmatpush1.bf16.msra.mxu1 %v9031_v28  ;;  %3339 = vmatprep.subr.bf16.mxu0 %v9036_v7  ;;  %v9118_v28 = vld [vmem:[#allocation13 + $0x120] ss:$16 sps:$4 sm:$0xff]   ;;  %v9121_v7 = vld [vmem:[#allocation13 + $0x128] ss:$16 sps:$4 sm:$0xff]  }
 0x279   : > { %3465 = vmatprep.subr.bf16.mxu1 %v9039_v29  ;;  %v9126_v29 = vld [vmem:[#allocation13 + $0x144] ss:$16 sps:$4 sm:$0xff]  }
 0x27b   : > { %3340 = vmatpush1.bf16.msra.mxu0 %v9034_v30  ;;  %v9129_v30 = vld [vmem:[#allocation13 + $0x14c] ss:$16 sps:$4 sm:$0xff]  }
 0x27c   : > { %3466 = vmatpush1.bf16.msra.mxu1 %v9037_v31  ;;  %3341 = vmatprep.subr.bf16.mxu0 %v9042_v32  ;;  %v9124_v31 = vld [vmem:[#allocation13 + $0x140] ss:$16 sps:$4 sm:$0xff]   ;;  %v9127_v32 = vld [vmem:[#allocation13 + $0x148] ss:$16 sps:$4 sm:$0xff]  }
 0x27d   : > { %3467 = vmatprep.subr.bf16.mxu1 %v9045_v26  ;;  %v9132_v26 = vld [vmem:[#allocation13 + $0x164] ss:$16 sps:$4 sm:$0xff]  }
 0x27f   : > { %3342 = vmatpush1.bf16.msra.mxu0 %v9040_v16  ;;  %v9135_v16 = vld [vmem:[#allocation13 + $0x16c] ss:$16 sps:$4 sm:$0xff]  }
 0x280   : > { %3468 = vmatpush1.bf16.msra.mxu1 %v9043_v33  ;;  %3343 = vmatprep.subr.bf16.mxu0 %v9048_v22  ;;  %v9130_v33 = vld [vmem:[#allocation13 + $0x160] ss:$16 sps:$4 sm:$0xff]   ;;  %v9133_v22 = vld [vmem:[#allocation13 + $0x168] ss:$16 sps:$4 sm:$0xff]  }
 0x281   : > { %3469 = vmatprep.subr.bf16.mxu1 %v9051_v9  ;;  %v9138_v9 = vld [vmem:[#allocation13 + $0x184] ss:$16 sps:$4 sm:$0xff]  }
 0x283   : > { %3344 = vmatpush1.bf16.msra.mxu0 %v9046_v34  ;;  %v9141_v34 = vld [vmem:[#allocation13 + $0x18c] ss:$16 sps:$4 sm:$0xff]  }
 0x284   : > { %3470 = vmatpush1.bf16.msra.mxu1 %v9049_v35  ;;  %3345 = vmatprep.subr.bf16.mxu0 %v9054_v36  ;;  %v9136_v35 = vld [vmem:[#allocation13 + $0x180] ss:$16 sps:$4 sm:$0xff]   ;;  %v9139_v36 = vld [vmem:[#allocation13 + $0x188] ss:$16 sps:$4 sm:$0xff]  }
 0x285   : > { %3471 = vmatprep.subr.bf16.mxu1 %v9057_v37  ;;  %v9144_v37 = vld [vmem:[#allocation13 + $0x1a4] ss:$16 sps:$4 sm:$0xff]  }
 0x287   : > { %3346 = vmatpush1.bf16.msra.mxu0 %v9052_v38  ;;  %v9147_v38 = vld [vmem:[#allocation13 + $0x1ac] ss:$16 sps:$4 sm:$0xff]  }
 0x288   : > { %3472 = vmatpush1.bf16.msra.mxu1 %v9055_v40  ;;  %4762 = vmatprep.subr.bf16.mxu0 %v9066_v41  ;;  %v9142_v40 = vld [vmem:[#allocation13 + $0x1a0] ss:$16 sps:$4 sm:$0xff]   ;;  %v9145_v41 = vld [vmem:[#allocation13 + $0x1a8] ss:$16 sps:$4 sm:$0xff]  }
 0x289   : > { %4888 = vmatprep.subr.bf16.mxu1 %v9069_v15  ;;  %v9150_v15 = vld [vmem:[#allocation13 + $0x1c4] ss:$16 sps:$4 sm:$0xff]  }
 0x28a   : > { %3348 = vmatmul.mubr.bf16.vlgmr.msra.gmra.mrb[12].mxu0 %v10094_v5 }
 0x28b   : > { %3474 = vmatmul.mubr.bf16.vlgmr.msra.gmra.mrb[12].mxu1 %v10094_v5  ;;  %3357 = vmatprep.mubr.bf16.mxu0 %v9058_v23  ;;  %v9087_v5 = vld [vmem:[#allocation13 + $0x6c] ss:$16 sps:$4 sm:$0xff]  }
 0x28c   : > { %3483 = vmatprep.mubr.bf16.mxu1 %v9058_v23  ;;  %4763 = vmatpush1.bf16.msra.mxu0 %v9064_v42  ;;  %v9153_v42 = vld [vmem:[#allocation13 + $0x1cc] ss:$16 sps:$4 sm:$0xff]   ;;  %v9148_v23 = vld [vmem:[#allocation13 + $0x1c0] ss:$16 sps:$4 sm:$0xff]  }
 0x28d   : > { %4889 = vmatpush1.bf16.msra.mxu1 %v9067_v43  ;;  %4764 = vmatprep.subr.bf16.mxu0 %v9072_v44  ;;  %v9151_v43 = vld [vmem:[#allocation13 + $0x1c8] ss:$16 sps:$4 sm:$0xff]   ;;  %v9156_v44 = vld [vmem:[#allocation13 + $0x1e4] ss:$16 sps:$4 sm:$0xff]  }
 0x28e   : > { %4890 = vmatprep.subr.bf16.mxu1 %v9075_v45  ;;  %v9159_v45 = vld [vmem:[#allocation13 + $0x1ec] ss:$16 sps:$4 sm:$0xff]  }
 0x290   : > { %4765 = vmatpush1.bf16.msra.mxu0 %v9070_v47  ;;  %v9154_v47 = vld [vmem:[#allocation13 + $0x1e0] ss:$16 sps:$4 sm:$0xff]  }
 0x291   : > { %4891 = vmatpush1.bf16.msra.mxu1 %v9073_v48  ;;  %4766 = vmatprep.subr.bf16.mxu0 %v9078_v49  ;;  %v9157_v48 = vld [vmem:[#allocation13 + $0x1e8] ss:$16 sps:$4 sm:$0xff]   ;;  %v9162_v49 = vld [vmem:[#allocation13 + $0x204] ss:$16 sps:$4 sm:$0xff]  }
 0x292   : > { %3358 = vmatmul.mubr.bf16.gmra.mrb[16].mxu0 %v9060_v51  ;;  %4892 = vmatprep.subr.bf16.mxu1 %v9081_v50  ;;  %v9165_v50 = vld [vmem:[#allocation13 + $0x20c] ss:$16 sps:$4 sm:$0xff]  }
 0x293   : > { %3484 = vmatmul.mubr.bf16.gmra.mrb[16].mxu1 %v9060_v51  ;;  %3367 = vmatprep.mubr.bf16.mxu0 %v9061_v53  ;;  %v3504_v51 = vld [vmem:[%s10954_s5] sm:$0xf] }
 0x294   : > { %3493 = vmatprep.mubr.bf16.mxu1 %v9061_v53  ;;  %4767 = vmatpush1.bf16.msra.mxu0 %v9076_v52  ;;  %v10153_v52 = vrot.slane %v3504_v51, %v10049_v13  ;;  %v10156_v53 = vrot.slane %v3504_v51, %v10062_v39 }
 0x295   : > { %4893 = vmatpush1.bf16.msra.mxu1 %v9079_v54  ;;  %4768 = vmatprep.subr.bf16.mxu0 %v9084_v57  ;;  %v10159_v54 = vrot.slane %v3504_v51, %v10051_v14  ;;  %v10162_v57 = vrot.slane %v3504_v51, %v10065_v46 }
 0x296   : > { %4894 = vmatprep.subr.bf16.mxu1 %v9087_v5 }
 0x298   : > { %4769 = vmatpush1.bf16.msra.mxu0 %v9082_v58 }
 0x299   : > { %4895 = vmatpush1.bf16.msra.mxu1 %v9085_v59  ;;  %4770 = vmatprep.subr.bf16.mxu0 %v9090_v60 }
 0x29a   : > { %3368 = vmatmul.mubr.bf16.gmra.mrb[20].mxu0 %v9063_v55  ;;  %4896 = vmatprep.subr.bf16.mxu1 %v9093_v62 }
 0x29b   : > { %3494 = vmatmul.mubr.bf16.gmra.mrb[20].mxu1 %v9063_v55 }
 0x29c   : > { %4771 = vmatpush1.bf16.msra.mxu0 %v9088_v63 }
 0x29d   : > { %4897 = vmatpush1.bf16.msra.mxu1 %v9091_v0  ;;  %4772 = vmatprep.subr.bf16.mxu0 %v9096_v56  ;;  %v10167_v56 = vld [vmem:[#allocation3 + $0x60] sm:$0x11] }
 0x29e   : > { %4898 = vmatprep.subr.bf16.mxu1 %v9099_v61 }
 0x2a0   : > { %4773 = vmatpush1.bf16.msra.mxu0 %v9094_v1 }
 0x2a1   : > { %4899 = vmatpush1.bf16.msra.mxu1 %v9097_v3  ;;  %4774 = vmatprep.subr.bf16.mxu0 %v9102_v4 }
 0x2a2   : > { %4900 = vmatprep.subr.bf16.mxu1 %v9105_v6 }
 0x2a4   : > { %4775 = vmatpush1.bf16.msra.mxu0 %v9100_v2 }
 0x2a5   : > { %4901 = vmatpush1.bf16.msra.mxu1 %v9103_v11  ;;  %4776 = vmatprep.subr.bf16.mxu0 %v9108_v12 }
 0x2a6   : > { %4902 = vmatprep.subr.bf16.mxu1 %v9111_v17 }
 0x2a8   : > { %4777 = vmatpush1.bf16.msra.mxu0 %v9106_v18 }
 0x2a9   : > { %4903 = vmatpush1.bf16.msra.mxu1 %v9109_v19  ;;  %4778 = vmatprep.subr.bf16.mxu0 %v9114_v20 }
 0x2aa   : > { %4904 = vmatprep.subr.bf16.mxu1 %v9117_v21 }
 0x2ac   : > { %4779 = vmatpush1.bf16.msra.mxu0 %v9112_v24  ;;  %v7841_v24 = vcombine.high %v10167_v56, %v10167_v56 }
 0x2ad   : > { %4905 = vmatpush1.bf16.msra.mxu1 %v9115_v25  ;;  %4780 = vmatprep.subr.bf16.mxu0 %v9120_v27 }
 0x2ae   : > { %4906 = vmatprep.subr.bf16.mxu1 %v9123_v8 }
 0x2b0   : > { %4781 = vmatpush1.bf16.msra.mxu0 %v9118_v28 }
 0x2b1   : > { %4907 = vmatpush1.bf16.msra.mxu1 %v9121_v7  ;;  %4782 = vmatprep.subr.bf16.mxu0 %v9126_v29 }
 0x2b2   : > { %4908 = vmatprep.subr.bf16.mxu1 %v9129_v30 }
 0x2b4   : > { %4783 = vmatpush1.bf16.msra.mxu0 %v9124_v31 }
 0x2b5   : > { %4909 = vmatpush1.bf16.msra.mxu1 %v9127_v32  ;;  %4784 = vmatprep.subr.bf16.mxu0 %v9132_v26 }
 0x2b6   : > { %4910 = vmatprep.subr.bf16.mxu1 %v9135_v16 }
 0x2b8   : > { %4785 = vmatpush1.bf16.msra.mxu0 %v9130_v33  ;;  %v10180_v33 = vshll.u32 %v7841_v24, 16 }
 0x2b9   : > { %4911 = vmatpush1.bf16.msra.mxu1 %v9133_v22  ;;  %4786 = vmatprep.subr.bf16.mxu0 %v9138_v9 }
 0x2ba   : > { %4912 = vmatprep.subr.bf16.mxu1 %v9141_v34 }
 0x2bc   : > { %4787 = vmatpush1.bf16.msra.mxu0 %v9136_v35 }
 0x2bd   : > { %4913 = vmatpush1.bf16.msra.mxu1 %v9139_v36  ;;  %4788 = vmatprep.subr.bf16.mxu0 %v9144_v37 }
 0x2be   : > { %4914 = vmatprep.subr.bf16.mxu1 %v9147_v38 }
 0x2c0   : > { %4789 = vmatpush1.bf16.msra.mxu0 %v9142_v40 }
 0x2c1   : > { %4915 = vmatpush1.bf16.msra.mxu1 %v9145_v41  ;;  %4790 = vmatprep.subr.bf16.mxu0 %v9150_v15 }
 0x2c2   : > { %4916 = vmatprep.subr.bf16.mxu1 %v9153_v42 }
 0x2c4   : > { %4791 = vmatpush1.bf16.msra.mxu0 %v9148_v23 }
 0x2c5   : > { %4917 = vmatpush1.bf16.msra.mxu1 %v9151_v43  ;;  %4792 = vmatprep.subr.bf16.mxu0 %v9156_v44 }
 0x2c6   : > { %4918 = vmatprep.subr.bf16.mxu1 %v9159_v45 }
 0x2c8   : > { %4793 = vmatpush1.bf16.msra.mxu0 %v9154_v47 }
 0x2c9   : > { %4919 = vmatpush1.bf16.msra.mxu1 %v9157_v48  ;;  %4825 = vmatprep.subr.bf16.mxu0 %v9162_v49 }
 0x2ca   : > { %4951 = vmatprep.subr.bf16.mxu1 %v9165_v50 }
 0x35d   : > { %v3349_v5 = vpop.f32.mrb[12].mxu0 }
 0x35e   : > { %v3526_v58 = vadd.f32 %v10153_v52, %v3349_v5  ;;  %v3475_v59 = vpop.f32.mrb[12].mxu1  ;;  %v3351_v60 = vpop.f32.mrb[13].mxu0  ;;  %v7840_v5 = vcombine.low %v10167_v56, %v10167_v56  ;;  %v9187_v56 = vld [vmem:[#allocation13 + $0x284] ss:$16 sps:$4 sm:$0xff]  }
 0x35f   : > { %v3528_v62 = vadd.f32 %v10156_v53, %v3475_v59  ;;  %v3527_v55 = vadd.f32 %v10159_v54, %v3351_v60  ;;  %v3477_v63 = vpop.f32.mrb[13].mxu1  ;;  %v3353_v0 = vpop.f32.mrb[14].mxu0 }
 0x360   : > { %v3550_v61 = vmax.f32 %v3526_v58, 0.0  ;;  %v10170_v1 = vadd.f32 %v10162_v57, %v3477_v63  ;;  %v3530_v3 = vadd.f32 %v10153_v52, %v3353_v0  ;;  %v3479_v4 = vpop.f32.mrb[14].mxu1  ;;  %v3355_v6 = vpop.f32.mrb[15].mxu0 }
 0x361   : > { %v3552_v2 = vmax.f32 %v3528_v62, 0.0  ;;  %v3551_v11 = vmax.f32 %v3527_v55, 0.0  ;;  %v3532_v12 = vadd.f32 %v10156_v53, %v3479_v4  ;;  %v3531_v17 = vadd.f32 %v10159_v54, %v3355_v6  ;;  %v3481_v18 = vpop.f32.mrb[15].mxu1 }
 0x362   : > { %v3553_v19 = vmax.f32 %v10170_v1, 0.0  ;;  %v3554_v20 = vmax.f32 %v3530_v3, 0.0  ;;  %v3533_v21 = vadd.f32 %v10162_v57, %v3481_v18 }
 0x363   : > { %v8189_v25 = vpack.c.bf16 %v3551_v11, %v3550_v61  ;;  %v3556_v27 = vmax.f32 %v3532_v12, 0.0  ;;  %v3555_v8 = vmax.f32 %v3531_v17, 0.0 }
 0x364   : > { %v8190_v28 = vpack.c.bf16 %v3553_v19, %v3552_v2  ;;  %v3557_v7 = vmax.f32 %v3533_v21, 0.0  ;;  %v10186_v36 = vpack.c.bf16 %v3554_v20, %v3550_v61  ;;  %v4092_v61 = vrot.slane %v10180_v33, 1 }
 0x365   : > { %3646 = vst [vmem:[#allocation3] sm:$0xff] %v8189_v25  ;;  %v8191_v29 = vpack.c.bf16 %v3555_v8, %v3554_v20  ;;  %v3359_v30 = vpop.f32.mrb[16].mxu0  ;;  %v10188_v37 = vpack.c.bf16 %v3555_v8, %v3551_v11  ;;  %v10194_v23 = vpack.c.bf16 %v3556_v27, %v3552_v2 }
 0x366   : > { %3647 = vst [vmem:[#allocation3 + $0x8] sm:$0xff] %v8190_v28  ;;  %v8192_v31 = vpack.c.bf16 %v3557_v7, %v3556_v27  ;;  %v3534_v32 = vadd.f32 %v10153_v52, %v3359_v30  ;;  %v3485_v26 = vpop.f32.mrb[16].mxu1  ;;  %v3361_v16 = vpop.f32.mrb[17].mxu0  ;;  %v4001_v0 = vshll.u32 %v10186_v36, 16  ;;  %v3999_v6 = vshrl.u32 %v10186_v36, 16 }
 0x367   : > { %3648 = vst [vmem:[#allocation3 + $0x10] sm:$0xff] %v8191_v29  ;;  %v10183_v22 = vadd.f32 %v10156_v53, %v3485_v26  ;;  %v3535_v9 = vadd.f32 %v10159_v54, %v3361_v16  ;;  %v3487_v34 = vpop.f32.mrb[17].mxu1  ;;  %v3363_v35 = vpop.f32.mrb[18].mxu0  ;;  %v4013_v62 = vshll.u32 %v10188_v37, 16  ;;  %v4011_v4 = vshrl.u32 %v10188_v37, 16 }
 0x368   : > { %3649 = vst [vmem:[#allocation3 + $0x18] sm:$0xff] %v8192_v31  ;;  %v3558_v38 = vmax.f32 %v3534_v32, 0.0  ;;  %v10191_v40 = vadd.f32 %v10162_v57, %v3487_v34  ;;  %v3538_v41 = vadd.f32 %v10153_v52, %v3363_v35  ;;  %v3489_v15 = vpop.f32.mrb[18].mxu1  ;;  %v3365_v42 = vpop.f32.mrb[19].mxu0  ;;  %v10218_v2 = vpack.c.bf16 %v3557_v7, %v3553_v19 }
 0x369   : > { %v3560_v43 = vmax.f32 %v10183_v22, 0.0  ;;  %v3559_v44 = vmax.f32 %v3535_v9, 0.0  ;;  %v10198_v45 = vadd.f32 %v10156_v53, %v3489_v15  ;;  %v3539_v47 = vadd.f32 %v10159_v54, %v3365_v42  ;;  %v3491_v48 = vpop.f32.mrb[19].mxu1 }
 0x36a   : > { %v3561_v49 = vmax.f32 %v10191_v40, 0.0  ;;  %v3562_v50 = vmax.f32 %v3538_v41, 0.0  ;;  %v10203_v51 = vadd.f32 %v10162_v57, %v3491_v48  ;;  %v4015_v20 = vrot.slane %v4013_v62, 1  ;;  %v9166_v40 = vld [vmem:[#allocation13 + $0x220] ss:$16 sps:$4 sm:$0xff]  }
 0x36b   : > { %v8193_v58 = vpack.c.bf16 %v3559_v44, %v3558_v38  ;;  %v3564_v59 = vmax.f32 %v10198_v45, 0.0  ;;  %v3563_v60 = vmax.f32 %v3539_v47, 0.0  ;;  %v4003_v21 = vrot.slane %v4001_v0, 1  ;;  %v9163_v0 = vld [vmem:[#allocation13 + $0x208] ss:$16 sps:$4 sm:$0xff]  }
 0x36c   : > { %v8194_v55 = vpack.c.bf16 %v3561_v49, %v3560_v43  ;;  %v3565_v63 = vmax.f32 %v10203_v51, 0.0  ;;  %v9519_v28 = vpack.c.bf16 %v3562_v50, %v3558_v38  ;;  %v4025_v26 = vshll.u32 %v10194_v23, 16  ;;  %v9160_v51 = vld [vmem:[#allocation13 + $0x200] ss:$16 sps:$4 sm:$0xff]  }
 0x36d   : > { %3650 = vst [vmem:[#allocation3 + $0x20] sm:$0xff] %v8193_v58  ;;  %v8195_v1 = vpack.c.bf16 %v3563_v60, %v3562_v50  ;;  %v3369_v3 = vpop.f32.mrb[20].mxu0  ;;  %v9520_v29 = vpack.c.bf16 %v3563_v60, %v3559_v44  ;;  %v4016_v45 = vor.u32 %v4015_v20, %v4011_v4  ;;  %v4004_v58 = vor.u32 %v4003_v21, %v3999_v6 }
 0x36e   : > { %3651 = vst [vmem:[#allocation3 + $0x28] sm:$0xff] %v8194_v55  ;;  %v8196_v11 = vpack.c.bf16 %v3565_v63, %v3564_v59  ;;  %v3542_v12 = vadd.f32 %v10153_v52, %v3369_v3  ;;  %v3495_v17 = vpop.f32.mrb[20].mxu1  ;;  %v3371_v18 = vpop.f32.mrb[21].mxu0  ;;  %v4006_v50 = vshll.u32 %v9519_v28, 16  ;;  %v9168_v3 = vld [vmem:[#allocation13 + $0x224] ss:$16 sps:$4 sm:$0xff]   ;;  %v9522_v4 = vpack.c.bf16 %v3565_v63, %v3561_v49 }
 0x36f   : > { %3652 = vst [vmem:[#allocation3 + $0x30] sm:$0xff] %v8195_v1  ;;  %v10222_v24 = vadd.f32 %v10156_v53, %v3495_v17  ;;  %v3543_v25 = vadd.f32 %v10159_v54, %v3371_v18  ;;  %v3497_v27 = vpop.f32.mrb[21].mxu1  ;;  %v3373_v8 = vpop.f32.mrb[22].mxu0  ;;  %v4018_v15 = vshll.u32 %v9520_v29, 16  ;;  %v4054_v60 = vshrl.u32 %v9520_v29, 16 }
 0x370   : > { %3653 = vst [vmem:[#allocation3 + $0x38] sm:$0xff] %v8196_v11  ;;  %v3566_v19 = vmax.f32 %v3542_v12, 0.0  ;;  %v10226_v7 = vadd.f32 %v10162_v57, %v3497_v27  ;;  %v3546_v30 = vadd.f32 %v10153_v52, %v3373_v8  ;;  %v3499_v31 = vpop.f32.mrb[22].mxu1  ;;  %v3375_v32 = vpop.f32.mrb[23].mxu0  ;;  %v4008_v1 = vrot.slane %v4006_v50, 1 }
 0x371   : > { %v3568_v16 = vmax.f32 %v10222_v24, 0.0  ;;  %v3567_v9 = vmax.f32 %v3543_v25, 0.0  ;;  %v10232_v34 = vadd.f32 %v10156_v53, %v3499_v31  ;;  %v3547_v35 = vadd.f32 %v10159_v54, %v3375_v32  ;;  %v3501_v36 = vpop.f32.mrb[23].mxu1  ;;  %v9171_v11 = vld [vmem:[#allocation13 + $0x22c] ss:$16 sps:$4 sm:$0xff]  }
 0x372   : > { %v3569_v37 = vmax.f32 %v10226_v7, 0.0  ;;  %v3570_v38 = vmax.f32 %v3546_v30, 0.0  ;;  %v3549_v41 = vadd.f32 %v10162_v57, %v3501_v36  ;;  %v4020_v53 = vrot.slane %v4018_v15, 1  ;;  %v9169_v27 = vld [vmem:[#allocation13 + $0x228] ss:$16 sps:$4 sm:$0xff]  }
 0x373   : > { %v8197_v52 = vpack.c.bf16 %v3567_v9, %v3566_v19  ;;  %v3572_v42 = vmax.f32 %v10232_v34, 0.0  ;;  %v3571_v44 = vmax.f32 %v3547_v35, 0.0  ;;  %v10242_v57 = vpack.c.bf16 %v3564_v59, %v3560_v43  ;;  %v9174_v7 = vld [vmem:[#allocation13 + $0x244] ss:$16 sps:$4 sm:$0xff]  }
 0x374   : > { %v8198_v47 = vpack.c.bf16 %v3569_v37, %v3568_v16  ;;  %v3573_v48 = vmax.f32 %v3549_v41, 0.0  ;;  %v4021_v55 = vsel %vm1535_vm0, %v4016_v45, %v4020_v53  ;;  %v10247_v12 = vpack.c.bf16 %v3570_v38, %v3566_v19  ;;  %v9181_v24 = vld [vmem:[#allocation13 + $0x264] ss:$16 sps:$4 sm:$0xff]  }
 0x375   : > { %3654 = vst [vmem:[#allocation3 + $0x40] sm:$0xff] %v8197_v52  ;;  %v8199_v54 = vpack.c.bf16 %v3571_v44, %v3570_v38  ;;  %4794 = vmatprep.mubr.bf16.mxu0 %v4021_v55  ;;  %4920 = vmatprep.mubr.bf16.mxu1 %v4021_v55  ;;  %v9523_v6 = vpack.c.bf16 %v3571_v44, %v3567_v9  ;;  %v4046_v22 = vshrl.u32 %v9519_v28, 16  ;;  %v4023_v43 = vshrl.u32 %v10194_v23, 16  ;;  %v9177_v9 = vld [vmem:[#allocation13 + $0x24c] ss:$16 sps:$4 sm:$0xff]  }
 0x376   : > { %3655 = vst [vmem:[#allocation3 + $0x48] sm:$0xff] %v8198_v47  ;;  %v8200_v62 = vpack.c.bf16 %v3573_v48, %v3572_v42  ;;  %v4009_v59 = vsel %vm1535_vm0, %v4004_v58, %v4008_v1  ;;  %v4056_v17 = vor.u32 %v4054_v60, %v4020_v53  ;;  %v4037_v18 = vshll.u32 %v10218_v2, 16  ;;  %v9172_v38 = vld [vmem:[#allocation13 + $0x240] ss:$16 sps:$4 sm:$0xff]   ;;  %v9175_v52 = vld [vmem:[#allocation13 + $0x248] ss:$16 sps:$4 sm:$0xff]  }
 0x377   : > { %3656 = vst [vmem:[#allocation3 + $0x50] sm:$0xff] %v8199_v54  ;;  %v4042_v20 = vshll.u32 %v9522_v4, 16  ;;  %4795 = vmatmul.mubr.bf16.vlgmr.msra.gmra.mrb[24].mxu0 %v4009_v59  ;;  %4921 = vmatmul.mubr.bf16.vlgmr.msra.gmra.mrb[24].mxu1 %v4009_v59  ;;  %v4058_v49 = vshll.u32 %v9523_v6, 16  ;;  %v4048_v63 = vor.u32 %v4046_v22, %v4008_v1  ;;  %v4050_v21 = vshll.u32 %v10247_v12, 16  ;;  %v9184_v53 = vld [vmem:[#allocation13 + $0x26c] ss:$16 sps:$4 sm:$0xff]  }
 0x378   : > { %3657 = vst [vmem:[#allocation3 + $0x58] sm:$0xff] %v8200_v62  ;;  %v4035_v25 = vshrl.u32 %v10218_v2, 16  ;;  %4826 = vmatpush1.bf16.msra.mxu0 %v9160_v51  ;;  %4952 = vmatpush1.bf16.msra.mxu1 %v9163_v0  ;;  %v4039_v23 = vrot.slane %v4037_v18, 1  ;;  %v4027_v28 = vrot.slane %v4025_v26, 1  ;;  %v4030_v29 = vshll.u32 %v10242_v57, 16 }
 0x379   : > { %v4044_v8 = vrot.slane %v4042_v20, 1  ;;  %4827 = vmatprep.subr.bf16.mxu0 %v9168_v3  ;;  %4953 = vmatprep.subr.bf16.mxu1 %v9171_v11  ;;  %v4060_v19 = vrot.slane %v4058_v49, 1  ;;  %v4052_v30 = vrot.slane %v4050_v21, 1  ;;  %v4086_v31 = vshrl.u32 %v9523_v6, 16  ;;  %v9182_v62 = vld [vmem:[#allocation13 + $0x268] ss:$16 sps:$4 sm:$0xff]  }
 0x37a   : > { %v10255_v32 = vpack.c.bf16 %v3573_v48, %v3569_v37  ;;  %v4040_v34 = vor.u32 %v4039_v23, %v4035_v25  ;;  %v4028_v35 = vor.u32 %v4027_v28, %v4023_v43  ;;  %v4032_v2 = vrot.slane %v4030_v29, 1  ;;  %v9185_v3 = vld [vmem:[#allocation13 + $0x280] ss:$16 sps:$4 sm:$0xff]   ;;  %v9194_v6 = vld [vmem:[#allocation13 + $0x2a4] ss:$16 sps:$4 sm:$0xff]  }
 0x37b   : > { %v10259_v36 = vpack.c.bf16 %v3572_v42, %v3568_v16  ;;  %v4061_v26 = vsel %vm1535_vm0, %v4056_v17, %v4060_v19  ;;  %v4053_v41 = vsel %vm1535_vm0, %v4048_v63, %v4052_v30  ;;  %v4088_v15 = vor.u32 %v4086_v31, %v4060_v19  ;;  %v9192_v22 = vld [vmem:[#allocation13 + $0x2a0] ss:$16 sps:$4 sm:$0xff]   ;;  %v9195_v43 = vld [vmem:[#allocation13 + $0x2a8] ss:$16 sps:$4 sm:$0xff]   ;;  %v9200_v59 = vld [vmem:[#allocation13 + $0x2c4] ss:$16 sps:$4 sm:$0xff]  }
 0x37c   : > { %4828 = vmatpush1.bf16.msra.mxu0 %v9166_v40  ;;  %4954 = vmatpush1.bf16.msra.mxu1 %v9169_v27  ;;  %v4045_v37 = vsel %vm1535_vm0, %v4040_v34, %v4044_v8  ;;  %v10265_v44 = vsel %vm1535_vm0, %v4028_v35, %v4032_v2  ;;  %v4070_v45 = vshrl.u32 %v9522_v4, 16  ;;  %v4074_v47 = vshll.u32 %v10255_v32, 16  ;;  %v9188_v4 = vld [vmem:[#allocation13 + $0x288] ss:$16 sps:$4 sm:$0xff]   ;;  %v9203_v17 = vld [vmem:[#allocation13 + $0x2cc] ss:$16 sps:$4 sm:$0xff]  }
 0x37d   : > { %4804 = vmatprep.mubr.bf16.mxu0 %v4061_v26  ;;  %4829 = vmatprep.subr.bf16.mxu0 %v9174_v7  ;;  %v4062_v16 = vshrl.u32 %v10242_v57, 16  ;;  %v4066_v42 = vshll.u32 %v10259_v36, 16  ;;  %v4093_v48 = vsel %vm1535_vm0, %v4088_v15, %v4092_v61  ;;  %v4082_v50 = vshll.u32 %v7840_v5, 16  ;;  %v9179_v57 = vld [vmem:[#allocation13 + $0x260] ss:$16 sps:$4 sm:$0xff]  }
 0x37e   : > { %4930 = vmatprep.mubr.bf16.mxu1 %v4061_v26  ;;  %4955 = vmatprep.subr.bf16.mxu1 %v9177_v9  ;;  %v4072_v54 = vor.u32 %v4070_v45, %v4044_v8  ;;  %v10276_v51 = vrot.slane %v4074_v47, 1  ;;  %v4078_v33 = vshrl.u32 %v10247_v12, 16  ;;  %v9190_v5 = vld [vmem:[#allocation13 + $0x28c] ss:$16 sps:$4 sm:$0xff]   ;;  %v9198_v18 = vld [vmem:[#allocation13 + $0x2c0] ss:$16 sps:$4 sm:$0xff]  }
 0x37f   : > { %4805 = vmatmul.mubr.bf16.gmra.mrb[28].mxu0 %v4053_v41  ;;  %4931 = vmatmul.mubr.bf16.gmra.mrb[28].mxu1 %v4053_v41  ;;  %v4064_v58 = vor.u32 %v4062_v16, %v4032_v2  ;;  %v10278_v60 = vrot.slane %v4066_v42, 1  ;;  %v4084_v1 = vrot.slane %v4082_v50, 1  ;;  %v9197_v12 = vld [vmem:[#allocation13 + $0x2ac] ss:$16 sps:$4 sm:$0xff]   ;;  %v9201_v20 = vld [vmem:[#allocation13 + $0x2c8] ss:$16 sps:$4 sm:$0xff]  }
 0x380   : > { %4830 = vmatpush1.bf16.msra.mxu0 %v9172_v38  ;;  %4956 = vmatpush1.bf16.msra.mxu1 %v9175_v52  ;;  %v10283_v61 = vsel %vm1535_vm0, %v4072_v54, %v10276_v51  ;;  %v4080_v0 = vor.u32 %v4078_v33, %v4052_v30  ;;  %v9206_v40 = vld [vmem:[#allocation13 + $0x2e4] ss:$16 sps:$4 sm:$0xff]   ;;  %v9209_v49 = vld [vmem:[#allocation13 + $0x2ec] ss:$16 sps:$4 sm:$0xff]   ;;  %v9204_v63 = vld [vmem:[#allocation13 + $0x2e0] ss:$16 sps:$4 sm:$0xff]  }
 0x381   : > { %4814 = vmatprep.mubr.bf16.mxu0 %v4093_v48  ;;  %4940 = vmatprep.mubr.bf16.mxu1 %v4093_v48  ;;  %v10287_v55 = vsel %vm1535_vm0, %v4064_v58, %v10278_v60  ;;  %v9207_v21 = vld [vmem:[#allocation13 + $0x2e8] ss:$16 sps:$4 sm:$0xff]   ;;  %v9212_v25 = vld [vmem:[#allocation13 + $0x304] ss:$16 sps:$4 sm:$0xff]   ;;  %v9215_v27 = vld [vmem:[#allocation13 + $0x30c] ss:$16 sps:$4 sm:$0xff]  }
 0x382   : > { %4831 = vmatprep.subr.bf16.mxu0 %v9181_v24  ;;  %4957 = vmatprep.subr.bf16.mxu1 %v9184_v53  ;;  %v4085_v11 = vsel %vm1535_vm0, %v4080_v0, %v4084_v1  ;;  %v9210_v23 = vld [vmem:[#allocation13 + $0x300] ss:$16 sps:$4 sm:$0xff]   ;;  %v9213_v8 = vld [vmem:[#allocation13 + $0x308] ss:$16 sps:$4 sm:$0xff]   ;;  %v9218_v28 = vld [vmem:[#allocation13 + $0x324] ss:$16 sps:$4 sm:$0xff]  }
 0x383   : > { %v9221_v29 = vld [vmem:[#allocation13 + $0x32c] ss:$16 sps:$4 sm:$0xff]   ;;  %v9216_v19 = vld [vmem:[#allocation13 + $0x320] ss:$16 sps:$4 sm:$0xff]   ;;  %v9219_v7 = vld [vmem:[#allocation13 + $0x328] ss:$16 sps:$4 sm:$0xff]  }
 0x384   : > { %4832 = vmatpush1.bf16.msra.mxu0 %v9179_v57  ;;  %4958 = vmatpush1.bf16.msra.mxu1 %v9182_v62  ;;  %v9224_v30 = vld [vmem:[#allocation13 + $0x344] ss:$16 sps:$4 sm:$0xff]   ;;  %v9227_v31 = vld [vmem:[#allocation13 + $0x34c] ss:$16 sps:$4 sm:$0xff]   ;;  %v9222_v9 = vld [vmem:[#allocation13 + $0x340] ss:$16 sps:$4 sm:$0xff]  }
 0x385   : > { %4833 = vmatprep.subr.bf16.mxu0 %v9187_v56  ;;  %4959 = vmatprep.subr.bf16.mxu1 %v9190_v5  ;;  %v9225_v34 = vld [vmem:[#allocation13 + $0x348] ss:$16 sps:$4 sm:$0xff]   ;;  %v9230_v35 = vld [vmem:[#allocation13 + $0x364] ss:$16 sps:$4 sm:$0xff]   ;;  %v9233_v2 = vld [vmem:[#allocation13 + $0x36c] ss:$16 sps:$4 sm:$0xff]  }
 0x386   : > { %v9228_v26 = vld [vmem:[#allocation13 + $0x360] ss:$16 sps:$4 sm:$0xff]   ;;  %v9231_v38 = vld [vmem:[#allocation13 + $0x368] ss:$16 sps:$4 sm:$0xff]   ;;  %v9236_v41 = vld [vmem:[#allocation13 + $0x384] ss:$16 sps:$4 sm:$0xff]  }
 0x387   : > { %4815 = vmatmul.mubr.bf16.gmra.mrb[32].mxu0 %v4085_v11  ;;  %4941 = vmatmul.mubr.bf16.gmra.mrb[32].mxu1 %v4085_v11  ;;  %v9239_v15 = vld [vmem:[#allocation13 + $0x38c] ss:$16 sps:$4 sm:$0xff]   ;;  %v9234_v52 = vld [vmem:[#allocation13 + $0x380] ss:$16 sps:$4 sm:$0xff]   ;;  %v9242_v45 = vld [vmem:[#allocation13 + $0x3a4] ss:$16 sps:$4 sm:$0xff]  }
 0x388   : > { %4834 = vmatpush1.bf16.msra.mxu0 %v9185_v3  ;;  %4960 = vmatpush1.bf16.msra.mxu1 %v9188_v4  ;;  %v9245_v47 = vld [vmem:[#allocation13 + $0x3ac] ss:$16 sps:$4 sm:$0xff]   ;;  %v9240_v24 = vld [vmem:[#allocation13 + $0x3a0] ss:$16 sps:$4 sm:$0xff]   ;;  %v9243_v16 = vld [vmem:[#allocation13 + $0x3a8] ss:$16 sps:$4 sm:$0xff]  }
 0x389   : > { %4857 = vmatprep.mubr.bf16.mxu0 %v4045_v37  ;;  %4983 = vmatprep.mubr.bf16.mxu1 %v4045_v37  ;;  %v9237_v37 = vld [vmem:[#allocation13 + $0x388] ss:$16 sps:$4 sm:$0xff]   ;;  %v9248_v42 = vld [vmem:[#allocation13 + $0x3c4] ss:$16 sps:$4 sm:$0xff]   ;;  %v9251_v48 = vld [vmem:[#allocation13 + $0x3cc] ss:$16 sps:$4 sm:$0xff]  }
 0x38a   : > { %4835 = vmatprep.subr.bf16.mxu0 %v9194_v6  ;;  %4961 = vmatprep.subr.bf16.mxu1 %v9197_v12  ;;  %v9246_v53 = vld [vmem:[#allocation13 + $0x3c0] ss:$16 sps:$4 sm:$0xff]   ;;  %v9249_v50 = vld [vmem:[#allocation13 + $0x3c8] ss:$16 sps:$4 sm:$0xff]   ;;  %v9254_v54 = vld [vmem:[#allocation13 + $0x3e4] ss:$16 sps:$4 sm:$0xff]  }
 0x38b   : > { %v9257_v58 = vld [vmem:[#allocation13 + $0x3ec] ss:$16 sps:$4 sm:$0xff]   ;;  %v9252_v57 = vld [vmem:[#allocation13 + $0x3e0] ss:$16 sps:$4 sm:$0xff]   ;;  %v9255_v62 = vld [vmem:[#allocation13 + $0x3e8] ss:$16 sps:$4 sm:$0xff]  }
 0x38c   : > { %4836 = vmatpush1.bf16.msra.mxu0 %v9192_v22  ;;  %4962 = vmatpush1.bf16.msra.mxu1 %v9195_v43  ;;  %v3811_v33 = vld [vmem:[#allocation3 + $0x68] sm:$0x11]  ;;  %v9263_v5 = vld [vmem:[#allocation11 + $0xc] ss:$16 sps:$4 sm:$0xff]   ;;  %v9258_v1 = vld [vmem:[#allocation11] ss:$16 sps:$4 sm:$0xff]  }
 0x38d   : > { %4837 = vmatprep.subr.bf16.mxu0 %v9200_v59  ;;  %4963 = vmatprep.subr.bf16.mxu1 %v9203_v17  ;;  %v9260_v56 = vld [vmem:[#allocation11 + $0x4] ss:$16 sps:$4 sm:$0xff]   ;;  %v7843_v0 = vcombine.high %v3811_v33, %v3811_v33  ;;  %v9261_v3 = vld [vmem:[#allocation11 + $0x8] ss:$16 sps:$4 sm:$0xff]   ;;  %v9269_v11 = vld [vmem:[#allocation11 + $0x2c] ss:$16 sps:$4 sm:$0xff]  }
 0x38e   : > { %v9266_v4 = vld [vmem:[#allocation11 + $0x24] ss:$16 sps:$4 sm:$0xff]   ;;  %v9264_v12 = vld [vmem:[#allocation11 + $0x20] ss:$16 sps:$4 sm:$0xff]   ;;  %v9267_v22 = vld [vmem:[#allocation11 + $0x28] ss:$16 sps:$4 sm:$0xff]  }
 0x38f   : > { %v4106_v6 = vshll.u32 %v7843_v0, 16  ;;  %v4102_v43 = vshrl.u32 %v10255_v32, 16  ;;  %v9272_v59 = vld [vmem:[#allocation11 + $0x44] ss:$16 sps:$4 sm:$0xff]   ;;  %v9275_v17 = vld [vmem:[#allocation11 + $0x4c] ss:$16 sps:$4 sm:$0xff]  }
 0x390   : > { %4838 = vmatpush1.bf16.msra.mxu0 %v9198_v18  ;;  %4964 = vmatpush1.bf16.msra.mxu1 %v9201_v20  ;;  %v7842_v18 = vcombine.low %v3811_v33, %v3811_v33  ;;  %v9334_v33 = vld [vmem:[#allocation11 + $0x16c] ss:$16 sps:$4 sm:$0xff]   ;;  %v9337_v0 = vld [vmem:[#allocation11 + $0x184] ss:$16 sps:$4 sm:$0xff]  }
 0x391   : > { %4839 = vmatprep.subr.bf16.mxu0 %v9206_v40  ;;  %4965 = vmatprep.subr.bf16.mxu1 %v9209_v49  ;;  %v4104_v20 = vor.u32 %v4102_v43, %v10276_v51  ;;  %v4108_v40 = vrot.slane %v4106_v6, 1  ;;  %v9273_v49 = vld [vmem:[#allocation11 + $0x48] ss:$16 sps:$4 sm:$0xff]   ;;  %v4094_v51 = vshrl.u32 %v10259_v36, 16  ;;  %v9292_v36 = vld [vmem:[#allocation3 + $0x4] ss:$16 sps:$4 sm:$0xff]  }
 0x392   : > { %v9346_v6 = vld [vmem:[#allocation11 + $0x1ac] ss:$16 sps:$4 sm:$0xff]   ;;  %v9349_v43 = vld [vmem:[#allocation11 + $0x1c4] ss:$16 sps:$4 sm:$0xff]  }
 0x393   : > { %v4109_v32 = vsel %vm1535_vm0, %v4104_v20, %v4108_v40  ;;  %v9355_v20 = vld [vmem:[#allocation11 + $0x1e4] ss:$16 sps:$4 sm:$0xff]   ;;  %v9358_v40 = vld [vmem:[#allocation11 + $0x1ec] ss:$16 sps:$4 sm:$0xff]  }
 0x394   : > { %4840 = vmatpush1.bf16.msra.mxu0 %v9204_v63  ;;  %4966 = vmatpush1.bf16.msra.mxu1 %v9207_v21  ;;  %v9282_v63 = vld [vmem:[#allocation11 + $0x6c] ss:$16 sps:$4 sm:$0xff]   ;;  %v4098_v21 = vshll.u32 %v7842_v18, 16  ;;  %v9350_v18 = vld [vmem:[#allocation11 + $0x1c8] ss:$16 sps:$4 sm:$0xff]  }
 0x395   : > { %4841 = vmatprep.subr.bf16.mxu0 %v9212_v25  ;;  %4967 = vmatprep.subr.bf16.mxu1 %v9215_v27  ;;  %v9277_v25 = vld [vmem:[#allocation11 + $0x60] ss:$16 sps:$4 sm:$0xff]   ;;  %v9280_v27 = vld [vmem:[#allocation11 + $0x68] ss:$16 sps:$4 sm:$0xff]  }
 0x398   : > { %4842 = vmatpush1.bf16.msra.mxu0 %v9210_v23  ;;  %4968 = vmatpush1.bf16.msra.mxu1 %v9213_v8  ;;  %v4096_v23 = vor.u32 %v4094_v51, %v10278_v60  ;;  %v4100_v8 = vrot.slane %v4098_v21, 1  ;;  %v9293_v60 = vld [vmem:[#allocation11 + $0xa0] ss:$16 sps:$4 sm:$0xff]   ;;  %v9362_v51 = vld [vmem:[#allocation11 + $0x208] ss:$16 sps:$4 sm:$0xff]  }
 0x399   : > { %4843 = vmatprep.subr.bf16.mxu0 %v9218_v28  ;;  %4969 = vmatprep.subr.bf16.mxu1 %v9221_v29  ;;  %v9286_v28 = vld [vmem:[#allocation11 + $0x84] ss:$16 sps:$4 sm:$0xff]   ;;  %v9289_v29 = vld [vmem:[#allocation11 + $0x8c] ss:$16 sps:$4 sm:$0xff]   ;;  %v9359_v21 = vld [vmem:[#allocation11 + $0x200] ss:$16 sps:$4 sm:$0xff]  }
 0x39c   : > { %4844 = vmatpush1.bf16.msra.mxu0 %v9216_v19  ;;  %4970 = vmatpush1.bf16.msra.mxu1 %v9219_v7  ;;  %v9287_v19 = vld [vmem:[#allocation11 + $0x88] ss:$16 sps:$4 sm:$0xff]   ;;  %v4101_v7 = vsel %vm1535_vm0, %v4096_v23, %v4100_v8  ;;  %v9372_v23 = vld [vmem:[#allocation11 + $0x22c] ss:$16 sps:$4 sm:$0xff]   ;;  %v9367_v8 = vld [vmem:[#allocation11 + $0x220] ss:$16 sps:$4 sm:$0xff]  }
 0x39d   : > { %4845 = vmatprep.subr.bf16.mxu0 %v9224_v30  ;;  %4971 = vmatprep.subr.bf16.mxu1 %v9227_v31  ;;  %v9295_v30 = vld [vmem:[#allocation11 + $0xa4] ss:$16 sps:$4 sm:$0xff]   ;;  %v9298_v31 = vld [vmem:[#allocation11 + $0xac] ss:$16 sps:$4 sm:$0xff]  }
 0x3a0   : > { %4846 = vmatpush1.bf16.msra.mxu0 %v9222_v9  ;;  %4972 = vmatpush1.bf16.msra.mxu1 %v9225_v34  ;;  %v9296_v9 = vld [vmem:[#allocation11 + $0xa8] ss:$16 sps:$4 sm:$0xff]   ;;  %v9301_v34 = vld [vmem:[#allocation11 + $0xc4] ss:$16 sps:$4 sm:$0xff]  }
 0x3a1   : > { %4847 = vmatprep.subr.bf16.mxu0 %v9230_v35  ;;  %4973 = vmatprep.subr.bf16.mxu1 %v9233_v2  ;;  %v9304_v35 = vld [vmem:[#allocation11 + $0xcc] ss:$16 sps:$4 sm:$0xff]   ;;  %v9299_v2 = vld [vmem:[#allocation11 + $0xc0] ss:$16 sps:$4 sm:$0xff]  }
 0x3a4   : > { %4848 = vmatpush1.bf16.msra.mxu0 %v9228_v26  ;;  %4974 = vmatpush1.bf16.msra.mxu1 %v9231_v38  ;;  %v9302_v26 = vld [vmem:[#allocation11 + $0xc8] ss:$16 sps:$4 sm:$0xff]   ;;  %v9307_v38 = vld [vmem:[#allocation11 + $0xe4] ss:$16 sps:$4 sm:$0xff]  }
 0x3a5   : > { %4849 = vmatprep.subr.bf16.mxu0 %v9236_v41  ;;  %4975 = vmatprep.subr.bf16.mxu1 %v9239_v15  ;;  %v9310_v41 = vld [vmem:[#allocation11 + $0xec] ss:$16 sps:$4 sm:$0xff]   ;;  %v9305_v15 = vld [vmem:[#allocation11 + $0xe0] ss:$16 sps:$4 sm:$0xff]  }
 0x3a8   : > { %4850 = vmatpush1.bf16.msra.mxu0 %v9234_v52  ;;  %4976 = vmatpush1.bf16.msra.mxu1 %v9237_v37  ;;  %v9308_v52 = vld [vmem:[#allocation11 + $0xe8] ss:$16 sps:$4 sm:$0xff]   ;;  %v9313_v37 = vld [vmem:[#allocation11 + $0x104] ss:$16 sps:$4 sm:$0xff]  }
 0x3a9   : > { %4851 = vmatprep.subr.bf16.mxu0 %v9242_v45  ;;  %4977 = vmatprep.subr.bf16.mxu1 %v9245_v47  ;;  %v9316_v45 = vld [vmem:[#allocation11 + $0x10c] ss:$16 sps:$4 sm:$0xff]   ;;  %v9311_v47 = vld [vmem:[#allocation11 + $0x100] ss:$16 sps:$4 sm:$0xff]  }
 0x3ac   : > { %4852 = vmatpush1.bf16.msra.mxu0 %v9240_v24  ;;  %4978 = vmatpush1.bf16.msra.mxu1 %v9243_v16  ;;  %v9314_v24 = vld [vmem:[#allocation11 + $0x108] ss:$16 sps:$4 sm:$0xff]   ;;  %v9319_v16 = vld [vmem:[#allocation11 + $0x124] ss:$16 sps:$4 sm:$0xff]  }
 0x3ad   : > { %4853 = vmatprep.subr.bf16.mxu0 %v9248_v42  ;;  %4979 = vmatprep.subr.bf16.mxu1 %v9251_v48  ;;  %v9322_v42 = vld [vmem:[#allocation11 + $0x12c] ss:$16 sps:$4 sm:$0xff]   ;;  %v9317_v48 = vld [vmem:[#allocation11 + $0x120] ss:$16 sps:$4 sm:$0xff]  }
 0x3b0   : > { %4854 = vmatpush1.bf16.msra.mxu0 %v9246_v53  ;;  %4980 = vmatpush1.bf16.msra.mxu1 %v9249_v50  ;;  %v9320_v53 = vld [vmem:[#allocation11 + $0x128] ss:$16 sps:$4 sm:$0xff]   ;;  %v9325_v50 = vld [vmem:[#allocation11 + $0x144] ss:$16 sps:$4 sm:$0xff]  }
 0x3b1   : > { %4855 = vmatprep.subr.bf16.mxu0 %v9254_v54  ;;  %4981 = vmatprep.subr.bf16.mxu1 %v9257_v58  ;;  %v9328_v54 = vld [vmem:[#allocation11 + $0x14c] ss:$16 sps:$4 sm:$0xff]   ;;  %v9323_v58 = vld [vmem:[#allocation11 + $0x140] ss:$16 sps:$4 sm:$0xff]  }
 0x3b4   : > { %4856 = vmatpush1.bf16.msra.mxu0 %v9252_v57  ;;  %4982 = vmatpush1.bf16.msra.mxu1 %v9255_v62  ;;  %v9326_v57 = vld [vmem:[#allocation11 + $0x148] ss:$16 sps:$4 sm:$0xff]   ;;  %v9331_v62 = vld [vmem:[#allocation11 + $0x164] ss:$16 sps:$4 sm:$0xff]  }
 0x3b5   : > { %5714 = vmatprep.subr.bf16.mxu0 %v9260_v56  ;;  %5840 = vmatprep.subr.bf16.mxu1 %v9263_v5  ;;  %v9329_v56 = vld [vmem:[#allocation11 + $0x160] ss:$16 sps:$4 sm:$0xff]   ;;  %v9332_v5 = vld [vmem:[#allocation11 + $0x168] ss:$16 sps:$4 sm:$0xff]  }
 0x3b7   : > { %4858 = vmatmul.mubr.bf16.vlgmr.msra.gmra.mrb[24].mxu0 %v10265_v44  ;;  %4984 = vmatmul.mubr.bf16.vlgmr.msra.gmra.mrb[24].mxu1 %v10265_v44  ;;  %v9270_v44 = vld [vmem:[#allocation11 + $0x40] ss:$16 sps:$4 sm:$0xff]  }
 0x3b8   : > { %4867 = vmatprep.mubr.bf16.mxu0 %v10283_v61  ;;  %4993 = vmatprep.mubr.bf16.mxu1 %v10283_v61  ;;  %v9279_v61 = vld [vmem:[#allocation11 + $0x64] ss:$16 sps:$4 sm:$0xff]  }
 0x3b9   : > { %5715 = vmatpush1.bf16.msra.mxu0 %v9258_v1  ;;  %5841 = vmatpush1.bf16.msra.mxu1 %v9261_v3  ;;  %v9340_v1 = vld [vmem:[#allocation11 + $0x18c] ss:$16 sps:$4 sm:$0xff]   ;;  %v9335_v3 = vld [vmem:[#allocation11 + $0x180] ss:$16 sps:$4 sm:$0xff]  }
 0x3ba   : > { %5716 = vmatprep.subr.bf16.mxu0 %v9266_v4  ;;  %5842 = vmatprep.subr.bf16.mxu1 %v9269_v11  ;;  %v9338_v4 = vld [vmem:[#allocation11 + $0x188] ss:$16 sps:$4 sm:$0xff]   ;;  %v9343_v11 = vld [vmem:[#allocation11 + $0x1a4] ss:$16 sps:$4 sm:$0xff]  }
 0x3bd   : > { %5717 = vmatpush1.bf16.msra.mxu0 %v9264_v12  ;;  %5843 = vmatpush1.bf16.msra.mxu1 %v9267_v22  ;;  %v9341_v12 = vld [vmem:[#allocation11 + $0x1a0] ss:$16 sps:$4 sm:$0xff]   ;;  %v9344_v22 = vld [vmem:[#allocation11 + $0x1a8] ss:$16 sps:$4 sm:$0xff]  }
 0x3be   : > { %5718 = vmatprep.subr.bf16.mxu0 %v9272_v59  ;;  %5844 = vmatprep.subr.bf16.mxu1 %v9275_v17  ;;  %v9352_v59 = vld [vmem:[#allocation11 + $0x1cc] ss:$16 sps:$4 sm:$0xff]   ;;  %v9347_v17 = vld [vmem:[#allocation11 + $0x1c0] ss:$16 sps:$4 sm:$0xff]  }
 0x3bf   : > { %4868 = vmatmul.mubr.bf16.gmra.mrb[28].mxu0 %v10287_v55  ;;  %4994 = vmatmul.mubr.bf16.gmra.mrb[28].mxu1 %v10287_v55  ;;  %v9284_v55 = vld [vmem:[#allocation11 + $0x80] ss:$16 sps:$4 sm:$0xff]  }
 0x3c0   : > { %4877 = vmatprep.mubr.bf16.mxu0 %v4109_v32  ;;  %5003 = vmatprep.mubr.bf16.mxu1 %v4109_v32  ;;  %v9290_v32 = vld [vmem:[#allocation3] ss:$16 sps:$4 sm:$0xff]  }
 0x3c1   : > { %5719 = vmatpush1.bf16.msra.mxu0 %v9270_v44  ;;  %5845 = vmatpush1.bf16.msra.mxu1 %v9273_v49  ;;  %v9353_v44 = vld [vmem:[#allocation11 + $0x1e0] ss:$16 sps:$4 sm:$0xff]   ;;  %v9356_v49 = vld [vmem:[#allocation11 + $0x1e8] ss:$16 sps:$4 sm:$0xff]  }
 0x3c2   : > { %5720 = vmatprep.subr.bf16.mxu0 %v9279_v61  ;;  %5846 = vmatprep.subr.bf16.mxu1 %v9282_v63  ;;  %v9361_v61 = vld [vmem:[#allocation11 + $0x204] ss:$16 sps:$4 sm:$0xff]   ;;  %v9364_v63 = vld [vmem:[#allocation11 + $0x20c] ss:$16 sps:$4 sm:$0xff]  }
 0x3c5   : > { %5721 = vmatpush1.bf16.msra.mxu0 %v9277_v25  ;;  %5847 = vmatpush1.bf16.msra.mxu1 %v9280_v27  ;;  %v9365_v25 = vld [vmem:[#allocation3 + $0x24] ss:$16 sps:$4 sm:$0xff]  }
 0x3c6   : > { %5722 = vmatprep.subr.bf16.mxu0 %v9286_v28  ;;  %5848 = vmatprep.subr.bf16.mxu1 %v9289_v29  ;;  %v9369_v27 = vld [vmem:[#allocation11 + $0x224] ss:$16 sps:$4 sm:$0xff]   ;;  %v9370_v28 = vld [vmem:[#allocation11 + $0x228] ss:$16 sps:$4 sm:$0xff]  }
 0x3c7   : > { %4878 = vmatmul.mubr.bf16.gmra.mrb[32].mxu0 %v4101_v7  ;;  %5004 = vmatmul.mubr.bf16.gmra.mrb[32].mxu1 %v4101_v7  ;;  %v9376_v29 = vld [vmem:[#allocation11 + $0x244] ss:$16 sps:$4 sm:$0xff]   ;;  %v9373_v7 = vld [vmem:[#allocation3 + $0x20] ss:$16 sps:$4 sm:$0xff]  }
 0x3c8   : > { %5746 = vmatprep.mubr.bf16.mxu0 %v9292_v36  ;;  %5872 = vmatprep.mubr.bf16.mxu1 %v9292_v36  ;;  %v9377_v36 = vld [vmem:[#allocation11 + $0x248] ss:$16 sps:$4 sm:$0xff]  }
 0x3c9   : > { %5723 = vmatpush1.bf16.msra.mxu0 %v9284_v55  ;;  %5849 = vmatpush1.bf16.msra.mxu1 %v9287_v19  ;;  %v9379_v55 = vld [vmem:[#allocation11 + $0x24c] ss:$16 sps:$4 sm:$0xff]   ;;  %v9374_v19 = vld [vmem:[#allocation11 + $0x240] ss:$16 sps:$4 sm:$0xff]  }
 0x3ca   : > { %5724 = vmatprep.subr.bf16.mxu0 %v9295_v30  ;;  %5850 = vmatprep.subr.bf16.mxu1 %v9298_v31  ;;  %v9380_v30 = vld [vmem:[#allocation3 + $0x44] ss:$16 sps:$4 sm:$0xff]  }
 0x3cb   : > { %v9384_v31 = vld [vmem:[#allocation11 + $0x264] ss:$16 sps:$4 sm:$0xff]  }
 0x3cd   : > { %5725 = vmatpush1.bf16.msra.mxu0 %v9293_v60  ;;  %5851 = vmatpush1.bf16.msra.mxu1 %v9296_v9  ;;  %v9387_v60 = vld [vmem:[#allocation11 + $0x26c] ss:$16 sps:$4 sm:$0xff]   ;;  %v9382_v9 = vld [vmem:[#allocation11 + $0x260] ss:$16 sps:$4 sm:$0xff]  }
 0x3ce   : > { %5726 = vmatprep.subr.bf16.mxu0 %v9301_v34  ;;  %5852 = vmatprep.subr.bf16.mxu1 %v9304_v35  ;;  %v9385_v34 = vld [vmem:[#allocation11 + $0x268] ss:$16 sps:$4 sm:$0xff]   ;;  %v9391_v35 = vld [vmem:[#allocation11 + $0x284] ss:$16 sps:$4 sm:$0xff]  }
 0x3d1   : > { %5727 = vmatpush1.bf16.msra.mxu0 %v9299_v2  ;;  %5853 = vmatpush1.bf16.msra.mxu1 %v9302_v26  ;;  %v9394_v2 = vld [vmem:[#allocation11 + $0x28c] ss:$16 sps:$4 sm:$0xff]   ;;  %v9389_v26 = vld [vmem:[#allocation11 + $0x280] ss:$16 sps:$4 sm:$0xff]  }
 0x3d2   : > { %5728 = vmatprep.subr.bf16.mxu0 %v9307_v38  ;;  %5854 = vmatprep.subr.bf16.mxu1 %v9310_v41  ;;  %v9388_v38 = vld [vmem:[#allocation3 + $0x40] ss:$16 sps:$4 sm:$0xff]   ;;  %v9392_v41 = vld [vmem:[#allocation11 + $0x288] ss:$16 sps:$4 sm:$0xff]  }
 0x3d5   : > { %5729 = vmatpush1.bf16.msra.mxu0 %v9305_v15  ;;  %5855 = vmatpush1.bf16.msra.mxu1 %v9308_v52  ;;  %v9397_v15 = vld [vmem:[#allocation3 + $0xc] ss:$16 sps:$4 sm:$0xff]   ;;  %v9400_v52 = vld [vmem:[#allocation11 + $0x2a4] ss:$16 sps:$4 sm:$0xff]  }
 0x3d6   : > { %5730 = vmatprep.subr.bf16.mxu0 %v9313_v37  ;;  %5856 = vmatprep.subr.bf16.mxu1 %v9316_v45  ;;  %v9403_v37 = vld [vmem:[#allocation11 + $0x2ac] ss:$16 sps:$4 sm:$0xff]   ;;  %v9398_v45 = vld [vmem:[#allocation11 + $0x2a0] ss:$16 sps:$4 sm:$0xff]  }
 0x3d9   : > { %5731 = vmatpush1.bf16.msra.mxu0 %v9311_v47  ;;  %5857 = vmatpush1.bf16.msra.mxu1 %v9314_v24  ;;  %v9401_v47 = vld [vmem:[#allocation11 + $0x2a8] ss:$16 sps:$4 sm:$0xff]   ;;  %v9406_v24 = vld [vmem:[#allocation11 + $0x2c4] ss:$16 sps:$4 sm:$0xff]  }
 0x3da   : > { %5732 = vmatprep.subr.bf16.mxu0 %v9319_v16  ;;  %5858 = vmatprep.subr.bf16.mxu1 %v9322_v42  ;;  %v9409_v16 = vld [vmem:[#allocation11 + $0x2cc] ss:$16 sps:$4 sm:$0xff]   ;;  %v9404_v42 = vld [vmem:[#allocation11 + $0x2c0] ss:$16 sps:$4 sm:$0xff]  }
 0x3dd   : > { %5733 = vmatpush1.bf16.msra.mxu0 %v9317_v48  ;;  %5859 = vmatpush1.bf16.msra.mxu1 %v9320_v53  ;;  %v9407_v48 = vld [vmem:[#allocation11 + $0x2c8] ss:$16 sps:$4 sm:$0xff]   ;;  %v9412_v53 = vld [vmem:[#allocation11 + $0x2e4] ss:$16 sps:$4 sm:$0xff]  }
 0x3de   : > { %5734 = vmatprep.subr.bf16.mxu0 %v9325_v50  ;;  %5860 = vmatprep.subr.bf16.mxu1 %v9328_v54  ;;  %v9415_v50 = vld [vmem:[#allocation11 + $0x2ec] ss:$16 sps:$4 sm:$0xff]   ;;  %v9410_v54 = vld [vmem:[#allocation11 + $0x2e0] ss:$16 sps:$4 sm:$0xff]  }
 0x3e1   : > { %5735 = vmatpush1.bf16.msra.mxu0 %v9323_v58  ;;  %5861 = vmatpush1.bf16.msra.mxu1 %v9326_v57  ;;  %v9413_v58 = vld [vmem:[#allocation11 + $0x2e8] ss:$16 sps:$4 sm:$0xff]   ;;  %v9418_v57 = vld [vmem:[#allocation11 + $0x304] ss:$16 sps:$4 sm:$0xff]  }
 0x3e2   : > { %5736 = vmatprep.subr.bf16.mxu0 %v9331_v62  ;;  %5862 = vmatprep.subr.bf16.mxu1 %v9334_v33  ;;  %v9421_v62 = vld [vmem:[#allocation11 + $0x30c] ss:$16 sps:$4 sm:$0xff]   ;;  %v9416_v33 = vld [vmem:[#allocation11 + $0x300] ss:$16 sps:$4 sm:$0xff]  }
 0x3e5   : > { %5737 = vmatpush1.bf16.msra.mxu0 %v9329_v56  ;;  %5863 = vmatpush1.bf16.msra.mxu1 %v9332_v5  ;;  %v9419_v56 = vld [vmem:[#allocation11 + $0x308] ss:$16 sps:$4 sm:$0xff]   ;;  %v9424_v5 = vld [vmem:[#allocation11 + $0x324] ss:$16 sps:$4 sm:$0xff]  }
 0x3e6   : > { %5738 = vmatprep.subr.bf16.mxu0 %v9337_v0  ;;  %5864 = vmatprep.subr.bf16.mxu1 %v9340_v1  ;;  %v9427_v0 = vld [vmem:[#allocation11 + $0x32c] ss:$16 sps:$4 sm:$0xff]   ;;  %v9422_v1 = vld [vmem:[#allocation11 + $0x320] ss:$16 sps:$4 sm:$0xff]  }
 0x3e9   : > { %5739 = vmatpush1.bf16.msra.mxu0 %v9335_v3  ;;  %5865 = vmatpush1.bf16.msra.mxu1 %v9338_v4  ;;  %v9425_v3 = vld [vmem:[#allocation11 + $0x328] ss:$16 sps:$4 sm:$0xff]   ;;  %v9430_v4 = vld [vmem:[#allocation11 + $0x344] ss:$16 sps:$4 sm:$0xff]  }
 0x3ea   : > { %5740 = vmatprep.subr.bf16.mxu0 %v9343_v11  ;;  %5866 = vmatprep.subr.bf16.mxu1 %v9346_v6  ;;  %v9433_v11 = vld [vmem:[#allocation11 + $0x34c] ss:$16 sps:$4 sm:$0xff]   ;;  %v9428_v6 = vld [vmem:[#allocation11 + $0x340] ss:$16 sps:$4 sm:$0xff]  }
 0x3ed   : > { %5741 = vmatpush1.bf16.msra.mxu0 %v9341_v12  ;;  %5867 = vmatpush1.bf16.msra.mxu1 %v9344_v22  ;;  %v9431_v12 = vld [vmem:[#allocation11 + $0x348] ss:$16 sps:$4 sm:$0xff]   ;;  %v9436_v22 = vld [vmem:[#allocation11 + $0x364] ss:$16 sps:$4 sm:$0xff]  }
 0x3ee   : > { %5742 = vmatprep.subr.bf16.mxu0 %v9349_v43  ;;  %5868 = vmatprep.subr.bf16.mxu1 %v9352_v59  ;;  %v9439_v43 = vld [vmem:[#allocation11 + $0x36c] ss:$16 sps:$4 sm:$0xff]   ;;  %v9434_v59 = vld [vmem:[#allocation11 + $0x360] ss:$16 sps:$4 sm:$0xff]  }
 0x3f1   : > { %5743 = vmatpush1.bf16.msra.mxu0 %v9347_v17  ;;  %5869 = vmatpush1.bf16.msra.mxu1 %v9350_v18  ;;  %v9437_v17 = vld [vmem:[#allocation11 + $0x368] ss:$16 sps:$4 sm:$0xff]   ;;  %v9442_v18 = vld [vmem:[#allocation11 + $0x384] ss:$16 sps:$4 sm:$0xff]  }
 0x3f2   : > { %5744 = vmatprep.subr.bf16.mxu0 %v9355_v20  ;;  %5870 = vmatprep.subr.bf16.mxu1 %v9358_v40  ;;  %v9445_v20 = vld [vmem:[#allocation11 + $0x38c] ss:$16 sps:$4 sm:$0xff]   ;;  %v9440_v40 = vld [vmem:[#allocation11 + $0x380] ss:$16 sps:$4 sm:$0xff]  }
 0x3f5   : > { %5745 = vmatpush1.bf16.msra.mxu0 %v9353_v44  ;;  %5871 = vmatpush1.bf16.msra.mxu1 %v9356_v49  ;;  %v9443_v44 = vld [vmem:[#allocation11 + $0x388] ss:$16 sps:$4 sm:$0xff]   ;;  %v9448_v49 = vld [vmem:[#allocation11 + $0x3a4] ss:$16 sps:$4 sm:$0xff]  }
 0x3f6   : > { %5777 = vmatprep.subr.bf16.mxu0 %v9361_v61  ;;  %5903 = vmatprep.subr.bf16.mxu1 %v9364_v63  ;;  %v9451_v61 = vld [vmem:[#allocation11 + $0x3ac] ss:$16 sps:$4 sm:$0xff]   ;;  %v9446_v63 = vld [vmem:[#allocation11 + $0x3a0] ss:$16 sps:$4 sm:$0xff]  }
 0x3f8   : > { %5747 = vmatmul.mubr.bf16.vlgmr.msra.gmra.mrb[24].mxu0 %v9290_v32  ;;  %5873 = vmatmul.mubr.bf16.vlgmr.msra.gmra.mrb[24].mxu1 %v9290_v32  ;;  %v9454_v32 = vld [vmem:[#allocation11 + $0x3c4] ss:$16 sps:$4 sm:$0xff]  }
 0x3f9   : > { %5756 = vmatprep.mubr.bf16.mxu0 %v9365_v25  ;;  %5778 = vmatpush1.bf16.msra.mxu0 %v9359_v21  ;;  %v9449_v21 = vld [vmem:[#allocation11 + $0x3a8] ss:$16 sps:$4 sm:$0xff]  }
 0x3fa   : > { %5882 = vmatprep.mubr.bf16.mxu1 %v9365_v25  ;;  %5904 = vmatpush1.bf16.msra.mxu1 %v9362_v51  ;;  %v9457_v51 = vld [vmem:[#allocation11 + $0x3cc] ss:$16 sps:$4 sm:$0xff]   ;;  %v9452_v25 = vld [vmem:[#allocation11 + $0x3c0] ss:$16 sps:$4 sm:$0xff]  }
 0x3fb   : > { %5779 = vmatprep.subr.bf16.mxu0 %v9369_v27  ;;  %5905 = vmatprep.subr.bf16.mxu1 %v9372_v23  ;;  %v9455_v27 = vld [vmem:[#allocation11 + $0x3c8] ss:$16 sps:$4 sm:$0xff]   ;;  %v9460_v23 = vld [vmem:[#allocation11 + $0x3e4] ss:$16 sps:$4 sm:$0xff]  }
 0x3fd   : > { %5780 = vmatpush1.bf16.msra.mxu0 %v9367_v8  ;;  %v9463_v8 = vld [vmem:[#allocation11 + $0x3ec] ss:$16 sps:$4 sm:$0xff]  }
 0x3fe   : > { %5906 = vmatpush1.bf16.msra.mxu1 %v9370_v28  ;;  %5781 = vmatprep.subr.bf16.mxu0 %v9376_v29  ;;  %v9458_v28 = vld [vmem:[#allocation11 + $0x3e0] ss:$16 sps:$4 sm:$0xff]   ;;  %v9461_v29 = vld [vmem:[#allocation11 + $0x3e8] ss:$16 sps:$4 sm:$0xff]  }
 0x3ff   : > { %5907 = vmatprep.subr.bf16.mxu1 %v9379_v55  ;;  %v9395_v55 = vld [vmem:[#allocation3 + $0x8] ss:$16 sps:$4 sm:$0xff]  }
 0x400   : > { %5757 = vmatmul.mubr.bf16.gmra.mrb[28].mxu0 %v9373_v7  ;;  %5883 = vmatmul.mubr.bf16.gmra.mrb[28].mxu1 %v9373_v7  ;;  %v9466_v7 = vld [vmem:[#allocation3 + $0x28] ss:$16 sps:$4 sm:$0xff]  }
 0x401   : > { %5766 = vmatprep.mubr.bf16.mxu0 %v9380_v30  ;;  %5782 = vmatpush1.bf16.msra.mxu0 %v9374_v19  ;;  %v9464_v19 = vld [vmem:[#allocation3 + $0x2c] ss:$16 sps:$4 sm:$0xff]  }
 0x402   : > { %5892 = vmatprep.mubr.bf16.mxu1 %v9380_v30  ;;  %5908 = vmatpush1.bf16.msra.mxu1 %v9377_v36  ;;  %v9467_v36 = vld [vmem:[#allocation3 + $0x4c] ss:$16 sps:$4 sm:$0xff]   ;;  %v9469_v30 = vld [vmem:[#allocation3 + $0x48] ss:$16 sps:$4 sm:$0xff]  }
 0x403   : > { %5783 = vmatprep.subr.bf16.mxu0 %v9384_v31  ;;  %5909 = vmatprep.subr.bf16.mxu1 %v9387_v60  ;;  %v9470_v31 = vld [vmem:[%s10958_s9 + $0x40] sm:$0xff]  }
 0x404   : > { %v9471_v60 = vld [vmem:[%s10958_s9 + $0xc0] sm:$0xff]  }
 0x405   : > { %5784 = vmatpush1.bf16.msra.mxu0 %v9382_v9  ;;  %v9472_v9 = vld [vmem:[%s10958_s9] sm:$0xff]  }
 0x406   : > { %5910 = vmatpush1.bf16.msra.mxu1 %v9385_v34  ;;  %5785 = vmatprep.subr.bf16.mxu0 %v9391_v35  ;;  %v9473_v34 = vld [vmem:[%s10958_s9 + $0x80] sm:$0xff]   ;;  %v9474_v35 = vld [vmem:[%s10958_s9 + $0x48] sm:$0xff]  }
 0x407   : > { %5911 = vmatprep.subr.bf16.mxu1 %v9394_v2  ;;  %v9475_v2 = vld [vmem:[%s10958_s9 + $0xc8] sm:$0xff]  }
 0x408   : > { %5767 = vmatmul.mubr.bf16.gmra.mrb[32].mxu0 %v9388_v38  ;;  %5893 = vmatmul.mubr.bf16.gmra.mrb[32].mxu1 %v9388_v38  ;;  %v9477_v38 = vld [vmem:[%s10958_s9 + $0x88] sm:$0xff]  }
 0x409   : > { %5786 = vmatpush1.bf16.msra.mxu0 %v9389_v26  ;;  %5809 = vmatprep.mubr.bf16.mxu0 %v9397_v15  ;;  %v9476_v26 = vld [vmem:[%s10958_s9 + $0x8] sm:$0xff]  }
 0x40a   : > { %5912 = vmatpush1.bf16.msra.mxu1 %v9392_v41  ;;  %5935 = vmatprep.mubr.bf16.mxu1 %v9397_v15  ;;  %v9478_v41 = vld [vmem:[%s10958_s9 + $0x50] sm:$0xff]  }
 0x40b   : > { %5787 = vmatprep.subr.bf16.mxu0 %v9400_v52  ;;  %5913 = vmatprep.subr.bf16.mxu1 %v9403_v37  ;;  %v9479_v15 = vld [vmem:[%s10958_s9 + $0xd0] sm:$0xff]  }
 0x40c   : > { %v9480_v52 = vld [vmem:[%s10958_s9 + $0x10] sm:$0xff]  }
 0x40d   : > { %5788 = vmatpush1.bf16.msra.mxu0 %v9398_v45  ;;  %v9481_v37 = vld [vmem:[%s10958_s9 + $0x90] sm:$0xff]   ;;  %v9482_v45 = vld [vmem:[%s10958_s9 + $0x58] sm:$0xff]  }
 0x40e   : > { %5914 = vmatpush1.bf16.msra.mxu1 %v9401_v47  ;;  %5789 = vmatprep.subr.bf16.mxu0 %v9406_v24  ;;  %v9483_v47 = vld [vmem:[%s10958_s9 + $0xd8] sm:$0xff]  }
 0x40f   : > { %5915 = vmatprep.subr.bf16.mxu1 %v9409_v16  ;;  %v9484_v24 = vld [vmem:[%s10958_s9 + $0x18] sm:$0xff]  }
 0x410   : > { %v9485_v16 = vld [vmem:[%s10958_s9 + $0x98] sm:$0xff]  }
 0x411   : > { %5790 = vmatpush1.bf16.msra.mxu0 %v9404_v42  ;;  %v9486_v42 = vld [vmem:[%s10958_s9 + $0x60] sm:$0xff]  }
 0x412   : > { %5916 = vmatpush1.bf16.msra.mxu1 %v9407_v48  ;;  %5791 = vmatprep.subr.bf16.mxu0 %v9412_v53  ;;  %v9487_v48 = vld [vmem:[%s10958_s9 + $0xe0] sm:$0xff]  }
 0x413   : > { %5917 = vmatprep.subr.bf16.mxu1 %v9415_v50  ;;  %v9488_v53 = vld [vmem:[%s10958_s9 + $0x20] sm:$0xff]  }
 0x414   : > { %v9489_v50 = vld [vmem:[%s10958_s9 + $0xa0] sm:$0xff]  }
 0x415   : > { %5792 = vmatpush1.bf16.msra.mxu0 %v9410_v54  ;;  %v9490_v54 = vld [vmem:[%s10958_s9 + $0x68] sm:$0xff]  }
 0x416   : > { %5918 = vmatpush1.bf16.msra.mxu1 %v9413_v58  ;;  %5793 = vmatprep.subr.bf16.mxu0 %v9418_v57  ;;  %v9491_v58 = vld [vmem:[%s10958_s9 + $0xe8] sm:$0xff]  }
 0x417   : > { %5919 = vmatprep.subr.bf16.mxu1 %v9421_v62  ;;  %v9492_v57 = vld [vmem:[%s10958_s9 + $0x28] sm:$0xff]  }
 0x418   : > { %v9493_v62 = vld [vmem:[%s10958_s9 + $0xa8] sm:$0xff]  }
 0x419   : > { %5794 = vmatpush1.bf16.msra.mxu0 %v9416_v33  ;;  %v9494_v33 = vld [vmem:[%s10958_s9 + $0x70] sm:$0xff]  }
 0x41a   : > { %5920 = vmatpush1.bf16.msra.mxu1 %v9419_v56  ;;  %5795 = vmatprep.subr.bf16.mxu0 %v9424_v5  ;;  %v9495_v56 = vld [vmem:[%s10958_s9 + $0xf0] sm:$0xff]  }
 0x41b   : > { %5921 = vmatprep.subr.bf16.mxu1 %v9427_v0  ;;  %v9496_v5 = vld [vmem:[%s10958_s9 + $0x30] sm:$0xff]  }
 0x41c   : > { %v9497_v0 = vld [vmem:[%s10958_s9 + $0xb0] sm:$0xff]  }
 0x41d   : > { %5796 = vmatpush1.bf16.msra.mxu0 %v9422_v1  ;;  %v9498_v1 = vld [vmem:[%s10958_s9 + $0x78] sm:$0xff]  }
 0x41e   : > { %5922 = vmatpush1.bf16.msra.mxu1 %v9425_v3  ;;  %5797 = vmatprep.subr.bf16.mxu0 %v9430_v4  ;;  %v9499_v3 = vld [vmem:[%s10958_s9 + $0xf8] sm:$0xff]  }
 0x41f   : > { %5923 = vmatprep.subr.bf16.mxu1 %v9433_v11  ;;  %v9500_v4 = vld [vmem:[%s10958_s9 + $0x38] sm:$0xff]  }
 0x420   : > { %v9501_v11 = vld [vmem:[%s10958_s9 + $0xb8] sm:$0xff]  }
 0x421   : > { %5798 = vmatpush1.bf16.msra.mxu0 %v9428_v6  ;;  %v5966_v6 = vld [vmem:[%s10957_s8] sm:$0xf] }
 0x422   : > { %5924 = vmatpush1.bf16.msra.mxu1 %v9431_v12  ;;  %5799 = vmatprep.subr.bf16.mxu0 %v9436_v22  ;;  %v6358_v12 = vld [vmem:[#allocation2 + $0x60] sm:$0x33]  ;;  %v10402_v22 = vrot.slane %v5966_v6, %v10049_v13 }
 0x423   : > { %5925 = vmatprep.subr.bf16.mxu1 %v9439_v43  ;;  %v10405_v43 = vrot.slane %v5966_v6, %v10062_v39 }
 0x425   : > { %5800 = vmatpush1.bf16.msra.mxu0 %v9434_v59  ;;  %v10408_v59 = vrot.slane %v5966_v6, %v10051_v14 }
 0x426   : > { %5926 = vmatpush1.bf16.msra.mxu1 %v9437_v17  ;;  %5801 = vmatprep.subr.bf16.mxu0 %v9442_v18  ;;  %v6431_v17 = vshrl.u32 %v6358_v12, 16  ;;  %v6434_v18 = vshll.u32 %v6358_v12, 16 }
 0x427   : > { %5927 = vmatprep.subr.bf16.mxu1 %v9445_v20  ;;  %v10411_v20 = vrot.slane %v5966_v6, %v10065_v46 }
 0x428   : > { %v10421_v46 = vrot.slane %v6434_v18, 6 }
 0x429   : > { %5802 = vmatpush1.bf16.msra.mxu0 %v9440_v40 }
 0x42a   : > { %5928 = vmatpush1.bf16.msra.mxu1 %v9443_v44  ;;  %5803 = vmatprep.subr.bf16.mxu0 %v9448_v49  ;;  %v10413_v44 = vld [vmem:[#allocation2 + $0x60] sm:$0x11] }
 0x42b   : > { %5929 = vmatprep.subr.bf16.mxu1 %v9451_v61  ;;  %v6239_v13 = vshll.u32 %v10413_v44, 16 }
 0x42d   : > { %5804 = vmatpush1.bf16.msra.mxu0 %v9446_v63 }
 0x42e   : > { %5930 = vmatpush1.bf16.msra.mxu1 %v9449_v21  ;;  %5805 = vmatprep.subr.bf16.mxu0 %v9454_v32 }
 0x42f   : > { %5931 = vmatprep.subr.bf16.mxu1 %v9457_v51  ;;  %v10419_v51 = vrot.slane %v6431_v17, 5 }
 0x431   : > { %5806 = vmatpush1.bf16.msra.mxu0 %v9452_v25 }
 0x432   : > { %5932 = vmatpush1.bf16.msra.mxu1 %v9455_v27  ;;  %5807 = vmatprep.subr.bf16.mxu0 %v9460_v23 }
 0x433   : > { %5933 = vmatprep.subr.bf16.mxu1 %v9463_v8 }
 0x435   : > { %5808 = vmatpush1.bf16.msra.mxu0 %v9458_v28 }
 0x436   : > { %5934 = vmatpush1.bf16.msra.mxu1 %v9461_v29  ;;  %8213 = vmatprep.subr.bf16.mxu0 %v9470_v31  ;;  %v10434_v31 = vrot.slane %v6239_v13, 5 }
 0x437   : > { %8247 = vmatprep.subr.bf16.mxu1 %v9471_v60  ;;  %v6329_v60 = vrot.slane %v10413_v44, 5 }
 0x438   : > { %5810 = vmatmul.mubr.bf16.vlgmr.msra.gmra.mrb[24].mxu0 %v9395_v55 }
 0x439   : > { %5936 = vmatmul.mubr.bf16.vlgmr.msra.gmra.mrb[24].mxu1 %v9395_v55  ;;  %5819 = vmatprep.mubr.bf16.mxu0 %v9464_v19 }
 0x43a   : > { %5945 = vmatprep.mubr.bf16.mxu1 %v9464_v19  ;;  %8214 = vmatpush3.bf16.msra.mxu0 %v9472_v9 }
 0x43b   : > { %8248 = vmatpush3.bf16.msra.mxu1 %v9473_v34  ;;  %8215 = vmatprep.subr.bf16.mxu0 %v9474_v35 }
 0x43c   : > { %8249 = vmatprep.subr.bf16.mxu1 %v9475_v2  ;;  %v6437_v2 = vor.u32 %v10421_v46, %v10419_v51 }
 0x43e   : > { %8216 = vmatpush3.bf16.msra.mxu0 %v9476_v26 }
 0x43f   : > { %8250 = vmatpush3.bf16.msra.mxu1 %v9477_v38  ;;  %8217 = vmatprep.subr.bf16.mxu0 %v9478_v41 }
 0x440   : > { %5820 = vmatmul.mubr.bf16.gmra.mrb[28].mxu0 %v9466_v7  ;;  %8251 = vmatprep.subr.bf16.mxu1 %v9479_v15 }
 0x441   : > { %5946 = vmatmul.mubr.bf16.gmra.mrb[28].mxu1 %v9466_v7  ;;  %5829 = vmatprep.mubr.bf16.mxu0 %v9467_v36  ;;  %v10429_v7 = vld [vmem:[#allocation2 + $0x68] sm:$0x33] }
 0x442   : > { %5955 = vmatprep.mubr.bf16.mxu1 %v9467_v36  ;;  %8218 = vmatpush3.bf16.msra.mxu0 %v9480_v52  ;;  %v6441_v15 = vshrl.u32 %v10429_v7, 16 }
 0x443   : > { %8252 = vmatpush3.bf16.msra.mxu1 %v9481_v37  ;;  %8219 = vmatprep.subr.bf16.mxu0 %v9482_v45 }
 0x444   : > { %8253 = vmatprep.subr.bf16.mxu1 %v9483_v47 }
 0x446   : > { %8220 = vmatpush3.bf16.msra.mxu0 %v9484_v24 }
 0x447   : > { %8254 = vmatpush3.bf16.msra.mxu1 %v9485_v16  ;;  %8221 = vmatprep.subr.bf16.mxu0 %v9486_v42 }
 0x448   : > { %5830 = vmatmul.mubr.bf16.gmra.mrb[32].mxu0 %v9469_v30  ;;  %8255 = vmatprep.subr.bf16.mxu1 %v9487_v48 }
 0x449   : > { %5956 = vmatmul.mubr.bf16.gmra.mrb[32].mxu1 %v9469_v30 }
 0x44a   : > { %8222 = vmatpush3.bf16.msra.mxu0 %v9488_v53 }
 0x44b   : > { %8256 = vmatpush3.bf16.msra.mxu1 %v9489_v50  ;;  %8223 = vmatprep.subr.bf16.mxu0 %v9490_v54 }
 0x44c   : > { %8257 = vmatprep.subr.bf16.mxu1 %v9491_v58 }
 0x44e   : > { %8224 = vmatpush3.bf16.msra.mxu0 %v9492_v57 }
 0x44f   : > { %8258 = vmatpush3.bf16.msra.mxu1 %v9493_v62  ;;  %8225 = vmatprep.subr.bf16.mxu0 %v9494_v33 }
 0x450   : > { %8259 = vmatprep.subr.bf16.mxu1 %v9495_v56 }
 0x452   : > { %8226 = vmatpush3.bf16.msra.mxu0 %v9496_v5 }
 0x453   : > { %8260 = vmatpush3.bf16.msra.mxu1 %v9497_v0  ;;  %8227 = vmatprep.subr.bf16.mxu0 %v9498_v1 }
 0x454   : > { %8261 = vmatprep.subr.bf16.mxu1 %v9499_v3 }
 0x456   : > { %8228 = vmatpush3.bf16.msra.mxu0 %v9500_v4 }
 0x457   : > { %8262 = vmatpush3.bf16.msra.mxu1 %v9501_v11 }
 0x50b   : > { %v5811_v40 = vpop.f32.mrb[24].mxu0 }
 0x50c   : > { %v5988_v49 = vadd.f32 %v10402_v22, %v5811_v40  ;;  %v5937_v61 = vpop.f32.mrb[24].mxu1  ;;  %v5813_v63 = vpop.f32.mrb[25].mxu0 }
 0x50d   : > { %v5990_v39 = vadd.f32 %v10405_v43, %v5937_v61  ;;  %v5989_v14 = vadd.f32 %v10408_v59, %v5813_v63  ;;  %v5939_v21 = vpop.f32.mrb[25].mxu1  ;;  %v5815_v32 = vpop.f32.mrb[26].mxu0 }
 0x50e   : > { %v5991_v25 = vadd.f32 %v10411_v20, %v5939_v21  ;;  %v5992_v27 = vadd.f32 %v10402_v22, %v5815_v32  ;;  %v5941_v23 = vpop.f32.mrb[26].mxu1  ;;  %v5817_v8 = vpop.f32.mrb[27].mxu0 }
 0x50f   : > { %v10425_v28 = vpack.c.bf16 %v5989_v14, %v5988_v49  ;;  %v5994_v29 = vadd.f32 %v10405_v43, %v5941_v23  ;;  %v5993_v55 = vadd.f32 %v10408_v59, %v5817_v8  ;;  %v5943_v19 = vpop.f32.mrb[27].mxu1 }
 0x510   : > { %v10431_v36 = vpack.c.bf16 %v5991_v25, %v5990_v39  ;;  %v5995_v30 = vadd.f32 %v10411_v20, %v5943_v19 }
 0x511   : > { %6084 = vst [vmem:[#allocation2] sm:$0xff] %v10425_v28  ;;  %v10438_v9 = vpack.c.bf16 %v5993_v55, %v5992_v27  ;;  %v6126_v34 = vshrl.u32 %v10425_v28, 16  ;;  %v6129_v35 = vshll.u32 %v10425_v28, 16 }
 0x512   : > { %6085 = vst [vmem:[#allocation2 + $0x8] sm:$0xff] %v10431_v36  ;;  %v10445_v26 = vpack.c.bf16 %v5995_v30, %v5994_v29  ;;  %v6140_v38 = vshrl.u32 %v10431_v36, 16  ;;  %v6143_v41 = vshll.u32 %v10431_v36, 16 }
 0x513   : > { %6086 = vst [vmem:[#allocation2 + $0x10] sm:$0xff] %v10438_v9  ;;  %v5821_v52 = vpop.f32.mrb[28].mxu0  ;;  %v6128_v37 = vrot.slane %v6126_v34, 4  ;;  %v6131_v45 = vrot.slane %v6129_v35, 5  ;;  %v6135_v47 = vshll.u32 %v10438_v9, 16  ;;  %v6153_v24 = vshrl.u32 %v10438_v9, 16 }
 0x514   : > { %v5996_v16 = vadd.f32 %v10402_v22, %v5821_v52  ;;  %v5947_v42 = vpop.f32.mrb[28].mxu1  ;;  %v5823_v48 = vpop.f32.mrb[29].mxu0  ;;  %v6298_v53 = vrot.slane %v10438_v9, 5  ;;  %v10455_v50 = vrot.slane %v6140_v38, 4  ;;  %v10457_v54 = vrot.slane %v6143_v41, 5 }
 0x515   : > { %v5998_v58 = vadd.f32 %v10405_v43, %v5947_v42  ;;  %v5997_v57 = vadd.f32 %v10408_v59, %v5823_v48  ;;  %v5949_v62 = vpop.f32.mrb[29].mxu1  ;;  %v5825_v33 = vpop.f32.mrb[30].mxu0  ;;  %v6132_v56 = vor.u32 %v6131_v45, %v6128_v37  ;;  %v6137_v5 = vrot.slane %v6135_v47, 5 }
 0x516   : > { %v5999_v0 = vadd.f32 %v10411_v20, %v5949_v62  ;;  %v6000_v1 = vadd.f32 %v10402_v22, %v5825_v33  ;;  %v5951_v3 = vpop.f32.mrb[30].mxu1  ;;  %v5827_v4 = vpop.f32.mrb[31].mxu0  ;;  %v6155_v6 = vrot.slane %v6153_v24, 4  ;;  %v6304_v12 = vrot.slane %v6298_v53, 4 }
 0x517   : > { %v10469_v17 = vpack.c.bf16 %v5997_v57, %v5996_v16  ;;  %v6002_v18 = vadd.f32 %v10405_v43, %v5951_v3  ;;  %v6001_v40 = vadd.f32 %v10408_v59, %v5827_v4  ;;  %v5953_v49 = vpop.f32.mrb[31].mxu1  ;;  %v6133_v61 = vrot.slane %v6132_v56, 4 }
 0x518   : > { %v10473_v63 = vpack.c.bf16 %v5999_v0, %v5998_v58  ;;  %v6003_v13 = vadd.f32 %v10411_v20, %v5953_v49  ;;  %v6156_v39 = vor.u32 %v6155_v6, %v6137_v5  ;;  %v6277_v14 = vld [vmem:[#allocation2] sm:$0xee]  ;;  %v6372_v21 = vrot.slane %v6153_v24, 5 }
 0x519   : > { %6088 = vst [vmem:[#allocation2 + $0x20] sm:$0xff] %v10469_v17  ;;  %v10477_v32 = vpack.c.bf16 %v6001_v40, %v6000_v1  ;;  %v6138_v25 = vsel %vm10465_vm5, %v6133_v61, %v6137_v5  ;;  %v6159_v27 = vshll.u32 %v10469_v17, 16  ;;  %v6173_v23 = vshrl.u32 %v10469_v17, 16 }
 0x51a   : > { %6089 = vst [vmem:[#allocation2 + $0x28] sm:$0xff] %v10473_v63  ;;  %v10490_v29 = vpack.c.bf16 %v6003_v13, %v6002_v18  ;;  %v6157_v55 = vrot.slane %v6156_v39, 4  ;;  %v10493_v19 = vmax.bf16 %v10425_v28, %v6138_v25  ;;  %v8124_v30 = vrot.slane %v6277_v14, 9 }
 0x51b   : > { %6090 = vst [vmem:[#allocation2 + $0x30] sm:$0xff] %v10477_v32  ;;  %v5831_v34 = vpop.f32.mrb[32].mxu0  ;;  %v10496_v35 = vrot.slane %v6159_v27, 5  ;;  %v10498_v38 = vrot.slane %v6173_v23, 4  ;;  %v6305_v41 = vrot.slane %v10469_v17, 5  ;;  %v6364_v52 = vshrl.u32 %v6277_v14, 16 }
 0x51c   : > { %6091 = vst [vmem:[#allocation2 + $0x38] sm:$0xff] %v10490_v29  ;;  %v6004_v37 = vadd.f32 %v10402_v22, %v5831_v34  ;;  %v5957_v45 = vpop.f32.mrb[32].mxu1  ;;  %v5833_v24 = vpop.f32.mrb[33].mxu0  ;;  %v6299_v28 = vsel %vm10485_vm8, %v8124_v30, %v6298_v53  ;;  %v6367_v16 = vshll.u32 %v6277_v14, 16  ;;  %v6373_v42 = vrot.slane %v6135_v47, 6 }
 0x51d   : > { %v6006_v48 = vadd.f32 %v10405_v43, %v5957_v45  ;;  %v6005_v58 = vadd.f32 %v10408_v59, %v5833_v24  ;;  %v5959_v57 = vpop.f32.mrb[33].mxu1  ;;  %v5835_v62 = vpop.f32.mrb[34].mxu0  ;;  %v6162_v33 = vsel %vm10465_vm5, %v6157_v55, %v10496_v35  ;;  %v6306_v56 = vsel %vm10485_vm8, %v6304_v12, %v6305_v41  ;;  %v6278_v30 = vld [vmem:[#allocation2 + $0x8] sm:$0xee] }
 0x51e   : > { %v6007_v5 = vadd.f32 %v10411_v20, %v5959_v57  ;;  %v6008_v53 = vadd.f32 %v10402_v22, %v5835_v62  ;;  %v5961_v47 = vpop.f32.mrb[34].mxu1  ;;  %v5837_v0 = vpop.f32.mrb[35].mxu0  ;;  %v6267_v1 = vmax.bf16 %v10438_v9, %v6162_v33  ;;  %v6346_v3 = vmax.bf16 %v6299_v28, %v10493_v19 }
 0x51f   : > { %v10518_v4 = vpack.c.bf16 %v6005_v58, %v6004_v37  ;;  %v6010_v6 = vadd.f32 %v10405_v43, %v5961_v47  ;;  %v6009_v18 = vadd.f32 %v10408_v59, %v5837_v0  ;;  %v5963_v40 = vpop.f32.mrb[35].mxu1  ;;  %v6366_v49 = vrot.slane %v6364_v52, 5 }
 0x520   : > { %v10522_v61 = vpack.c.bf16 %v6007_v5, %v6006_v48  ;;  %v6011_v12 = vadd.f32 %v10411_v20, %v5963_v40  ;;  %v6348_v13 = vmax.bf16 %v6306_v56, %v6267_v1  ;;  %v6369_v22 = vrot.slane %v6367_v16, 6 }
 0x521   : > { %6092 = vst [vmem:[#allocation2 + $0x40] sm:$0xff] %v10518_v4  ;;  %v10526_v39 = vpack.c.bf16 %v6009_v18, %v6008_v53  ;;  %v6374_v9 = vor.u32 %v6373_v42, %v6372_v21  ;;  %v6390_v14 = vrot.slane %v6173_v23, 5  ;;  %v6391_v25 = vrot.slane %v6159_v27, 6  ;;  %v10560_v53 = vld [vmem:[#allocation2 + $0x60] sm:$0xff] }
 0x522   : > { %6093 = vst [vmem:[#allocation2 + $0x48] sm:$0xff] %v10522_v61  ;;  %v10529_v43 = vpack.c.bf16 %v6011_v12, %v6010_v6  ;;  %v6370_v20 = vor.u32 %v6369_v22, %v6366_v49  ;;  %v6146_v55 = vor.u32 %v10457_v54, %v10455_v50  ;;  %v6149_v19 = vshll.u32 %v10445_v26, 16 }
 0x523   : > { %6094 = vst [vmem:[#allocation2 + $0x50] sm:$0xff] %v10526_v39  ;;  %v6389_v21 = vrot.slane %v6374_v9, 4  ;;  %v10541_v27 = vor.u32 %v6391_v25, %v6390_v14  ;;  %v6163_v23 = vshrl.u32 %v10445_v26, 16  ;;  %v6169_v34 = vshll.u32 %v10473_v63, 16 }
 0x524   : > { %6095 = vst [vmem:[#allocation2 + $0x58] sm:$0xff] %v10529_v43  ;;  %v6371_v52 = vrot.slane %v6370_v20, 4  ;;  %v6147_v37 = vrot.slane %v6146_v55, 4  ;;  %v6151_v45 = vrot.slane %v6149_v19, 5  ;;  %v6183_v24 = vshrl.u32 %v10473_v63, 16 }
 0x525   : > { %v6393_v50 = vsel %vm10533_vm9, %v6389_v21, %v10541_v27  ;;  %v6165_v54 = vrot.slane %v6163_v23, 4  ;;  %v10550_v28 = vrot.slane %v6169_v34, 5  ;;  %v8125_v16 = vrot.slane %v6278_v30, 9 }
 0x526   : > { %v6375_v42 = vsel %vm10533_vm9, %v6371_v52, %v6374_v9  ;;  %v6463_v48 = vmax.bf16 %v6393_v50, %v6348_v13  ;;  %v6152_v58 = vsel %vm10465_vm5, %v6147_v37, %v6151_v45  ;;  %v10556_v57 = vrot.slane %v6183_v24, 4 }
 0x527   : > { %v6461_v62 = vmax.bf16 %v6375_v42, %v6346_v3  ;;  %v6166_v33 = vor.u32 %v6165_v54, %v6151_v45  ;;  %v6266_v56 = vmax.bf16 %v10431_v36, %v6152_v58  ;;  %v6302_v5 = vrot.slane %v10445_v26, 5 }
 0x528   : > { %v6475_v47 = vmax.bf16 %v10560_v53, %v6463_v48  ;;  %v6308_v0 = vrot.slane %v10473_v63, 5  ;;  %v6377_v1 = vshrl.u32 %v6278_v30, 16  ;;  %v6380_v6 = vshll.u32 %v6278_v30, 16 }
 0x529   : > { %v6473_v18 = vmax.bf16 %v10560_v53, %v6461_v62  ;;  %v6167_v40 = vrot.slane %v6166_v33, 4  ;;  %v6303_v49 = vsel %vm10485_vm8, %v8125_v16, %v6302_v5  ;;  %v6307_v3 = vrot.slane %v6302_v5, 4 }
 0x52a   : > { %v6347_v12 = vmax.bf16 %v6303_v49, %v6266_v56  ;;  %v6379_v13 = vrot.slane %v6377_v1, 5  ;;  %v6382_v36 = vrot.slane %v6380_v6, 6  ;;  %v6385_v22 = vrot.slane %v6163_v23, 5 }
 0x52b   : > { %v8126_v9 = vcombine.low %v6473_v18, %v6475_v47  ;;  %v8127_v14 = vcombine.high %v6473_v18, %v6475_v47  ;;  %v6172_v25 = vsel %vm10465_vm5, %v6167_v40, %v10550_v28  ;;  %v6309_v20 = vsel %vm10485_vm8, %v6307_v3, %v6308_v0 }
 0x52c   : > { %v6268_v55 = vmax.bf16 %v10445_v26, %v6172_v25  ;;  %v6383_v30 = vor.u32 %v6382_v36, %v6379_v13  ;;  %v6386_v21 = vrot.slane %v6149_v19, 6  ;;  %v6395_v52 = vrot.slane %v6183_v24, 5 }
 0x52d   : > { %6833 = vmatprep.mubr.bf16.mxu0 %v8127_v14  ;;  %v6396_v37 = vrot.slane %v6169_v34, 6  ;;  %v6176_v23 = vor.u32 %v10498_v38, %v10496_v35  ;;  %v6179_v45 = vshll.u32 %v10477_v32, 16  ;;  %v6193_v50 = vshrl.u32 %v10477_v32, 16 }
 0x52e   : > { %v6349_v54 = vmax.bf16 %v6309_v20, %v6268_v55  ;;  %v6384_v16 = vrot.slane %v6383_v30, 4  ;;  %v6387_v42 = vor.u32 %v6386_v21, %v6385_v22  ;;  %6834 = vmatmul.mubr.bf16.vlgmr.msra.gmra.mrb[36].mxu0 %v8126_v9  ;;  %v6199_v48 = vshll.u32 %v10518_v4, 16 }
 0x52f   : > { %v10580_v58 = vor.u32 %v6396_v37, %v6395_v52  ;;  %v6177_v26 = vrot.slane %v6176_v23, 4  ;;  %v6181_v19 = vrot.slane %v6179_v45, 5  ;;  %v6195_v24 = vrot.slane %v6193_v50, 4 }
 0x530   : > { %v6388_v34 = vsel %vm10533_vm9, %v6384_v16, %v6387_v42  ;;  %v6394_v62 = vrot.slane %v6387_v42, 4  ;;  %v10584_v35 = vrot.slane %v6199_v48, 5  ;;  %v6213_v38 = vshrl.u32 %v10518_v4, 16 }
 0x531   : > { %v6462_v33 = vmax.bf16 %v6388_v34, %v6347_v12  ;;  %v6182_v56 = vsel %vm10465_vm5, %v6177_v26, %v6181_v19  ;;  %v6196_v5 = vor.u32 %v6195_v24, %v6181_v19  ;;  %v6310_v47 = vrot.slane %v6305_v41, 4 }
 0x532   : > { %v6398_v1 = vsel %vm10533_vm9, %v6394_v62, %v10580_v58  ;;  %v10594_v6 = vrot.slane %v6213_v38, 4  ;;  %v6269_v18 = vmax.bf16 %v10469_v17, %v6182_v56  ;;  %v6311_v40 = vrot.slane %v10477_v32, 5 }
 0x533   : > { %v6464_v49 = vmax.bf16 %v6398_v1, %v6349_v54  ;;  %v6474_v3 = vmax.bf16 %v10560_v53, %v6462_v33  ;;  %v6197_v12 = vrot.slane %v6196_v5, 4  ;;  %v6317_v13 = vrot.slane %v10518_v4, 5 }
 0x534   : > { %v6312_v36 = vsel %vm10485_vm8, %v6310_v47, %v6311_v40  ;;  %v6316_v41 = vrot.slane %v6311_v40, 4  ;;  %v6399_v22 = vrot.slane %v10541_v27, 4  ;;  %v6400_v9 = vrot.slane %v6193_v50, 5 }
 0x535   : > { %v6476_v14 = vmax.bf16 %v10560_v53, %v6464_v49  ;;  %v6202_v17 = vsel %vm10465_vm5, %v6197_v12, %v10584_v35  ;;  %v6350_v25 = vmax.bf16 %v6312_v36, %v6269_v18  ;;  %v6401_v20 = vrot.slane %v6179_v45, 6 }
 0x536   : > { %v6271_v55 = vmax.bf16 %v10477_v32, %v6202_v17  ;;  %v6318_v30 = vsel %vm10485_vm8, %v6316_v41, %v6317_v13  ;;  %v6410_v21 = vrot.slane %v6213_v38, 5  ;;  %v6411_v52 = vrot.slane %v6199_v48, 6 }
 0x537   : > { %v8128_v37 = vcombine.low %v6474_v3, %v6476_v14  ;;  %v8129_v23 = vcombine.high %v6474_v3, %v6476_v14  ;;  %v6402_v54 = vor.u32 %v6401_v20, %v6400_v9  ;;  %v6186_v27 = vor.u32 %v10556_v57, %v10550_v28 }
 0x538   : > { %v6352_v50 = vmax.bf16 %v6318_v30, %v6271_v55  ;;  %v10612_v16 = vor.u32 %v6411_v52, %v6410_v21  ;;  %v6189_v42 = vshll.u32 %v10490_v29, 16  ;;  %v6203_v45 = vshrl.u32 %v10490_v29, 16 }
 0x539   : > { %6890 = vmatprep.mubr.bf16.mxu1 %v8129_v23  ;;  %v6403_v32 = vsel %vm10533_vm9, %v6399_v22, %v6402_v54  ;;  %v6409_v26 = vrot.slane %v6402_v54, 4  ;;  %v6187_v19 = vrot.slane %v6186_v27, 4  ;;  %v6209_v48 = vshll.u32 %v10522_v61, 16 }
 0x53a   : > { %6891 = vmatmul.mubr.bf16.vlgmr.msra.gmra.mrb[36].mxu1 %v8128_v37  ;;  %v6465_v24 = vmax.bf16 %v6403_v32, %v6350_v25  ;;  %v6191_v34 = vrot.slane %v6189_v42, 5  ;;  %v6205_v62 = vrot.slane %v6203_v45, 4  ;;  %v6223_v28 = vshrl.u32 %v10522_v61, 16 }
 0x53b   : > { %v6413_v57 = vsel %vm10533_vm9, %v6409_v26, %v10612_v16  ;;  %v10623_v38 = vrot.slane %v6209_v48, 5  ;;  %v6313_v33 = vrot.slane %v6308_v0, 4  ;;  %v6314_v56 = vrot.slane %v10490_v29, 5 }
 0x53c   : > { %v6467_v5 = vmax.bf16 %v6413_v57, %v6352_v50  ;;  %v6477_v47 = vmax.bf16 %v10560_v53, %v6465_v24  ;;  %v6192_v1 = vsel %vm10465_vm5, %v6187_v19, %v6191_v34  ;;  %v6206_v18 = vor.u32 %v6205_v62, %v6191_v34 }
 0x53d   : > { %v6225_v40 = vrot.slane %v6223_v28, 4  ;;  %v6270_v49 = vmax.bf16 %v10473_v63, %v6192_v1  ;;  %v6315_v3 = vsel %vm10485_vm8, %v6313_v33, %v6314_v56  ;;  %v6319_v12 = vrot.slane %v6314_v56, 4 }
 0x53e   : > { %v6479_v36 = vmax.bf16 %v10560_v53, %v6467_v5  ;;  %v6207_v41 = vrot.slane %v6206_v18, 4  ;;  %v6320_v0 = vrot.slane %v10522_v61, 5  ;;  %v6404_v22 = vrot.slane %v10580_v58, 4 }
 0x53f   : > { %v6351_v9 = vmax.bf16 %v6315_v3, %v6270_v49  ;;  %v6405_v14 = vrot.slane %v6203_v45, 5  ;;  %v6406_v17 = vrot.slane %v6189_v42, 6  ;;  %v6415_v25 = vrot.slane %v6223_v28, 5 }
 0x540   : > { %v8131_v20 = vcombine.high %v6477_v47, %v6479_v36  ;;  %v6212_v63 = vsel %vm10465_vm5, %v6207_v41, %v10623_v38  ;;  %v6321_v55 = vsel %vm10485_vm8, %v6319_v12, %v6320_v0  ;;  %v6416_v30 = vrot.slane %v6209_v48, 6 }
 0x541   : > { %v6272_v21 = vmax.bf16 %v10490_v29, %v6212_v63  ;;  %v6407_v52 = vor.u32 %v6406_v17, %v6405_v14  ;;  %v8130_v37 = vcombine.low %v6477_v47, %v6479_v36  ;;  %v6216_v58 = vor.u32 %v10594_v6, %v10584_v35  ;;  %v6121_v17 = vld [vmem:[#allocation2 + $0x68] sm:$0x11] }
 0x542   : > { %6841 = vmatprep.mubr.bf16.mxu0 %v8131_v20  ;;  %v10645_v23 = vor.u32 %v6416_v30, %v6415_v25  ;;  %v6219_v54 = vshll.u32 %v10526_v39, 16  ;;  %v6233_v27 = vshrl.u32 %v10526_v39, 16  ;;  %v6322_v50 = vrot.slane %v6317_v13, 4 }
 0x543   : > { %v6353_v42 = vmax.bf16 %v6321_v55, %v6272_v21  ;;  %v6408_v45 = vsel %vm10533_vm9, %v6404_v22, %v6407_v52  ;;  %v6414_v32 = vrot.slane %v6407_v52, 4  ;;  %6842 = vmatmul.mubr.bf16.gmra.mrb[40].mxu0 %v8130_v37  ;;  %v6217_v29 = vrot.slane %v6216_v58, 4 }
 0x544   : > { %v6466_v26 = vmax.bf16 %v6408_v45, %v6351_v9  ;;  %v6221_v19 = vrot.slane %v6219_v54, 5  ;;  %v6235_v48 = vrot.slane %v6233_v27, 4  ;;  %v6323_v35 = vrot.slane %v10526_v39, 5 }
 0x545   : > { %v6418_v6 = vsel %vm10533_vm9, %v6414_v32, %v10645_v23  ;;  %v6419_v24 = vrot.slane %v10612_v16, 4  ;;  %v6420_v34 = vrot.slane %v6233_v27, 5  ;;  %v6421_v13 = vrot.slane %v6219_v54, 6 }
 0x546   : > { %v6468_v62 = vmax.bf16 %v6418_v6, %v6353_v42  ;;  %v6478_v28 = vmax.bf16 %v10560_v53, %v6466_v26  ;;  %v6222_v57 = vsel %vm10465_vm5, %v6217_v29, %v6221_v19  ;;  %v6236_v33 = vor.u32 %v6235_v48, %v6221_v19 }
 0x547   : > { %v6273_v56 = vmax.bf16 %v10518_v4, %v6222_v57  ;;  %v6324_v5 = vsel %vm10485_vm8, %v6322_v50, %v6323_v35  ;;  %v6328_v47 = vrot.slane %v6323_v35, 4  ;;  %v6422_v1 = vor.u32 %v6421_v13, %v6420_v34 }
 0x548   : > { %v6480_v18 = vmax.bf16 %v10560_v53, %v6468_v62  ;;  %v6237_v49 = vrot.slane %v6236_v33, 4  ;;  %v6226_v16 = vor.u32 %v6225_v40, %v10623_v38  ;;  %v6229_v3 = vshll.u32 %v10529_v43, 16 }
 0x549   : > { %v6354_v12 = vmax.bf16 %v6324_v5, %v6273_v56  ;;  %v6423_v36 = vsel %vm10533_vm9, %v6419_v24, %v6422_v1  ;;  %v6429_v41 = vrot.slane %v6422_v1, 4  ;;  %v6444_v22 = vshll.u32 %v10429_v7, 16 }
 0x54a   : > { %v8133_v4 = vcombine.high %v6478_v28, %v6480_v18  ;;  %v8132_v9 = vcombine.low %v6478_v28, %v6480_v18  ;;  %v6242_v14 = vsel %vm10465_vm5, %v6237_v49, %v10434_v31  ;;  %v6227_v25 = vrot.slane %v6226_v16, 4 }
 0x54b   : > { %v6275_v20 = vmax.bf16 %v10526_v39, %v6242_v14  ;;  %v6469_v38 = vmax.bf16 %v6423_v36, %v6354_v12  ;;  %v6231_v40 = vrot.slane %v6229_v3, 5  ;;  %v6249_v63 = vshll.u32 %v6121_v17, 16 }
 0x54c   : > { %6898 = vmatprep.mubr.bf16.mxu1 %v8133_v4  ;;  %v6330_v55 = vsel %vm10485_vm8, %v6328_v47, %v6329_v60  ;;  %v6243_v30 = vshrl.u32 %v10529_v43, 16  ;;  %v6325_v21 = vrot.slane %v6320_v0, 4  ;;  %v6326_v52 = vrot.slane %v10529_v43, 5 }
 0x54d   : > { %6899 = vmatmul.mubr.bf16.gmra.mrb[40].mxu1 %v8132_v9  ;;  %v6356_v31 = vmax.bf16 %v6330_v55, %v6275_v20  ;;  %v6232_v37 = vsel %vm10465_vm5, %v6227_v25, %v6231_v40  ;;  %v6426_v39 = vrot.slane %v6229_v3, 6  ;;  %v6438_v44 = vsel %vm10533_vm9, %v6429_v41, %v6437_v2 }
 0x54e   : > { %v6245_v58 = vrot.slane %v6243_v30, 4  ;;  %v6274_v60 = vmax.bf16 %v10522_v61, %v6232_v37  ;;  %v6327_v0 = vsel %vm10485_vm8, %v6325_v21, %v6326_v52  ;;  %v6424_v27 = vrot.slane %v10645_v23, 4 }
 0x54f   : > { %v6471_v54 = vmax.bf16 %v6438_v44, %v6356_v31  ;;  %v6425_v50 = vrot.slane %v6243_v30, 5  ;;  %v6443_v42 = vrot.slane %v6441_v15, 5  ;;  %v6251_v32 = vrot.slane %v6249_v63, 5 }
 0x550   : > { %v6246_v45 = vor.u32 %v6245_v58, %v6231_v40  ;;  %v6355_v29 = vmax.bf16 %v6327_v0, %v6274_v60  ;;  %v6446_v51 = vrot.slane %v6444_v22, 6  ;;  %v6481_v46 = vmax.bf16 %v10560_v53, %v6469_v38 }
 0x551   : > { %v6483_v2 = vmax.bf16 %v10560_v53, %v6471_v54  ;;  %v6427_v26 = vor.u32 %v6426_v39, %v6425_v50  ;;  %v6331_v19 = vrot.slane %v6326_v52, 4  ;;  %v6332_v48 = vrot.slane %v6121_v17, 5 }
 0x552   : > { %v6247_v61 = vrot.slane %v6246_v45, 4  ;;  %v6447_v24 = vor.u32 %v6446_v51, %v6443_v42  ;;  %v10705_v3 = vand.u32 127, %v591_v10 }
 0x553   : > { %v8135_v35 = vcombine.high %v6481_v46, %v6483_v2  ;;  %v6428_v23 = vsel %vm10533_vm9, %v6424_v27, %v6427_v26  ;;  %v8134_v6 = vcombine.low %v6481_v46, %v6483_v2  ;;  %v6439_v15 = vrot.slane %v6427_v26, 4 }
 0x554   : > { %v6252_v7 = vsel %vm10465_vm5, %v6247_v61, %v6251_v32  ;;  %v6470_v34 = vmax.bf16 %v6428_v23, %v6355_v29  ;;  %v6333_v62 = vsel %vm10485_vm8, %v6331_v19, %v6332_v48  ;;  %vm6917_vm10 = vcmp.eq.s32.totalorder %v10705_v3, 0 }
 0x555   : > { %6849 = vmatprep.mubr.bf16.mxu0 %v8135_v35  ;;  %v6276_v13 = vmax.bf16 %v10529_v43, %v6252_v7  ;;  %v6448_v57 = vsel %vm10533_vm9, %v6439_v15, %v6447_v24  ;;  %vm6930_vm11 = vcmp.eq.s32.totalorder %v10705_v3, 1  ;;  %vm6967_vm12 = vcmp.eq.s32.totalorder %v10705_v3, 2 }
 0x556   : > { %6850 = vmatmul.mubr.bf16.gmra.mrb[44].mxu0 %v8134_v6  ;;  %v6482_v56 = vmax.bf16 %v10560_v53, %v6470_v34  ;;  %vm7004_vm13 = vcmp.eq.s32.totalorder %v10705_v3, 3  ;;  %vm7041_vm14 = vcmp.eq.s32.totalorder %v10705_v3, 4  ;;  %vm7078_vm15 = vcmp.eq.s32.totalorder %v10705_v3, 5 }
 0x557   : > { %v6357_v28 = vmax.bf16 %v6333_v62, %v6276_v13  ;;  %vm7115_vm0 = vcmp.eq.s32.totalorder %v10705_v3, 6  ;;  %vm7152_vm2 = vcmp.eq.s32.totalorder %v10705_v3, 7  ;;  %vm7017_vm5 = vcmask 1044480  }
 0x558   : > { %vm7165_vm8 = vcmask 1040384   ;;  %vm7189_vm9 = vcmask 64512  }
 0x559   : > { %v6472_v33 = vmax.bf16 %v6448_v57, %v6357_v28 }
 0x55b   : > { %v6484_v11 = vmax.bf16 %v10560_v53, %v6472_v33 }
 0x55d   : > { %v8137_v5 = vcombine.high %v6482_v56, %v6484_v11  ;;  %v8136_v47 = vcombine.low %v6482_v56, %v6484_v11 }
 0x55f   : > { %6906 = vmatprep.mubr.bf16.mxu1 %v8137_v5 }
 0x560   : > { %6907 = vmatmul.mubr.bf16.gmra.mrb[44].mxu1 %v8136_v47 }
 0x601   : > { %v8229_v1 = vpop.f32.mrb[36].mxu0 }
 0x602   : > { %v8230_v18 = vpop.f32.mrb[37].mxu0 }
 0x603   : > { %v8231_v43 = vadd.f32 %v8230_v18, %v8229_v1  ;;  %v8232_v49 = vpop.f32.mrb[38].mxu0 }
 0x604   : > { %v8233_v8 = vpop.f32.mrb[39].mxu0 }
 0x605   : > { %v8234_v16 = vadd.f32 %v8233_v8, %v8232_v49 }
 0x60d   : > { %v8263_v59 = vpop.f32.mrb[36].mxu1 }
 0x60e   : > { %v8264_v12 = vpop.f32.mrb[37].mxu1 }
 0x60f   : > { %v8265_v36 = vadd.f32 %v8264_v12, %v8263_v59  ;;  %v8266_v41 = vpop.f32.mrb[38].mxu1 }
 0x610   : > { %v8267_v53 = vpop.f32.mrb[39].mxu1 }
 0x611   : > { %v6893_v10 = vadd.f32 %v8265_v36, %v8231_v43  ;;  %v8268_v22 = vadd.f32 %v8267_v53, %v8266_v41 }
 0x613   : > { %v6896_v4 = vadd.f32 %v8268_v22, %v8234_v16  ;;  %v6918_v9 = vsel %vm6917_vm10, %v6893_v10, 0.0  ;;  %v6931_v14 = vsel %vm6930_vm11, %v6893_v10, 0.0  ;;  %v6968_v17 = vsel %vm6967_vm12, %v6893_v10, 0.0 }
 0x614   : > { %v6944_v25 = vrot.slane %v6931_v14, 1  ;;  %v6981_v20 = vrot.slane %v6968_v17, 2  ;;  %v7005_v38 = vsel %vm7004_vm13, %v6893_v10, 0.0  ;;  %v7042_v40 = vsel %vm7041_vm14, %v6893_v10, 0.0 }
 0x615   : > { %v10727_v63 = vsel %vm6930_vm11, %v6896_v4, 0.0  ;;  %v10731_v55 = vsel %vm6967_vm12, %v6896_v4, 0.0  ;;  %v10735_v30 = vsel %vm7004_vm13, %v6896_v4, 0.0  ;;  %v7018_v21 = vrot.slane %v7005_v38, 3 }
 0x616   : > { %v8235_v52 = vpop.f32.mrb[40].mxu0  ;;  %v6945_v31 = vrot.slane %v10727_v63, 1  ;;  %v6982_v37 = vrot.slane %v10731_v55, 2  ;;  %v7019_v39 = vrot.slane %v10735_v30, 3  ;;  %v10742_v44 = vsel %vm7041_vm14, %v6896_v4, 0.0 }
 0x617   : > { %v8236_v58 = vpop.f32.mrb[41].mxu0  ;;  %v7055_v60 = vrot.slane %v7042_v40, 4  ;;  %v7056_v0 = vrot.slane %v10742_v44, 4  ;;  %v7079_v54 = vsel %vm7078_vm15, %v6893_v10, 0.0  ;;  %v10749_v27 = vsel %vm7078_vm15, %v6896_v4, 0.0 }
 0x618   : > { %v8237_v50 = vadd.f32 %v8236_v58, %v8235_v52  ;;  %v8238_v42 = vpop.f32.mrb[42].mxu0  ;;  %v6946_v45 = vsel %vm6943_vm1, %v6944_v25, %v6945_v31  ;;  %v6983_v32 = vsel %vm6980_vm4, %v6981_v20, %v6982_v37  ;;  %v7020_v29 = vsel %vm7017_vm5, %v7018_v21, %v7019_v39 }
 0x619   : > { %v8239_v51 = vpop.f32.mrb[43].mxu0  ;;  %v6961_v46 = vadd.f32 %v6946_v45, %v6918_v9  ;;  %v7057_v2 = vsel %vm7054_vm6, %v7055_v60, %v7056_v0  ;;  %v7092_v26 = vrot.slane %v7079_v54, 5  ;;  %v7093_v61 = vrot.slane %v10749_v27, 5 }
 0x61a   : > { %v8240_v19 = vadd.f32 %v8239_v51, %v8238_v42  ;;  %v7116_v48 = vsel %vm7115_vm0, %v6893_v10, 0.0  ;;  %v7117_v35 = vsel %vm7115_vm0, %v6896_v4, 0.0  ;;  %v7153_v23 = vsel %vm7152_vm2, %v6893_v10, 0.0 }
 0x61b   : > { %v6998_v6 = vadd.f32 %v6983_v32, %v6961_v46  ;;  %v7094_v7 = vsel %vm6293_vm3, %v7092_v26, %v7093_v61  ;;  %v7129_v15 = vrot.slane %v7116_v48, 6  ;;  %v7130_v24 = vrot.slane %v7117_v35, 6 }
 0x61c   : > { %v7154_v34 = vsel %vm7152_vm2, %v6896_v4, 0.0  ;;  %v7166_v28 = vrot.slane %v7153_v23, 7  ;;  %v6919_v12 = vsel %vm6917_vm10, %v6896_v4, 0.0 }
 0x61d   : > { %v7035_v13 = vadd.f32 %v7020_v29, %v6998_v6  ;;  %v7131_v62 = vsel %vm7128_vm7, %v7129_v15, %v7130_v24  ;;  %v7167_v57 = vrot.slane %v7154_v34, 7 }
 0x61f   : > { %v7072_v33 = vadd.f32 %v7057_v2, %v7035_v13  ;;  %v7168_v56 = vsel %vm7165_vm8, %v7166_v28, %v7167_v57 }
 0x620   : > { %v8269_v11 = vpop.f32.mrb[40].mxu1 }
 0x621   : > { %v8270_v5 = vpop.f32.mrb[41].mxu1  ;;  %v7109_v47 = vadd.f32 %v7094_v7, %v7072_v33 }
 0x622   : > { %v8271_v1 = vadd.f32 %v8270_v5, %v8269_v11  ;;  %v8272_v18 = vpop.f32.mrb[42].mxu1 }
 0x623   : > { %v8273_v43 = vpop.f32.mrb[43].mxu1  ;;  %v7146_v49 = vadd.f32 %v7131_v62, %v7109_v47 }
 0x624   : > { %v6901_v8 = vadd.f32 %v8271_v1, %v8237_v50  ;;  %v8274_v16 = vadd.f32 %v8273_v43, %v8272_v18 }
 0x625   : > { %v7183_v59 = vadd.f32 %v7168_v56, %v7146_v49 }
 0x626   : > { %v10771_v36 = vadd.f32 %v8274_v16, %v8240_v19  ;;  %v6933_v41 = vsel %vm6930_vm11, %v6901_v8, 0.0  ;;  %v6970_v53 = vsel %vm6967_vm12, %v6901_v8, 0.0  ;;  %v7007_v10 = vsel %vm7004_vm13, %v6901_v8, 0.0 }
 0x627   : > { %v7190_v22 = vsel %vm7189_vm9, %v7183_v59, 0.0  ;;  %v6947_v9 = vrot.slane %v6933_v41, 1  ;;  %v6984_v14 = vrot.slane %v6970_v53, 2  ;;  %v7021_v17 = vrot.slane %v7007_v10, 3 }
 0x628   : > { %7191 = vadd.xlane.f32.xlu0 %v7190_v22  ;;  %v7044_v4 = vsel %vm7041_vm14, %v6901_v8, 0.0  ;;  %v7081_v25 = vsel %vm7078_vm15, %v6901_v8, 0.0  ;;  %v7118_v20 = vsel %vm7115_vm0, %v6901_v8, 0.0  ;;  %v7155_v38 = vsel %vm7152_vm2, %v6901_v8, 0.0 }
 0x629   : > { %v8241_v40 = vpop.f32.mrb[44].mxu0  ;;  %v6948_v63 = vsel %vm6943_vm1, %v6945_v31, %v6947_v9  ;;  %v6985_v55 = vsel %vm6980_vm4, %v6982_v37, %v6984_v14  ;;  %v7022_v30 = vsel %vm7017_vm5, %v7019_v39, %v7021_v17  ;;  %v7058_v21 = vrot.slane %v7044_v4, 4 }
 0x62a   : > { %v8242_v52 = vpop.f32.mrb[45].mxu0  ;;  %v6962_v58 = vadd.f32 %v6948_v63, %v6919_v12  ;;  %v7095_v60 = vrot.slane %v7081_v25, 5  ;;  %v7132_v54 = vrot.slane %v7118_v20, 6  ;;  %v7169_v27 = vrot.slane %v7155_v38, 7 }
 0x62b   : > { %v8243_v50 = vadd.f32 %v8242_v52, %v8241_v40  ;;  %v8244_v42 = vpop.f32.mrb[46].mxu0  ;;  %v7059_v45 = vsel %vm7054_vm6, %v7056_v0, %v7058_v21  ;;  %v6920_v32 = vsel %vm6917_vm10, %v6901_v8, 0.0  ;;  %v6934_v31 = vsel %vm6930_vm11, %v10771_v36, 0.0 }
 0x62c   : > { %v8245_v37 = vpop.f32.mrb[47].mxu0  ;;  %v6999_v39 = vadd.f32 %v6985_v55, %v6962_v58  ;;  %v7096_v29 = vsel %vm6293_vm3, %v7093_v61, %v7095_v60  ;;  %v7133_v51 = vsel %vm7128_vm7, %v7130_v24, %v7132_v54  ;;  %v7170_v46 = vsel %vm7165_vm8, %v7167_v57, %v7169_v27 }
 0x62d   : > { %v8246_v2 = vadd.f32 %v8245_v37, %v8244_v42  ;;  %v6949_v26 = vrot.slane %v6934_v31, 1  ;;  %v6971_v44 = vsel %vm6967_vm12, %v10771_v36, 0.0  ;;  %v7008_v0 = vsel %vm7004_vm13, %v10771_v36, 0.0 }
 0x62e   : > { %v7036_v19 = vadd.f32 %v7022_v30, %v6999_v39  ;;  %v6986_v48 = vrot.slane %v6971_v44, 2  ;;  %v7023_v35 = vrot.slane %v7008_v0, 3  ;;  %v7045_v61 = vsel %vm7041_vm14, %v10771_v36, 0.0 }
 0x62f   : > { %v6950_v23 = vsel %vm6943_vm1, %v6947_v9, %v6949_v26  ;;  %v7060_v6 = vrot.slane %v7045_v61, 4  ;;  %v7082_v7 = vsel %vm7078_vm15, %v10771_v36, 0.0  ;;  %v7119_v15 = vsel %vm7115_vm0, %v10771_v36, 0.0 }
 0x630   : > { %v7073_v24 = vadd.f32 %v7059_v45, %v7036_v19  ;;  %v6963_v34 = vadd.f32 %v6950_v23, %v6920_v32  ;;  %v6987_v13 = vsel %vm6980_vm4, %v6984_v14, %v6986_v48  ;;  %v7024_v62 = vsel %vm7017_vm5, %v7021_v17, %v7023_v35 }
 0x631   : > { %v7061_v28 = vsel %vm7054_vm6, %v7058_v21, %v7060_v6  ;;  %v7097_v57 = vrot.slane %v7082_v7, 5  ;;  %v7134_v33 = vrot.slane %v7119_v15, 6  ;;  %v7156_v56 = vsel %vm7152_vm2, %v10771_v36, 0.0 }
 0x632   : > { %v7110_v11 = vadd.f32 %v7096_v29, %v7073_v24  ;;  %v7000_v5 = vadd.f32 %v6987_v13, %v6963_v34  ;;  %v7171_v47 = vrot.slane %v7156_v56, 7  ;;  %v6921_v25 = vsel %vm6917_vm10, %v10771_v36, 0.0 }
 0x633   : > { %v8275_v1 = vpop.f32.mrb[44].mxu1  ;;  %v7098_v18 = vsel %vm6293_vm3, %v7095_v60, %v7097_v57  ;;  %v7135_v43 = vsel %vm7128_vm7, %v7132_v54, %v7134_v33 }
 0x634   : > { %v8276_v49 = vpop.f32.mrb[45].mxu1  ;;  %v7147_v8 = vadd.f32 %v7133_v51, %v7110_v11  ;;  %v7037_v16 = vadd.f32 %v7024_v62, %v7000_v5  ;;  %v7172_v59 = vsel %vm7165_vm8, %v7169_v27, %v7171_v47 }
 0x635   : > { %v8277_v12 = vadd.f32 %v8276_v49, %v8275_v1  ;;  %v8278_v41 = vpop.f32.mrb[46].mxu1 }
 0x636   : > { %v8279_v53 = vpop.f32.mrb[47].mxu1  ;;  %v7184_v10 = vadd.f32 %v7170_v46, %v7147_v8  ;;  %v7074_v22 = vadd.f32 %v7061_v28, %v7037_v16 }
 0x637   : > { %v6909_v9 = vadd.f32 %v8277_v12, %v8243_v50  ;;  %v8280_v14 = vadd.f32 %v8279_v53, %v8278_v41 }
 0x638   : > { %v7193_v17 = vsel %vm7189_vm9, %v7184_v10, 0.0  ;;  %v7111_v4 = vadd.f32 %v7098_v18, %v7074_v22 }
 0x639   : > { %v6912_v20 = vadd.f32 %v8280_v14, %v8246_v2  ;;  %7194 = vadd.xlane.f32.xlu0 %v7193_v17  ;;  %v6935_v38 = vsel %vm6930_vm11, %v6909_v9, 0.0  ;;  %v6972_v40 = vsel %vm6967_vm12, %v6909_v9, 0.0  ;;  %v7009_v63 = vsel %vm7004_vm13, %v6909_v9, 0.0 }
 0x63a   : > { %v7148_v55 = vadd.f32 %v7135_v43, %v7111_v4  ;;  %v6951_v30 = vrot.slane %v6935_v38, 1  ;;  %v6988_v21 = vrot.slane %v6972_v40, 2  ;;  %v7025_v52 = vrot.slane %v7009_v63, 3 }
 0x63b   : > { %v7046_v58 = vsel %vm7041_vm14, %v6909_v9, 0.0  ;;  %v7083_v36 = vsel %vm7078_vm15, %v6909_v9, 0.0  ;;  %v7120_v60 = vsel %vm7115_vm0, %v6909_v9, 0.0  ;;  %v7157_v54 = vsel %vm7152_vm2, %v6909_v9, 0.0 }
 0x63c   : > { %v7185_v27 = vadd.f32 %v7172_v59, %v7148_v55  ;;  %v6952_v50 = vsel %vm6943_vm1, %v6949_v26, %v6951_v30  ;;  %v6989_v42 = vsel %vm6980_vm4, %v6986_v48, %v6988_v21  ;;  %v7026_v45 = vsel %vm7017_vm5, %v7023_v35, %v7025_v52 }
 0x63d   : > { %v6964_v32 = vadd.f32 %v6952_v50, %v6921_v25  ;;  %v7062_v31 = vrot.slane %v7046_v58, 4  ;;  %v7099_v37 = vrot.slane %v7083_v36, 5  ;;  %v7136_v39 = vrot.slane %v7120_v60, 6  ;;  %v8170_v60 = vld [vmem:[#allocation4] ss:$0 sm:$0xff]  ;;  %v7211_v50 = vld [vmem:[%s10961_s12 + $0x8] sm:$0xff] }
 0x63e   : > { %v7196_v29 = vsel %vm7189_vm9, %v7185_v27, 0.0  ;;  %v7173_v51 = vrot.slane %v7157_v54, 7  ;;  %v6922_v46 = vsel %vm6917_vm10, %v6909_v9, 0.0  ;;  %v6936_v2 = vsel %vm6930_vm11, %v6912_v20, 0.0  ;;  %v7210_v27 = vld [vmem:[%s10961_s12] sm:$0xff] }
 0x63f   : > { %7197 = vadd.xlane.f32.xlu1 %v7196_v29  ;;  %v7001_v44 = vadd.f32 %v6989_v42, %v6964_v32  ;;  %v7063_v26 = vsel %vm7054_vm6, %v7060_v6, %v7062_v31  ;;  %v7100_v0 = vsel %vm6293_vm3, %v7097_v57, %v7099_v37  ;;  %v7137_v19 = vsel %vm7128_vm7, %v7134_v33, %v7136_v39  ;;  %v7213_v29 = vld [vmem:[%s10961_s12 + $0x18] sm:$0xff] }
 0x640   : > { %v7174_v48 = vsel %vm7165_vm8, %v7171_v47, %v7173_v51  ;;  %v6953_v35 = vrot.slane %v6936_v2, 1  ;;  %v6973_v61 = vsel %vm6967_vm12, %v6912_v20, 0.0  ;;  %v7010_v23 = vsel %vm7004_vm13, %v6912_v20, 0.0 }
 0x641   : > { %v7038_v7 = vadd.f32 %v7026_v45, %v7001_v44  ;;  %v6990_v15 = vrot.slane %v6973_v61, 2  ;;  %v7027_v24 = vrot.slane %v7010_v23, 3  ;;  %v7047_v34 = vsel %vm7041_vm14, %v6912_v20, 0.0 }
 0x642   : > { %v6954_v6 = vsel %vm6943_vm1, %v6951_v30, %v6953_v35  ;;  %v7064_v13 = vrot.slane %v7047_v34, 4  ;;  %v7084_v62 = vsel %vm7078_vm15, %v6912_v20, 0.0  ;;  %v7121_v28 = vsel %vm7115_vm0, %v6912_v20, 0.0 }
 0x643   : > { %v7075_v57 = vadd.f32 %v7063_v26, %v7038_v7  ;;  %v6965_v33 = vadd.f32 %v6954_v6, %v6922_v46  ;;  %v6991_v56 = vsel %vm6980_vm4, %v6988_v21, %v6990_v15  ;;  %v7028_v11 = vsel %vm7017_vm5, %v7025_v52, %v7027_v24  ;;  %v7214_v26 = vld [vmem:[%s10961_s12 + $0x20] sm:$0xff] }
 0x644   : > { %v7065_v5 = vsel %vm7054_vm6, %v7062_v31, %v7064_v13  ;;  %v7101_v47 = vrot.slane %v7084_v62, 5  ;;  %v7138_v1 = vrot.slane %v7121_v28, 6  ;;  %v7158_v18 = vsel %vm7152_vm2, %v6912_v20, 0.0  ;;  %v7209_v7 = vld [vmem:[%s10960_s11] sm:$0x3] }
 0x645   : > { %v7112_v43 = vadd.f32 %v7100_v0, %v7075_v57  ;;  %v7002_v49 = vadd.f32 %v6991_v56, %v6965_v33  ;;  %v7175_v8 = vrot.slane %v7158_v18, 7  ;;  %v6923_v16 = vsel %vm6917_vm10, %v6912_v20, 0.0 }
 0x646   : > { %v7102_v59 = vsel %vm6293_vm3, %v7099_v37, %v7101_v47  ;;  %v7139_v12 = vsel %vm7128_vm7, %v7136_v39, %v7138_v1  ;;  %v6966_v41 = vadd.f32 %v6953_v35, %v6923_v16  ;;  %v9751_v63 = vmov 0.0|0.0   ;;  %v7212_v39 = vld [vmem:[%s10961_s12 + $0x10] sm:$0xff] }
 0x647   : > { %v7149_v53 = vadd.f32 %v7137_v19, %v7112_v43  ;;  %v7039_v10 = vadd.f32 %v7028_v11, %v7002_v49  ;;  %v7176_v22 = vsel %vm7165_vm8, %v7173_v51, %v7175_v8  ;;  %8303 = vmatprep.subr.bf16.mxu0 %v9751_v63  ;;  %vm7205_vm3 = vcmask 57344   ;;  %v7215_v19 = vld [vmem:[%s10961_s12 + $0x28] sm:$0x1] }
 0x648   : > { %v7003_v9 = vadd.f32 %v6990_v15, %v6966_v41  ;;  %vm9752_vm10 = vmmov 0   ;;  %v9753_v36 = vmov 0.0   ;;  %vm9754_vm11 = vmmov 1  }
 0x649   : > { %v7186_v14 = vadd.f32 %v7174_v48, %v7149_v53  ;;  %v7076_v17 = vadd.f32 %v7065_v5, %v7039_v10  ;;  %8300 = vmatprep.mubr.msk.f32.mxu0 %vm9752_vm10, %v9753_v36  ;;  %vm8311_vm12 = vmpackc.low %vm7165_vm8, %vm9754_vm11  ;;  %vm7232_vm13 = vcmask 334848   ;;  %vm7309_vm14 = vcmask 189440  }
 0x64a   : > { %v7040_v4 = vadd.f32 %v7027_v24, %v7003_v9 }
 0x64b   : > { %v7199_v25 = vsel %vm7189_vm9, %v7186_v14, 0.0  ;;  %v7113_v38 = vadd.f32 %v7102_v59, %v7076_v17 }
 0x64c   : > { %7200 = vadd.xlane.f32.xlu1 %v7199_v25  ;;  %v7077_v40 = vadd.f32 %v7064_v13, %v7040_v4 }
 0x64d   : > { %v7150_v3 = vadd.f32 %v7139_v12, %v7113_v38 }
 0x64e   : > { %v7114_v20 = vadd.f32 %v7101_v47, %v7077_v40 }
 0x64f   : > { %v7187_v55 = vadd.f32 %v7176_v22, %v7150_v3 }
 0x650   : > { %v7151_v30 = vadd.f32 %v7138_v1, %v7114_v20 }
 0x651   : > { %v7202_v21 = vsel %vm7189_vm9, %v7187_v55, 0.0 }
 0x652   : > { %7203 = vadd.xlane.f32.xlu0 %v7202_v21  ;;  %v7188_v52 = vadd.f32 %v7175_v8, %v7151_v30 }
 0x654   : > { %v7206_v58 = vsel %vm7205_vm3, %v7188_v52, 0.0 }
 0x655   : > { %7207 = vadd.xlane.f32.xlu1 %v7206_v58 }
 0x668   : > { %7229 = vperm.xlu0 %8555, %v8170_v60  }
 0x6b5   : > { %v7192_v54 = vpop.xlane.xlu0 %7191 }
 0x6b6   : > { %v7216_v45 = vmul.f32 %v7210_v27, %v7192_v54 }
 0x6c6   : > { %v7195_v42 = vpop.xlane.xlu0 %7194 }
 0x6c7   : > { %v7217_v32 = vmul.f32 %v7211_v50, %v7195_v42 }
 0x6c9   : > { %v8304_v31 = vpack.c.bf16 %v7217_v32, %v7216_v45 }
 0x6cb   : > { %8305 = vmatpush3.bf16.msra.mxu0 %v8304_v31 }
 0x6cc   : > { %8306 = vmatprep.subr.bf16.mxu0 %v9751_v63  ;;  %v7198_v37 = vpop.xlane.xlu1 %7197 }
 0x6cd   : > { %v7218_v46 = vmul.f32 %v7212_v39, %v7198_v37 }
 0x6d9   : > { %v7201_v51 = vpop.xlane.xlu1 %7200 }
 0x6da   : > { %v7219_v2 = vmul.f32 %v7213_v29, %v7201_v51 }
 0x6dc   : > { %v8307_v44 = vpack.c.bf16 %v7219_v2, %v7218_v46 }
 0x6de   : > { %8308 = vmatpush3.bf16.msra.mxu0 %v8307_v44 }
 0x6df   : > { %8309 = vmatprep.subr.bf16.mxu0 %v9751_v63  ;;  %v7204_v0 = vpop.xlane.xlu0 %7203 }
 0x6e0   : > { %v7220_v35 = vmul.f32 %v7214_v26, %v7204_v0 }
 0x6e2   : > { %v7208_v48 = vpop.xlane.xlu1 %7207 }
 0x6e3   : > { %v7221_v61 = vmul.f32 %v7215_v19, %v7208_v48 }
 0x6e5   : > { %v8310_v23 = vpack.c.bf16 %v7221_v61, %v7220_v35 }
 0x6e7   : > { %8312 = vmatpush3.bf16.msk.msra.mxu0 %vm8311_vm12, %v8310_v23  ;;  %v7230_v15 = vpop.permute.xlu0 %7229 }
 0x6ea   : > { %8301 = vmatmul.mubr.msk.f32.vlgmr.msra.gmra.mrb[48].mxu0 %vm7232_vm13, %v7209_v7 }
 0x7bd   : > { %v7305_v24 = vpop.f32.mrb[48].mxu0 }
 0x7be   : > { %v8302_v34 = vpop.f32.mrb[49].mxu0  ;;  %v7306_v6 = vadd.f32 %v7305_v24, %v7230_v15 }
 0x7c0   : > { %7310 = vst.msk [vmem:[%s508_s18] sm:$0x3] %vm7309_vm14, %v7306_v6 }
 0x7c1   : > { %9680 = shalt.err (!%p9677_p0)
}
 0x7c2   : > { %s9681_s15 = scalar_lea.hbm %s10907_s27, 32  ;;  %s9685_s30 = scalar_lea.hbm %s11004_s13, 64 }
 0x7c3   : > { %p9682_p10 = scmp.ne.s32.totalorder %s10907_s27, %s9681_s15  ;;  %p9686_p4 = scmp.lt.u32.totalorder %s10907_s27, %s11004_s13 }
 0x7c4   : > { %p9687_p12 = scmp.lt.u32.totalorder %s9685_s30, %s9681_s15  ;;  %p9689_p8 = scmp.lt.u32.totalorder %s9681_s15, %s10907_s27 }
 0x7c5   : > { %p9683_p2 = pnand %p9682_p10, %p11005_p11 }
 0x7c6   : > { %p9688_p7 = por %p9687_p12, %p9686_p4 }
 0x7c7   : > { %p9684_p3 = pneg %p9683_p2 }
 0x7c8   : > { %p9690_p13 = por %p9689_p8, %p9688_p7 }
 0x7ca   : > { %p9691_p1 = pnand %p9690_p13, %p9684_p3 }
 0x7cc   : > { %9694 = shalt.err (!%p9691_p1)
}
 0x7cd   : > { %8478 = dma.vmem_to_hbm [thread:$0]  (%p11005_p11), %s10909_s29, 32, %s10907_s27, %s7312_s19  }
 0x7ce PF: > { %s11006_s24 = sld [smem:[#allocation21_spill]]  ;;  %s11007_s18 = sld [smem:[#allocation19_spill]] }
 0x7cf   : > { %s11008_s17 = sld [smem:[#allocation25_spill]] }
 0x7d4   : > { %p8510_p6 = scmp.ge.s32.totalorder %s11006_s24, 2  ;;  %s7337_s3 = sand.u32 1, %s11007_s18  }
 0x7d5   : > { %p11009_p9 = scmp.ne.s32.totalorder %s11008_s17, 0  ;;  %s7338_s22 = scalar_lea.sflag [#allocation7], %s7337_s3 }
 0x7d7   : > { %p8497_p5 = pnand %p8510_p6, %p11009_p9 }
 0x7d9   : > { %9724 = dma.done.wait (!%p8497_p5), %s7338_s22, 32  }
 0x7da   : > { %9726 = vsyncadd (!%p8497_p5), %s7338_s22, 4294967264  ;;  %s11010_s30 = sld [smem:[#allocation22_spill]]  ;;  %s11011_s10 = sld [smem:[#allocation20_spill]] }
 0x7db   : > { %s11012_s29 = sld [smem:[#allocation23_spill]]  ;;  %s11013_s27 = smov %s9733_s28 }
 0x7e0   : > { %p28_p0 = scmp.ge.s32.totalorder %s11010_s30, 4   ;;  %s11014_s28 = smov %s11011_s10 }
 0x7e2   :  { %30 = sbr.rel (!%p28_p0) target bundleno = 9 (0x9), region = 128 }
 0x7e9   :  { %7343 = vsyncpa [#allocation6], 1 }
 0x7ea   :  { %7345 = vsyncpa [#allocation6 + $0x1], 1 }
 0x7eb   :  { %7346 = vsyncpa [#allocation9], 1 }
 0x7ec   :  { %7347 = vsyncpa [#allocation12], 1 }
 0x7ed   :  { %7348 = vsyncpa [#allocation7], 1 }
 0x7ee   :  { %7350 = vsyncpa [#allocation7 + $0x1], 1 }

</bundles_post_ra>
